<compile_context>
chip_gen: v5e
topology: v5e:2x2
jax: 0.10.0
libtpu: 0.0.40
codegen_flags: <defaults>
</compile_context>

<pallas_src>
import math
import jax
import jax.numpy as jnp
from jax.experimental import pallas as pl
from jax.experimental.pallas import tpu as pltpu

# ---- module-level constants from the PyTorch script ----
b_j0 = 0.01
R_m = 1.0        # == 1, folded into the update equations below
BETA = 1.8       # isAdapt=1
DT = 1.0         # == 1, folded into the update equations below
NEG_BIG = -1e30  # value for padded output lanes so exp() underflows to 0 in the softmax


def _round_up(x, m):
    return ((x + m - 1) // m) * m


def _make_kernel(T, S_real):
    """Build the recurrent kernel for a static chunk length T and real sequence length S."""

    def rnn_kernel(xproj_ref,                       # (T, Bp, H1p)  precomputed x@W_ih1 + b
                   w_h11_ref,                       # (H1p, H1p)
                   w_l2_ref, b_l2_ref,              # (H1p+H2p, H2p), (1, H2p)  fused layer-2
                   w_h2o_ref, b_h2o_ref,            # (H2p, Op), (1, Op)
                   a1_ref, r1_ref, a2_ref, r2_ref, ao_ref,   # precomputed exp(-dt/tau)
                   mem1_init, mem2_init, memo_init,
                   out_ref, spk1_ref, mem1_traj_ref, memo_traj_ref,
                   mem1, spike1, bb1, mem2, spike2, bb2, memo):
        c = pl.program_id(0)

        @pl.when(c == 0)
        def _init():
            mem1[...] = mem1_init[...]
            mem2[...] = mem2_init[...]
            memo[...] = memo_init[...]
            spike1[...] = jnp.zeros_like(spike1)
            spike2[...] = jnp.zeros_like(spike2)
            bb1[...] = jnp.full_like(bb1, b_j0)
            bb2[...] = jnp.full_like(bb2, b_j0)
            out_ref[...] = jnp.zeros_like(out_ref)   # softmax accumulator, VMEM-resident

        # ---- hoist constant loads out of the inner time loop ----
        a1 = a1_ref[...]; om_a1 = 1.0 - a1
        r1 = r1_ref[...]; om_r1 = 1.0 - r1
        a2 = a2_ref[...]; om_a2 = 1.0 - a2
        r2 = r2_ref[...]; om_r2 = 1.0 - r2
        ao = ao_ref[...]; om_ao = 1.0 - ao
        W11 = w_h11_ref[...]
        W2 = w_l2_ref[...]; B2 = b_l2_ref[...]
        Wo = w_h2o_ref[...]; Bo = b_h2o_ref[...]

        # static trip count -> fully unrolled; all ref indices are static
        for tt in range(T):
            s1 = spike1[...]
            s2 = spike2[...]

            # ---------- layer 1 : adaptive LIF (input projection prefused) ----------
            h1 = xproj_ref[tt] + jnp.dot(s1, W11, preferred_element_type=jnp.float32)
            b1n = r1 * bb1[...] + om_r1 * s1
            th1 = b_j0 + BETA * b1n
            m1 = mem1[...] * a1 + om_a1 * h1 - th1 * s1          # R_m = 1, dt = 1
            s1n = (m1 - th1 > 0.0).astype(jnp.float32)
            bb1[...] = b1n; mem1[...] = m1; spike1[...] = s1n

            # ---------- layer 2 : adaptive LIF, fused [s1_new, s2_old] @ [W_h12; W_h22] ----------
            h2 = jnp.dot(jnp.concatenate([s1n, s2], axis=-1), W2,
                         preferred_element_type=jnp.float32) + B2
            b2n = r2 * bb2[...] + om_r2 * s2
            th2 = b_j0 + BETA * b2n
            m2 = mem2[...] * a2 + om_a2 * h2 - th2 * s2
            s2n = (m2 - th2 > 0.0).astype(jnp.float32)
            bb2[...] = b2n; mem2[...] = m2; spike2[...] = s2n

            # ---------- readout : leaky integrator (no spike) ----------
            o_in = jnp.dot(s2n, Wo, preferred_element_type=jnp.float32) + Bo
            mo = memo[...] * ao + om_ao * o_in
            memo[...] = mo

            # ---------- softmax accumulation, only for 10 < t < S ----------
            # padded O lanes hold -1e30 (alpha=1 there) -> exp underflows to exactly 0
            gt = c * T + tt
            e = jnp.exp(mo - jnp.max(mo, axis=-1, keepdims=True))
            sm = e * pl.reciprocal(jnp.sum(e, axis=-1, keepdims=True), approx=True)
            mask = jnp.logical_and(gt > 10, gt < S_real).astype(jnp.float32)
            out_ref[...] = out_ref[...] + mask * sm

            # ---------- trajectories ----------
            spk1_ref[tt] = s1n
            mem1_traj_ref[tt] = m1
            memo_traj_ref[tt] = mo

    return rnn_kernel


def rnn_custom_forward(x_sbd, params, mem1_init, mem2_init, memo_init, *, T=8):
    """x_sbd: (seq, batch, input_dim) float32.
    Returns (output (B,O), hidden_spike (S,B,H1), hidden_mem (S,B,H1), h2o_mem (S,B,O))."""
    S, B, D = x_sbd.shape
    H1 = params["w_ih1"].shape[1]
    H2 = params["w_h12"].shape[1]
    O = params["w_h2o"].shape[1]
    f32 = jnp.float32

    # padded (sublane/lane dense) shapes
    Bp = _round_up(B, 8)
    H1p = _round_up(H1, 128)
    H2p = _round_up(H2, 128)
    Op = _round_up(O, 128)
    Sp = _round_up(S, T)
    n_chunks = Sp // T

    def pad2(a, rows, cols, val=0.0):
        return jnp.pad(a, ((0, rows - a.shape[0]), (0, cols - a.shape[1])),
                       constant_values=val)

    # ---- hoisted time-independent input projection (one big matmul) + folded layer-1 bias ----
    b1 = params["b_ih1"] + params["b_h11"]                               # (1, H1)
    xproj = jnp.dot(x_sbd.reshape(S * B, D), params["w_ih1"],
                    preferred_element_type=f32) + b1
    xproj = xproj.reshape(S, B, H1)
    xproj = jnp.pad(xproj, ((0, Sp - S), (0, Bp - B), (0, H1p - H1)))    # (Sp, Bp, H1p)

    # ---- padded / fused weights & per-step constants ----
    w_h11 = pad2(params["w_h11"], H1p, H1p)
    w_l2 = jnp.concatenate([pad2(params["w_h12"], H1p, H2p),
                            pad2(params["w_h22"], H2p, H2p)], axis=0)    # (H1p+H2p, H2p)
    b_l2 = pad2(params["b_h12"] + params["b_h22"], 1, H2p)
    w_h2o = pad2(params["w_h2o"], H2p, Op)
    b_h2o = pad2(params["b_h2o"], 1, Op)

    # exp(-dt/tau) precomputed once; padded hidden lanes get alpha=ro=0 (stay inert),
    # padded output lanes get alpha=1 so memo stays at -1e30 there.
    alpha1 = pad2(jnp.exp(-DT / params["tau_m_h1"]), 1, H1p)
    ro1 = pad2(jnp.exp(-DT / params["tau_adp_h1"]), 1, H1p)
    alpha2 = pad2(jnp.exp(-DT / params["tau_m_h2"]), 1, H2p)
    ro2 = pad2(jnp.exp(-DT / params["tau_adp_h2"]), 1, H2p)
    alpha_o = pad2(jnp.exp(-DT / params["tau_m_o"]), 1, Op, val=1.0)

    mem1_p = pad2(mem1_init, Bp, H1p)
    mem2_p = pad2(mem2_init, Bp, H2p)
    memo_p = pad2(memo_init, Bp, Op, val=NEG_BIG)

    def full(shape):
        n = len(shape)
        return pl.BlockSpec(shape, lambda c, _n=n: (0,) * _n)

    in_specs = [
        pl.BlockSpec((T, Bp, H1p), lambda c: (c, 0, 0)),     # xproj chunk (streamed)
        full((H1p, H1p)),                                    # w_h11 (resident)
        full((H1p + H2p, H2p)), full((1, H2p)),              # fused layer-2 weight / bias
        full((H2p, Op)), full((1, Op)),                      # readout weight / bias
        full((1, H1p)), full((1, H1p)),                      # alpha1, ro1
        full((1, H2p)), full((1, H2p)),                      # alpha2, ro2
        full((1, Op)),                                       # alpha_o
        full((Bp, H1p)), full((Bp, H2p)), full((Bp, Op)),    # initial membranes
    ]
    out_specs = [
        pl.BlockSpec((Bp, Op), lambda c: (0, 0)),            # accumulated output (resident)
        pl.BlockSpec((T, Bp, H1p), lambda c: (c, 0, 0)),     # hidden_spike_ trajectory
        pl.BlockSpec((T, Bp, H1p), lambda c: (c, 0, 0)),     # hidden_mem_ trajectory
        pl.BlockSpec((T, Bp, Op), lambda c: (c, 0, 0)),      # h2o_mem_ trajectory
    ]
    out_shape = [
        jax.ShapeDtypeStruct((Bp, Op), f32),
        jax.ShapeDtypeStruct((Sp, Bp, H1p), f32),
        jax.ShapeDtypeStruct((Sp, Bp, H1p), f32),
        jax.ShapeDtypeStruct((Sp, Bp, Op), f32),
    ]
    scratch_shapes = [
        pltpu.VMEM((Bp, H1p), f32),  # mem1
        pltpu.VMEM((Bp, H1p), f32),  # spike1
        pltpu.VMEM((Bp, H1p), f32),  # b1 (adaptation)
        pltpu.VMEM((Bp, H2p), f32),  # mem2
        pltpu.VMEM((Bp, H2p), f32),  # spike2
        pltpu.VMEM((Bp, H2p), f32),  # b2 (adaptation)
        pltpu.VMEM((Bp, Op), f32),   # mem_output
    ]

    grid_spec = pltpu.PrefetchScalarGridSpec(
        num_scalar_prefetch=0,
        grid=(n_chunks,),
        in_specs=in_specs,
        out_specs=out_specs,
        scratch_shapes=scratch_shapes,
    )

    kernel = _make_kernel(T, S)

    out, spk1, mem1_traj, memo_traj = pl.pallas_call(
        kernel,
        out_shape=out_shape,
        grid_spec=grid_spec,
        compiler_params=pltpu.CompilerParams(
            dimension_semantics=("arbitrary",)),   # time recurrence is sequential
    )(
        xproj, w_h11, w_l2, b_l2, w_h2o, b_h2o,
        alpha1, ro1, alpha2, ro2, alpha_o,
        mem1_p, mem2_p, memo_p,
    )

    # slice padding back off
    return (out[:B, :O],
            spk1[:S, :B, :H1],
            mem1_traj[:S, :B, :H1],
            memo_traj[:S, :B, :O])


def init_params(key, D, H1, H2, O):
    """Deterministic parameter init mimicking the module's __init__ (shapes match).
    Weights are stored transposed as (in_features, out_features) so y = x @ W + b."""
    ks = jax.random.split(key, 12)
    f32 = jnp.float32

    def xavier(k, fan_in, fan_out):
        lim = math.sqrt(6.0 / (fan_in + fan_out))
        return jax.random.uniform(k, (fan_in, fan_out), f32, -lim, lim)

    def orthogonal(k, n):
        a = jax.random.normal(k, (n, n), f32)
        q, _ = jnp.linalg.qr(a)
        return q

    params = {
        "w_ih1": xavier(ks[0], D, H1),
        "b_ih1": jnp.zeros((1, H1), f32),
        "w_h11": orthogonal(ks[1], H1),
        "b_h11": jnp.zeros((1, H1), f32),
        "w_h12": xavier(ks[2], H1, H2),
        "b_h12": jnp.zeros((1, H2), f32),
        "w_h22": orthogonal(ks[3], H2),
        "b_h22": jnp.zeros((1, H2), f32),
        "w_h2o": xavier(ks[4], H2, O),
        # h2o bias uses nn.Linear default (not constant-0 in the module) -> small uniform
        "b_h2o": jax.random.uniform(ks[5], (1, O), f32,
                                    -1.0 / math.sqrt(H2), 1.0 / math.sqrt(H2)),
        # Gaussian tau init as in the module (could be <=0 in pathological draws; init-time
        # concern only, kernel itself is agnostic).
        "tau_adp_h1": 150.0 + 10.0 * jax.random.normal(ks[6], (1, H1), f32),
        "tau_adp_h2": 150.0 + 10.0 * jax.random.normal(ks[7], (1, H2), f32),
        "tau_m_h1": 20.0 + 5.0 * jax.random.normal(ks[8], (1, H1), f32),
        "tau_m_h2": 20.0 + 5.0 * jax.random.normal(ks[9], (1, H2), f32),
        "tau_m_o": 20.0 + 5.0 * jax.random.normal(ks[10], (1, O), f32),
    }
    return params


if __name__ == "__main__":
    # Small shapes consistent with the forward: (batch, seq, input_dim)
    B, S, D = 4, 16, 32
    H1, H2 = 32, 32
    O = 20  # output_dim
    T = 8   # timesteps per grid step (S padded up to a multiple of T)

    key = jax.random.PRNGKey(0)
    k_x, k_p, k_m1, k_m2, k_mo = jax.random.split(key, 5)

    # PyTorch forward takes (batch, seq, input_dim); kernel layout is (seq, batch, input_dim)
    x_bsd = jax.random.uniform(k_x, (B, S, D), jnp.float32)
    x_sbd = jnp.transpose(x_bsd, (1, 0, 2))

    params = init_params(k_p, D, H1, H2, O)

    # torch.rand initial membranes; spikes start at zero (handled in-kernel)
    mem1_init = jax.random.uniform(k_m1, (B, H1), jnp.float32)
    mem2_init = jax.random.uniform(k_m2, (B, H2), jnp.float32)
    memo_init = jax.random.uniform(k_mo, (B, O), jnp.float32)

    output, hidden_spike, hidden_mem, h2o_mem = rnn_custom_forward(
        x_sbd, params, mem1_init, mem2_init, memo_init, T=T
    )
    jax.block_until_ready((output, hidden_spike, hidden_mem, h2o_mem))

    assert output.shape == (B, O)
    assert hidden_spike.shape == (S, B, H1)
    assert hidden_mem.shape == (S, B, H1)
    assert h2o_mem.shape == (S, B, O)
    assert bool(jnp.all(jnp.isfinite(output)))
    print("KERNEL_OK")
</pallas_src>

<mosaic_0001>
module attributes {stable_mosaic.version = 11 : i64} {
  func.func @rnn_kernel(%arg0: i32, %arg1: memref<8x8x128xf32, #tpu.memory_space<vmem>>, %arg2: memref<128x128xf32, #tpu.memory_space<vmem>>, %arg3: memref<256x128xf32, #tpu.memory_space<vmem>>, %arg4: memref<1x128xf32, #tpu.memory_space<vmem>>, %arg5: memref<128x128xf32, #tpu.memory_space<vmem>>, %arg6: memref<1x128xf32, #tpu.memory_space<vmem>>, %arg7: memref<1x128xf32, #tpu.memory_space<vmem>>, %arg8: memref<1x128xf32, #tpu.memory_space<vmem>>, %arg9: memref<1x128xf32, #tpu.memory_space<vmem>>, %arg10: memref<1x128xf32, #tpu.memory_space<vmem>>, %arg11: memref<1x128xf32, #tpu.memory_space<vmem>>, %arg12: memref<8x128xf32, #tpu.memory_space<vmem>>, %arg13: memref<8x128xf32, #tpu.memory_space<vmem>>, %arg14: memref<8x128xf32, #tpu.memory_space<vmem>>, %arg15: memref<8x128xf32, #tpu.memory_space<vmem>>, %arg16: memref<8x8x128xf32, #tpu.memory_space<vmem>>, %arg17: memref<8x8x128xf32, #tpu.memory_space<vmem>>, %arg18: memref<8x8x128xf32, #tpu.memory_space<vmem>>, %arg19: memref<8x128xf32, #tpu.memory_space<vmem>>, %arg20: memref<8x128xf32, #tpu.memory_space<vmem>>, %arg21: memref<8x128xf32, #tpu.memory_space<vmem>>, %arg22: memref<8x128xf32, #tpu.memory_space<vmem>>, %arg23: memref<8x128xf32, #tpu.memory_space<vmem>>, %arg24: memref<8x128xf32, #tpu.memory_space<vmem>>, %arg25: memref<8x128xf32, #tpu.memory_space<vmem>>) attributes {dimension_semantics = [#tpu.dimension_semantics<arbitrary>], iteration_bounds = array<i64: 2>, scalar_prefetch = 0 : i64, scratch_operands = 7 : i64, tpu.core_type = #tpu.core_type<tc>, window_params = [{transform_indices = @transform_0, window_bounds = array<i64: 8, 8, 128>}, {pipeline_mode = #tpu.pipeline_mode<synchronous>, transform_indices = @transform_1, window_bounds = array<i64: 128, 128>}, {pipeline_mode = #tpu.pipeline_mode<synchronous>, transform_indices = @transform_2, window_bounds = array<i64: 256, 128>}, {pipeline_mode = #tpu.pipeline_mode<synchronous>, transform_indices = @transform_3, window_bounds = array<i64: 1, 128>}, {pipeline_mode = #tpu.pipeline_mode<synchronous>, transform_indices = @transform_4, window_bounds = array<i64: 128, 128>}, {pipeline_mode = #tpu.pipeline_mode<synchronous>, transform_indices = @transform_5, window_bounds = array<i64: 1, 128>}, {pipeline_mode = #tpu.pipeline_mode<synchronous>, transform_indices = @transform_6, window_bounds = array<i64: 1, 128>}, {pipeline_mode = #tpu.pipeline_mode<synchronous>, transform_indices = @transform_7, window_bounds = array<i64: 1, 128>}, {pipeline_mode = #tpu.pipeline_mode<synchronous>, transform_indices = @transform_8, window_bounds = array<i64: 1, 128>}, {pipeline_mode = #tpu.pipeline_mode<synchronous>, transform_indices = @transform_9, window_bounds = array<i64: 1, 128>}, {pipeline_mode = #tpu.pipeline_mode<synchronous>, transform_indices = @transform_10, window_bounds = array<i64: 1, 128>}, {pipeline_mode = #tpu.pipeline_mode<synchronous>, transform_indices = @transform_11, window_bounds = array<i64: 8, 128>}, {pipeline_mode = #tpu.pipeline_mode<synchronous>, transform_indices = @transform_12, window_bounds = array<i64: 8, 128>}, {pipeline_mode = #tpu.pipeline_mode<synchronous>, transform_indices = @transform_13, window_bounds = array<i64: 8, 128>}, {pipeline_mode = #tpu.pipeline_mode<synchronous>, transform_indices = @transform_14, window_bounds = array<i64: 8, 128>}, {transform_indices = @transform_15, window_bounds = array<i64: 8, 8, 128>}, {transform_indices = @transform_16, window_bounds = array<i64: 8, 8, 128>}, {transform_indices = @transform_17, window_bounds = array<i64: 8, 8, 128>}]} {
    %c0_i32 = arith.constant 0 : i32
    %0 = arith.cmpi eq, %arg0, %c0_i32 : i32
    %1 = arith.extui %0 : i1 to i32
    %c0_i32_0 = arith.constant 0 : i32
    %2 = arith.cmpi ne, %1, %c0_i32_0 : i32
    scf.if %2 {
      %c0_479 = arith.constant 0 : index
      %c0_480 = arith.constant 0 : index
      %847 = vector.load %arg12[%c0_479, %c0_480] : memref<8x128xf32, #tpu.memory_space<vmem>>, vector<8x128xf32>
      %c0_481 = arith.constant 0 : index
      %c0_482 = arith.constant 0 : index
      %848 = vector.load %arg19[%c0_481, %c0_482] : memref<8x128xf32, #tpu.memory_space<vmem>>, vector<8x128xf32>
      tpu.vector_store %arg19[%c0_481, %c0_482], %847 {strides = array<i32>} : memref<8x128xf32, #tpu.memory_space<vmem>>, vector<8x128xf32>,
      %c0_483 = arith.constant 0 : index
      %c0_484 = arith.constant 0 : index
      %849 = vector.load %arg13[%c0_483, %c0_484] : memref<8x128xf32, #tpu.memory_space<vmem>>, vector<8x128xf32>
      %c0_485 = arith.constant 0 : index
      %c0_486 = arith.constant 0 : index
      %850 = vector.load %arg22[%c0_485, %c0_486] : memref<8x128xf32, #tpu.memory_space<vmem>>, vector<8x128xf32>
      tpu.vector_store %arg22[%c0_485, %c0_486], %849 {strides = array<i32>} : memref<8x128xf32, #tpu.memory_space<vmem>>, vector<8x128xf32>,
      %c0_487 = arith.constant 0 : index
      %c0_488 = arith.constant 0 : index
      %851 = vector.load %arg14[%c0_487, %c0_488] : memref<8x128xf32, #tpu.memory_space<vmem>>, vector<8x128xf32>
      %c0_489 = arith.constant 0 : index
      %c0_490 = arith.constant 0 : index
      %852 = vector.load %arg25[%c0_489, %c0_490] : memref<8x128xf32, #tpu.memory_space<vmem>>, vector<8x128xf32>
      tpu.vector_store %arg25[%c0_489, %c0_490], %851 {strides = array<i32>} : memref<8x128xf32, #tpu.memory_space<vmem>>, vector<8x128xf32>,
      %cst_491 = arith.constant 0.000000e+00 : f32
      %853 = vector.broadcast %cst_491 : f32 to vector<8x128xf32>
      %c0_492 = arith.constant 0 : index
      %c0_493 = arith.constant 0 : index
      %854 = vector.load %arg20[%c0_492, %c0_493] : memref<8x128xf32, #tpu.memory_space<vmem>>, vector<8x128xf32>
      tpu.vector_store %arg20[%c0_492, %c0_493], %853 {strides = array<i32>} : memref<8x128xf32, #tpu.memory_space<vmem>>, vector<8x128xf32>,
      %cst_494 = arith.constant 0.000000e+00 : f32
      %855 = vector.broadcast %cst_494 : f32 to vector<8x128xf32>
      %c0_495 = arith.constant 0 : index
      %c0_496 = arith.constant 0 : index
      %856 = vector.load %arg23[%c0_495, %c0_496] : memref<8x128xf32, #tpu.memory_space<vmem>>, vector<8x128xf32>
      tpu.vector_store %arg23[%c0_495, %c0_496], %855 {strides = array<i32>} : memref<8x128xf32, #tpu.memory_space<vmem>>, vector<8x128xf32>,
      %cst_497 = arith.constant 0.00999999977 : f32
      %857 = vector.broadcast %cst_497 : f32 to vector<8x128xf32>
      %c0_498 = arith.constant 0 : index
      %c0_499 = arith.constant 0 : index
      %858 = vector.load %arg21[%c0_498, %c0_499] : memref<8x128xf32, #tpu.memory_space<vmem>>, vector<8x128xf32>
      tpu.vector_store %arg21[%c0_498, %c0_499], %857 {strides = array<i32>} : memref<8x128xf32, #tpu.memory_space<vmem>>, vector<8x128xf32>,
      %cst_500 = arith.constant 0.00999999977 : f32
      %859 = vector.broadcast %cst_500 : f32 to vector<8x128xf32>
      %c0_501 = arith.constant 0 : index
      %c0_502 = arith.constant 0 : index
      %860 = vector.load %arg24[%c0_501, %c0_502] : memref<8x128xf32, #tpu.memory_space<vmem>>, vector<8x128xf32>
      tpu.vector_store %arg24[%c0_501, %c0_502], %859 {strides = array<i32>} : memref<8x128xf32, #tpu.memory_space<vmem>>, vector<8x128xf32>,
      %cst_503 = arith.constant 0.000000e+00 : f32
      %861 = vector.broadcast %cst_503 : f32 to vector<8x128xf32>
      %c0_504 = arith.constant 0 : index
      %c0_505 = arith.constant 0 : index
      %862 = vector.load %arg15[%c0_504, %c0_505] : memref<8x128xf32, #tpu.memory_space<vmem>>, vector<8x128xf32>
      tpu.vector_store %arg15[%c0_504, %c0_505], %861 {strides = array<i32>} : memref<8x128xf32, #tpu.memory_space<vmem>>, vector<8x128xf32>,
    } else {
    }
    %c0 = arith.constant 0 : index
    %c0_1 = arith.constant 0 : index
    %3 = vector.load %arg7[%c0, %c0_1] : memref<1x128xf32, #tpu.memory_space<vmem>>, vector<1x128xf32>
    %cst = arith.constant 1.000000e+00 : f32
    %4 = vector.broadcast %cst : f32 to vector<1x128xf32>
    %5 = arith.subf %4, %3 : vector<1x128xf32>
    %c0_2 = arith.constant 0 : index
    %c0_3 = arith.constant 0 : index
    %6 = vector.load %arg8[%c0_2, %c0_3] : memref<1x128xf32, #tpu.memory_space<vmem>>, vector<1x128xf32>
    %cst_4 = arith.constant 1.000000e+00 : f32
    %7 = vector.broadcast %cst_4 : f32 to vector<1x128xf32>
    %8 = arith.subf %7, %6 : vector<1x128xf32>
    %c0_5 = arith.constant 0 : index
    %c0_6 = arith.constant 0 : index
    %9 = vector.load %arg9[%c0_5, %c0_6] : memref<1x128xf32, #tpu.memory_space<vmem>>, vector<1x128xf32>
    %cst_7 = arith.constant 1.000000e+00 : f32
    %10 = vector.broadcast %cst_7 : f32 to vector<1x128xf32>
    %11 = arith.subf %10, %9 : vector<1x128xf32>
    %c0_8 = arith.constant 0 : index
    %c0_9 = arith.constant 0 : index
    %12 = vector.load %arg10[%c0_8, %c0_9] : memref<1x128xf32, #tpu.memory_space<vmem>>, vector<1x128xf32>
    %cst_10 = arith.constant 1.000000e+00 : f32
    %13 = vector.broadcast %cst_10 : f32 to vector<1x128xf32>
    %14 = arith.subf %13, %12 : vector<1x128xf32>
    %c0_11 = arith.constant 0 : index
    %c0_12 = arith.constant 0 : index
    %15 = vector.load %arg11[%c0_11, %c0_12] : memref<1x128xf32, #tpu.memory_space<vmem>>, vector<1x128xf32>
    %cst_13 = arith.constant 1.000000e+00 : f32
    %16 = vector.broadcast %cst_13 : f32 to vector<1x128xf32>
    %17 = arith.subf %16, %15 : vector<1x128xf32>
    %c0_14 = arith.constant 0 : index
    %c0_15 = arith.constant 0 : index
    %18 = vector.load %arg2[%c0_14, %c0_15] : memref<128x128xf32, #tpu.memory_space<vmem>>, vector<128x128xf32>
    %c0_16 = arith.constant 0 : index
    %c0_17 = arith.constant 0 : index
    %19 = vector.load %arg3[%c0_16, %c0_17] : memref<256x128xf32, #tpu.memory_space<vmem>>, vector<256x128xf32>
    %c0_18 = arith.constant 0 : index
    %c0_19 = arith.constant 0 : index
    %20 = vector.load %arg4[%c0_18, %c0_19] : memref<1x128xf32, #tpu.memory_space<vmem>>, vector<1x128xf32>
    %c0_20 = arith.constant 0 : index
    %c0_21 = arith.constant 0 : index
    %21 = vector.load %arg5[%c0_20, %c0_21] : memref<128x128xf32, #tpu.memory_space<vmem>>, vector<128x128xf32>
    %c0_22 = arith.constant 0 : index
    %c0_23 = arith.constant 0 : index
    %22 = vector.load %arg6[%c0_22, %c0_23] : memref<1x128xf32, #tpu.memory_space<vmem>>, vector<1x128xf32>
    %c0_24 = arith.constant 0 : index
    %c0_25 = arith.constant 0 : index
    %23 = vector.load %arg20[%c0_24, %c0_25] : memref<8x128xf32, #tpu.memory_space<vmem>>, vector<8x128xf32>
    %c0_26 = arith.constant 0 : index
    %c0_27 = arith.constant 0 : index
    %24 = vector.load %arg23[%c0_26, %c0_27] : memref<8x128xf32, #tpu.memory_space<vmem>>, vector<8x128xf32>
    %c0_28 = arith.constant 0 : index
    %c0_29 = arith.constant 0 : index
    %c0_30 = arith.constant 0 : index
    %25 = vector.load %arg1[%c0_28, %c0_29, %c0_30] : memref<8x8x128xf32, #tpu.memory_space<vmem>>, vector<1x8x128xf32>
    %26 = vector.shape_cast %25 : vector<1x8x128xf32> to vector<8x128xf32>
    %cst_31 = arith.constant dense<0.000000e+00> : vector<8x128xf32>
    %27 = tpu.matmul %23, %18, %cst_31 {dimension_numbers = #tpu.dot_dimension_numbers<[1], [0], [0], [1], [0, 0, 1, 1], [], []>} : vector<8x128xf32>, vector<128x128xf32>, vector<8x128xf32> -> vector<8x128xf32>
    %28 = arith.addf %26, %27 : vector<8x128xf32>
    %c0_32 = arith.constant 0 : index
    %c0_33 = arith.constant 0 : index
    %29 = vector.load %arg21[%c0_32, %c0_33] : memref<8x128xf32, #tpu.memory_space<vmem>>, vector<8x128xf32>
    %30 = vector.broadcast %6 : vector<1x128xf32> to vector<8x128xf32>
    %31 = arith.mulf %30, %29 : vector<8x128xf32>
    %32 = vector.broadcast %8 : vector<1x128xf32> to vector<8x128xf32>
    %33 = arith.mulf %32, %23 : vector<8x128xf32>
    %34 = arith.addf %31, %33 : vector<8x128xf32>
    %cst_34 = arith.constant 1.800000e+00 : f32
    %35 = vector.broadcast %cst_34 : f32 to vector<8x128xf32>
    %36 = arith.mulf %35, %34 : vector<8x128xf32>
    %cst_35 = arith.constant 0.00999999977 : f32
    %37 = vector.broadcast %cst_35 : f32 to vector<8x128xf32>
    %38 = arith.addf %37, %36 : vector<8x128xf32>
    %c0_36 = arith.constant 0 : index
    %c0_37 = arith.constant 0 : index
    %39 = vector.load %arg19[%c0_36, %c0_37] : memref<8x128xf32, #tpu.memory_space<vmem>>, vector<8x128xf32>
    %40 = vector.broadcast %3 : vector<1x128xf32> to vector<8x128xf32>
    %41 = arith.mulf %39, %40 : vector<8x128xf32>
    %42 = vector.broadcast %5 : vector<1x128xf32> to vector<8x128xf32>
    %43 = arith.mulf %42, %28 : vector<8x128xf32>
    %44 = arith.addf %41, %43 : vector<8x128xf32>
    %45 = arith.mulf %38, %23 : vector<8x128xf32>
    %46 = arith.subf %44, %45 : vector<8x128xf32>
    %47 = arith.subf %46, %38 : vector<8x128xf32>
    %cst_38 = arith.constant 0.000000e+00 : f32
    %48 = vector.broadcast %cst_38 : f32 to vector<8x128xf32>
    %49 = arith.cmpf ogt, %47, %48 : vector<8x128xf32>
    %50 = arith.extui %49 : vector<8x128xi1> to vector<8x128xi32>
    %51 = arith.sitofp %50 : vector<8x128xi32> to vector<8x128xf32>
    %c0_39 = arith.constant 0 : index
    %c0_40 = arith.constant 0 : index
    %52 = vector.load %arg21[%c0_39, %c0_40] : memref<8x128xf32, #tpu.memory_space<vmem>>, vector<8x128xf32>
    tpu.vector_store %arg21[%c0_39, %c0_40], %34 {strides = array<i32>} : memref<8x128xf32, #tpu.memory_space<vmem>>, vector<8x128xf32>,
    %c0_41 = arith.constant 0 : index
    %c0_42 = arith.constant 0 : index
    %53 = vector.load %arg19[%c0_41, %c0_42] : memref<8x128xf32, #tpu.memory_space<vmem>>, vector<8x128xf32>
    tpu.vector_store %arg19[%c0_41, %c0_42], %46 {strides = array<i32>} : memref<8x128xf32, #tpu.memory_space<vmem>>, vector<8x128xf32>,
    %c0_43 = arith.constant 0 : index
    %c0_44 = arith.constant 0 : index
    %54 = vector.load %arg20[%c0_43, %c0_44] : memref<8x128xf32, #tpu.memory_space<vmem>>, vector<8x128xf32>
    tpu.vector_store %arg20[%c0_43, %c0_44], %51 {strides = array<i32>} : memref<8x128xf32, #tpu.memory_space<vmem>>, vector<8x128xf32>,
    %55 = tpu.concatenate %51, %24 in 1 : vector<8x128xf32>, vector<8x128xf32> -> vector<8x256xf32>
    %cst_45 = arith.constant dense<0.000000e+00> : vector<8x128xf32>
    %56 = tpu.matmul %55, %19, %cst_45 {dimension_numbers = #tpu.dot_dimension_numbers<[1], [0], [0], [1], [0, 0, 1, 1], [], []>} : vector<8x256xf32>, vector<256x128xf32>, vector<8x128xf32> -> vector<8x128xf32>
    %57 = vector.broadcast %20 : vector<1x128xf32> to vector<8x128xf32>
    %58 = arith.addf %56, %57 : vector<8x128xf32>
    %c0_46 = arith.constant 0 : index
    %c0_47 = arith.constant 0 : index
    %59 = vector.load %arg24[%c0_46, %c0_47] : memref<8x128xf32, #tpu.memory_space<vmem>>, vector<8x128xf32>
    %60 = vector.broadcast %12 : vector<1x128xf32> to vector<8x128xf32>
    %61 = arith.mulf %60, %59 : vector<8x128xf32>
    %62 = vector.broadcast %14 : vector<1x128xf32> to vector<8x128xf32>
    %63 = arith.mulf %62, %24 : vector<8x128xf32>
    %64 = arith.addf %61, %63 : vector<8x128xf32>
    %cst_48 = arith.constant 1.800000e+00 : f32
    %65 = vector.broadcast %cst_48 : f32 to vector<8x128xf32>
    %66 = arith.mulf %65, %64 : vector<8x128xf32>
    %cst_49 = arith.constant 0.00999999977 : f32
    %67 = vector.broadcast %cst_49 : f32 to vector<8x128xf32>
    %68 = arith.addf %67, %66 : vector<8x128xf32>
    %c0_50 = arith.constant 0 : index
    %c0_51 = arith.constant 0 : index
    %69 = vector.load %arg22[%c0_50, %c0_51] : memref<8x128xf32, #tpu.memory_space<vmem>>, vector<8x128xf32>
    %70 = vector.broadcast %9 : vector<1x128xf32> to vector<8x128xf32>
    %71 = arith.mulf %69, %70 : vector<8x128xf32>
    %72 = vector.broadcast %11 : vector<1x128xf32> to vector<8x128xf32>
    %73 = arith.mulf %72, %58 : vector<8x128xf32>
    %74 = arith.addf %71, %73 : vector<8x128xf32>
    %75 = arith.mulf %68, %24 : vector<8x128xf32>
    %76 = arith.subf %74, %75 : vector<8x128xf32>
    %77 = arith.subf %76, %68 : vector<8x128xf32>
    %cst_52 = arith.constant 0.000000e+00 : f32
    %78 = vector.broadcast %cst_52 : f32 to vector<8x128xf32>
    %79 = arith.cmpf ogt, %77, %78 : vector<8x128xf32>
    %80 = arith.extui %79 : vector<8x128xi1> to vector<8x128xi32>
    %81 = arith.sitofp %80 : vector<8x128xi32> to vector<8x128xf32>
    %c0_53 = arith.constant 0 : index
    %c0_54 = arith.constant 0 : index
    %82 = vector.load %arg24[%c0_53, %c0_54] : memref<8x128xf32, #tpu.memory_space<vmem>>, vector<8x128xf32>
    tpu.vector_store %arg24[%c0_53, %c0_54], %64 {strides = array<i32>} : memref<8x128xf32, #tpu.memory_space<vmem>>, vector<8x128xf32>,
    %c0_55 = arith.constant 0 : index
    %c0_56 = arith.constant 0 : index
    %83 = vector.load %arg22[%c0_55, %c0_56] : memref<8x128xf32, #tpu.memory_space<vmem>>, vector<8x128xf32>
    tpu.vector_store %arg22[%c0_55, %c0_56], %76 {strides = array<i32>} : memref<8x128xf32, #tpu.memory_space<vmem>>, vector<8x128xf32>,
    %c0_57 = arith.constant 0 : index
    %c0_58 = arith.constant 0 : index
    %84 = vector.load %arg23[%c0_57, %c0_58] : memref<8x128xf32, #tpu.memory_space<vmem>>, vector<8x128xf32>
    tpu.vector_store %arg23[%c0_57, %c0_58], %81 {strides = array<i32>} : memref<8x128xf32, #tpu.memory_space<vmem>>, vector<8x128xf32>,
    %cst_59 = arith.constant dense<0.000000e+00> : vector<8x128xf32>
    %85 = tpu.matmul %81, %21, %cst_59 {dimension_numbers = #tpu.dot_dimension_numbers<[1], [0], [0], [1], [0, 0, 1, 1], [], []>} : vector<8x128xf32>, vector<128x128xf32>, vector<8x128xf32> -> vector<8x128xf32>
    %86 = vector.broadcast %22 : vector<1x128xf32> to vector<8x128xf32>
    %87 = arith.addf %85, %86 : vector<8x128xf32>
    %c0_60 = arith.constant 0 : index
    %c0_61 = arith.constant 0 : index
    %88 = vector.load %arg25[%c0_60, %c0_61] : memref<8x128xf32, #tpu.memory_space<vmem>>, vector<8x128xf32>
    %89 = vector.broadcast %15 : vector<1x128xf32> to vector<8x128xf32>
    %90 = arith.mulf %88, %89 : vector<8x128xf32>
    %91 = vector.broadcast %17 : vector<1x128xf32> to vector<8x128xf32>
    %92 = arith.mulf %91, %87 : vector<8x128xf32>
    %93 = arith.addf %90, %92 : vector<8x128xf32>
    %c0_62 = arith.constant 0 : index
    %c0_63 = arith.constant 0 : index
    %94 = vector.load %arg25[%c0_62, %c0_63] : memref<8x128xf32, #tpu.memory_space<vmem>>, vector<8x128xf32>
    tpu.vector_store %arg25[%c0_62, %c0_63], %93 {strides = array<i32>} : memref<8x128xf32, #tpu.memory_space<vmem>>, vector<8x128xf32>,
    %c8_i32 = arith.constant 8 : i32
    %95 = arith.muli %arg0, %c8_i32 : i32
    %c0_i32_64 = arith.constant 0 : i32
    %96 = arith.addi %95, %c0_i32_64 : i32
    %cst_65 = arith.constant dense<0xFF800000> : vector<8xf32>
    %97 = vector.multi_reduction <maximumf>, %93, %cst_65 [1] : vector<8x128xf32> to vector<8xf32>
    %98 = vector.shape_cast %97 : vector<8xf32> to vector<8x1xf32>
    %99 = vector.broadcast %98 : vector<8x1xf32> to vector<8x128xf32>
    %100 = arith.subf %93, %99 : vector<8x128xf32>
    %101 = math.exp %100 : vector<8x128xf32>
    %cst_66 = arith.constant dense<0.000000e+00> : vector<8xf32>
    %102 = vector.multi_reduction <add>, %101, %cst_66 [1] : vector<8x128xf32> to vector<8xf32>
    %103 = vector.shape_cast %102 : vector<8xf32> to vector<8x1xf32>
    %104 = tpu.reciprocal %103 {approx = true} : vector<8x1xf32> -> vector<8x1xf32>
    %105 = vector.broadcast %104 : vector<8x1xf32> to vector<8x128xf32>
    %106 = arith.mulf %101, %105 : vector<8x128xf32>
    %c10_i32 = arith.constant 10 : i32
    %107 = arith.cmpi sgt, %96, %c10_i32 : i32
    %c16_i32 = arith.constant 16 : i32
    %108 = arith.cmpi slt, %96, %c16_i32 : i32
    %109 = arith.andi %107, %108 : i1
    %110 = arith.extui %109 : i1 to i32
    %111 = arith.sitofp %110 : i32 to f32
    %c0_67 = arith.constant 0 : index
    %c0_68 = arith.constant 0 : index
    %112 = vector.load %arg15[%c0_67, %c0_68] : memref<8x128xf32, #tpu.memory_space<vmem>>, vector<8x128xf32>
    %113 = vector.broadcast %111 : f32 to vector<8x128xf32>
    %114 = arith.mulf %113, %106 : vector<8x128xf32>
    %115 = arith.addf %112, %114 : vector<8x128xf32>
    %c0_69 = arith.constant 0 : index
    %c0_70 = arith.constant 0 : index
    %116 = vector.load %arg15[%c0_69, %c0_70] : memref<8x128xf32, #tpu.memory_space<vmem>>, vector<8x128xf32>
    tpu.vector_store %arg15[%c0_69, %c0_70], %115 {strides = array<i32>} : memref<8x128xf32, #tpu.memory_space<vmem>>, vector<8x128xf32>,
    %c0_71 = arith.constant 0 : index
    %c0_72 = arith.constant 0 : index
    %c0_73 = arith.constant 0 : index
    %117 = vector.load %arg16[%c0_71, %c0_72, %c0_73] : memref<8x8x128xf32, #tpu.memory_space<vmem>>, vector<1x8x128xf32>
    %118 = vector.shape_cast %117 : vector<1x8x128xf32> to vector<8x128xf32>
    %119 = vector.shape_cast %51 : vector<8x128xf32> to vector<1x8x128xf32>
    tpu.vector_store %arg16[%c0_71, %c0_72, %c0_73], %119 {strides = array<i32>} : memref<8x8x128xf32, #tpu.memory_space<vmem>>, vector<1x8x128xf32>,
    %c0_74 = arith.constant 0 : index
    %c0_75 = arith.constant 0 : index
    %c0_76 = arith.constant 0 : index
    %120 = vector.load %arg17[%c0_74, %c0_75, %c0_76] : memref<8x8x128xf32, #tpu.memory_space<vmem>>, vector<1x8x128xf32>
    %121 = vector.shape_cast %120 : vector<1x8x128xf32> to vector<8x128xf32>
    %122 = vector.shape_cast %46 : vector<8x128xf32> to vector<1x8x128xf32>
    tpu.vector_store %arg17[%c0_74, %c0_75, %c0_76], %122 {strides = array<i32>} : memref<8x8x128xf32, #tpu.memory_space<vmem>>, vector<1x8x128xf32>,
    %c0_77 = arith.constant 0 : index
    %c0_78 = arith.constant 0 : index
    %c0_79 = arith.constant 0 : index
    %123 = vector.load %arg18[%c0_77, %c0_78, %c0_79] : memref<8x8x128xf32, #tpu.memory_space<vmem>>, vector<1x8x128xf32>
    %124 = vector.shape_cast %123 : vector<1x8x128xf32> to vector<8x128xf32>
    %125 = vector.shape_cast %93 : vector<8x128xf32> to vector<1x8x128xf32>
    tpu.vector_store %arg18[%c0_77, %c0_78, %c0_79], %125 {strides = array<i32>} : memref<8x8x128xf32, #tpu.memory_space<vmem>>, vector<1x8x128xf32>,
    %c0_80 = arith.constant 0 : index
    %c0_81 = arith.constant 0 : index
    %126 = vector.load %arg20[%c0_80, %c0_81] : memref<8x128xf32, #tpu.memory_space<vmem>>, vector<8x128xf32>
    %c0_82 = arith.constant 0 : index
    %c0_83 = arith.constant 0 : index
    %127 = vector.load %arg23[%c0_82, %c0_83] : memref<8x128xf32, #tpu.memory_space<vmem>>, vector<8x128xf32>
    %c1 = arith.constant 1 : index
    %c0_84 = arith.constant 0 : index
    %c0_85 = arith.constant 0 : index
    %128 = vector.load %arg1[%c1, %c0_84, %c0_85] : memref<8x8x128xf32, #tpu.memory_space<vmem>>, vector<1x8x128xf32>
    %129 = vector.shape_cast %128 : vector<1x8x128xf32> to vector<8x128xf32>
    %cst_86 = arith.constant dense<0.000000e+00> : vector<8x128xf32>
    %130 = tpu.matmul %126, %18, %cst_86 {dimension_numbers = #tpu.dot_dimension_numbers<[1], [0], [0], [1], [0, 0, 1, 1], [], []>} : vector<8x128xf32>, vector<128x128xf32>, vector<8x128xf32> -> vector<8x128xf32>
    %131 = arith.addf %129, %130 : vector<8x128xf32>
    %c0_87 = arith.constant 0 : index
    %c0_88 = arith.constant 0 : index
    %132 = vector.load %arg21[%c0_87, %c0_88] : memref<8x128xf32, #tpu.memory_space<vmem>>, vector<8x128xf32>
    %133 = vector.broadcast %6 : vector<1x128xf32> to vector<8x128xf32>
    %134 = arith.mulf %133, %132 : vector<8x128xf32>
    %135 = vector.broadcast %8 : vector<1x128xf32> to vector<8x128xf32>
    %136 = arith.mulf %135, %126 : vector<8x128xf32>
    %137 = arith.addf %134, %136 : vector<8x128xf32>
    %cst_89 = arith.constant 1.800000e+00 : f32
    %138 = vector.broadcast %cst_89 : f32 to vector<8x128xf32>
    %139 = arith.mulf %138, %137 : vector<8x128xf32>
    %cst_90 = arith.constant 0.00999999977 : f32
    %140 = vector.broadcast %cst_90 : f32 to vector<8x128xf32>
    %141 = arith.addf %140, %139 : vector<8x128xf32>
    %c0_91 = arith.constant 0 : index
    %c0_92 = arith.constant 0 : index
    %142 = vector.load %arg19[%c0_91, %c0_92] : memref<8x128xf32, #tpu.memory_space<vmem>>, vector<8x128xf32>
    %143 = vector.broadcast %3 : vector<1x128xf32> to vector<8x128xf32>
    %144 = arith.mulf %142, %143 : vector<8x128xf32>
    %145 = vector.broadcast %5 : vector<1x128xf32> to vector<8x128xf32>
    %146 = arith.mulf %145, %131 : vector<8x128xf32>
    %147 = arith.addf %144, %146 : vector<8x128xf32>
    %148 = arith.mulf %141, %126 : vector<8x128xf32>
    %149 = arith.subf %147, %148 : vector<8x128xf32>
    %150 = arith.subf %149, %141 : vector<8x128xf32>
    %cst_93 = arith.constant 0.000000e+00 : f32
    %151 = vector.broadcast %cst_93 : f32 to vector<8x128xf32>
    %152 = arith.cmpf ogt, %150, %151 : vector<8x128xf32>
    %153 = arith.extui %152 : vector<8x128xi1> to vector<8x128xi32>
    %154 = arith.sitofp %153 : vector<8x128xi32> to vector<8x128xf32>
    %c0_94 = arith.constant 0 : index
    %c0_95 = arith.constant 0 : index
    %155 = vector.load %arg21[%c0_94, %c0_95] : memref<8x128xf32, #tpu.memory_space<vmem>>, vector<8x128xf32>
    tpu.vector_store %arg21[%c0_94, %c0_95], %137 {strides = array<i32>} : memref<8x128xf32, #tpu.memory_space<vmem>>, vector<8x128xf32>,
    %c0_96 = arith.constant 0 : index
    %c0_97 = arith.constant 0 : index
    %156 = vector.load %arg19[%c0_96, %c0_97] : memref<8x128xf32, #tpu.memory_space<vmem>>, vector<8x128xf32>
    tpu.vector_store %arg19[%c0_96, %c0_97], %149 {strides = array<i32>} : memref<8x128xf32, #tpu.memory_space<vmem>>, vector<8x128xf32>,
    %c0_98 = arith.constant 0 : index
    %c0_99 = arith.constant 0 : index
    %157 = vector.load %arg20[%c0_98, %c0_99] : memref<8x128xf32, #tpu.memory_space<vmem>>, vector<8x128xf32>
    tpu.vector_store %arg20[%c0_98, %c0_99], %154 {strides = array<i32>} : memref<8x128xf32, #tpu.memory_space<vmem>>, vector<8x128xf32>,
    %158 = tpu.concatenate %154, %127 in 1 : vector<8x128xf32>, vector<8x128xf32> -> vector<8x256xf32>
    %cst_100 = arith.constant dense<0.000000e+00> : vector<8x128xf32>
    %159 = tpu.matmul %158, %19, %cst_100 {dimension_numbers = #tpu.dot_dimension_numbers<[1], [0], [0], [1], [0, 0, 1, 1], [], []>} : vector<8x256xf32>, vector<256x128xf32>, vector<8x128xf32> -> vector<8x128xf32>
    %160 = vector.broadcast %20 : vector<1x128xf32> to vector<8x128xf32>
    %161 = arith.addf %159, %160 : vector<8x128xf32>
    %c0_101 = arith.constant 0 : index
    %c0_102 = arith.constant 0 : index
    %162 = vector.load %arg24[%c0_101, %c0_102] : memref<8x128xf32, #tpu.memory_space<vmem>>, vector<8x128xf32>
    %163 = vector.broadcast %12 : vector<1x128xf32> to vector<8x128xf32>
    %164 = arith.mulf %163, %162 : vector<8x128xf32>
    %165 = vector.broadcast %14 : vector<1x128xf32> to vector<8x128xf32>
    %166 = arith.mulf %165, %127 : vector<8x128xf32>
    %167 = arith.addf %164, %166 : vector<8x128xf32>
    %cst_103 = arith.constant 1.800000e+00 : f32
    %168 = vector.broadcast %cst_103 : f32 to vector<8x128xf32>
    %169 = arith.mulf %168, %167 : vector<8x128xf32>
    %cst_104 = arith.constant 0.00999999977 : f32
    %170 = vector.broadcast %cst_104 : f32 to vector<8x128xf32>
    %171 = arith.addf %170, %169 : vector<8x128xf32>
    %c0_105 = arith.constant 0 : index
    %c0_106 = arith.constant 0 : index
    %172 = vector.load %arg22[%c0_105, %c0_106] : memref<8x128xf32, #tpu.memory_space<vmem>>, vector<8x128xf32>
    %173 = vector.broadcast %9 : vector<1x128xf32> to vector<8x128xf32>
    %174 = arith.mulf %172, %173 : vector<8x128xf32>
    %175 = vector.broadcast %11 : vector<1x128xf32> to vector<8x128xf32>
    %176 = arith.mulf %175, %161 : vector<8x128xf32>
    %177 = arith.addf %174, %176 : vector<8x128xf32>
    %178 = arith.mulf %171, %127 : vector<8x128xf32>
    %179 = arith.subf %177, %178 : vector<8x128xf32>
    %180 = arith.subf %179, %171 : vector<8x128xf32>
    %cst_107 = arith.constant 0.000000e+00 : f32
    %181 = vector.broadcast %cst_107 : f32 to vector<8x128xf32>
    %182 = arith.cmpf ogt, %180, %181 : vector<8x128xf32>
    %183 = arith.extui %182 : vector<8x128xi1> to vector<8x128xi32>
    %184 = arith.sitofp %183 : vector<8x128xi32> to vector<8x128xf32>
    %c0_108 = arith.constant 0 : index
    %c0_109 = arith.constant 0 : index
    %185 = vector.load %arg24[%c0_108, %c0_109] : memref<8x128xf32, #tpu.memory_space<vmem>>, vector<8x128xf32>
    tpu.vector_store %arg24[%c0_108, %c0_109], %167 {strides = array<i32>} : memref<8x128xf32, #tpu.memory_space<vmem>>, vector<8x128xf32>,
    %c0_110 = arith.constant 0 : index
    %c0_111 = arith.constant 0 : index
    %186 = vector.load %arg22[%c0_110, %c0_111] : memref<8x128xf32, #tpu.memory_space<vmem>>, vector<8x128xf32>
    tpu.vector_store %arg22[%c0_110, %c0_111], %179 {strides = array<i32>} : memref<8x128xf32, #tpu.memory_space<vmem>>, vector<8x128xf32>,
    %c0_112 = arith.constant 0 : index
    %c0_113 = arith.constant 0 : index
    %187 = vector.load %arg23[%c0_112, %c0_113] : memref<8x128xf32, #tpu.memory_space<vmem>>, vector<8x128xf32>
    tpu.vector_store %arg23[%c0_112, %c0_113], %184 {strides = array<i32>} : memref<8x128xf32, #tpu.memory_space<vmem>>, vector<8x128xf32>,
    %cst_114 = arith.constant dense<0.000000e+00> : vector<8x128xf32>
    %188 = tpu.matmul %184, %21, %cst_114 {dimension_numbers = #tpu.dot_dimension_numbers<[1], [0], [0], [1], [0, 0, 1, 1], [], []>} : vector<8x128xf32>, vector<128x128xf32>, vector<8x128xf32> -> vector<8x128xf32>
    %189 = vector.broadcast %22 : vector<1x128xf32> to vector<8x128xf32>
    %190 = arith.addf %188, %189 : vector<8x128xf32>
    %c0_115 = arith.constant 0 : index
    %c0_116 = arith.constant 0 : index
    %191 = vector.load %arg25[%c0_115, %c0_116] : memref<8x128xf32, #tpu.memory_space<vmem>>, vector<8x128xf32>
    %192 = vector.broadcast %15 : vector<1x128xf32> to vector<8x128xf32>
    %193 = arith.mulf %191, %192 : vector<8x128xf32>
    %194 = vector.broadcast %17 : vector<1x128xf32> to vector<8x128xf32>
    %195 = arith.mulf %194, %190 : vector<8x128xf32>
    %196 = arith.addf %193, %195 : vector<8x128xf32>
    %c0_117 = arith.constant 0 : index
    %c0_118 = arith.constant 0 : index
    %197 = vector.load %arg25[%c0_117, %c0_118] : memref<8x128xf32, #tpu.memory_space<vmem>>, vector<8x128xf32>
    tpu.vector_store %arg25[%c0_117, %c0_118], %196 {strides = array<i32>} : memref<8x128xf32, #tpu.memory_space<vmem>>, vector<8x128xf32>,
    %c8_i32_119 = arith.constant 8 : i32
    %198 = arith.muli %arg0, %c8_i32_119 : i32
    %c1_i32 = arith.constant 1 : i32
    %199 = arith.addi %198, %c1_i32 : i32
    %cst_120 = arith.constant dense<0xFF800000> : vector<8xf32>
    %200 = vector.multi_reduction <maximumf>, %196, %cst_120 [1] : vector<8x128xf32> to vector<8xf32>
    %201 = vector.shape_cast %200 : vector<8xf32> to vector<8x1xf32>
    %202 = vector.broadcast %201 : vector<8x1xf32> to vector<8x128xf32>
    %203 = arith.subf %196, %202 : vector<8x128xf32>
    %204 = math.exp %203 : vector<8x128xf32>
    %cst_121 = arith.constant dense<0.000000e+00> : vector<8xf32>
    %205 = vector.multi_reduction <add>, %204, %cst_121 [1] : vector<8x128xf32> to vector<8xf32>
    %206 = vector.shape_cast %205 : vector<8xf32> to vector<8x1xf32>
    %207 = tpu.reciprocal %206 {approx = true} : vector<8x1xf32> -> vector<8x1xf32>
    %208 = vector.broadcast %207 : vector<8x1xf32> to vector<8x128xf32>
    %209 = arith.mulf %204, %208 : vector<8x128xf32>
    %c10_i32_122 = arith.constant 10 : i32
    %210 = arith.cmpi sgt, %199, %c10_i32_122 : i32
    %c16_i32_123 = arith.constant 16 : i32
    %211 = arith.cmpi slt, %199, %c16_i32_123 : i32
    %212 = arith.andi %210, %211 : i1
    %213 = arith.extui %212 : i1 to i32
    %214 = arith.sitofp %213 : i32 to f32
    %c0_124 = arith.constant 0 : index
    %c0_125 = arith.constant 0 : index
    %215 = vector.load %arg15[%c0_124, %c0_125] : memref<8x128xf32, #tpu.memory_space<vmem>>, vector<8x128xf32>
    %216 = vector.broadcast %214 : f32 to vector<8x128xf32>
    %217 = arith.mulf %216, %209 : vector<8x128xf32>
    %218 = arith.addf %215, %217 : vector<8x128xf32>
    %c0_126 = arith.constant 0 : index
    %c0_127 = arith.constant 0 : index
    %219 = vector.load %arg15[%c0_126, %c0_127] : memref<8x128xf32, #tpu.memory_space<vmem>>, vector<8x128xf32>
    tpu.vector_store %arg15[%c0_126, %c0_127], %218 {strides = array<i32>} : memref<8x128xf32, #tpu.memory_space<vmem>>, vector<8x128xf32>,
    %c1_128 = arith.constant 1 : index
    %c0_129 = arith.constant 0 : index
    %c0_130 = arith.constant 0 : index
    %220 = vector.load %arg16[%c1_128, %c0_129, %c0_130] : memref<8x8x128xf32, #tpu.memory_space<vmem>>, vector<1x8x128xf32>
    %221 = vector.shape_cast %220 : vector<1x8x128xf32> to vector<8x128xf32>
    %222 = vector.shape_cast %154 : vector<8x128xf32> to vector<1x8x128xf32>
    tpu.vector_store %arg16[%c1_128, %c0_129, %c0_130], %222 {strides = array<i32>} : memref<8x8x128xf32, #tpu.memory_space<vmem>>, vector<1x8x128xf32>,
    %c1_131 = arith.constant 1 : index
    %c0_132 = arith.constant 0 : index
    %c0_133 = arith.constant 0 : index
    %223 = vector.load %arg17[%c1_131, %c0_132, %c0_133] : memref<8x8x128xf32, #tpu.memory_space<vmem>>, vector<1x8x128xf32>
    %224 = vector.shape_cast %223 : vector<1x8x128xf32> to vector<8x128xf32>
    %225 = vector.shape_cast %149 : vector<8x128xf32> to vector<1x8x128xf32>
    tpu.vector_store %arg17[%c1_131, %c0_132, %c0_133], %225 {strides = array<i32>} : memref<8x8x128xf32, #tpu.memory_space<vmem>>, vector<1x8x128xf32>,
    %c1_134 = arith.constant 1 : index
    %c0_135 = arith.constant 0 : index
    %c0_136 = arith.constant 0 : index
    %226 = vector.load %arg18[%c1_134, %c0_135, %c0_136] : memref<8x8x128xf32, #tpu.memory_space<vmem>>, vector<1x8x128xf32>
    %227 = vector.shape_cast %226 : vector<1x8x128xf32> to vector<8x128xf32>
    %228 = vector.shape_cast %196 : vector<8x128xf32> to vector<1x8x128xf32>
    tpu.vector_store %arg18[%c1_134, %c0_135, %c0_136], %228 {strides = array<i32>} : memref<8x8x128xf32, #tpu.memory_space<vmem>>, vector<1x8x128xf32>,
    %c0_137 = arith.constant 0 : index
    %c0_138 = arith.constant 0 : index
    %229 = vector.load %arg20[%c0_137, %c0_138] : memref<8x128xf32, #tpu.memory_space<vmem>>, vector<8x128xf32>
    %c0_139 = arith.constant 0 : index
    %c0_140 = arith.constant 0 : index
    %230 = vector.load %arg23[%c0_139, %c0_140] : memref<8x128xf32, #tpu.memory_space<vmem>>, vector<8x128xf32>
    %c2 = arith.constant 2 : index
    %c0_141 = arith.constant 0 : index
    %c0_142 = arith.constant 0 : index
    %231 = vector.load %arg1[%c2, %c0_141, %c0_142] : memref<8x8x128xf32, #tpu.memory_space<vmem>>, vector<1x8x128xf32>
    %232 = vector.shape_cast %231 : vector<1x8x128xf32> to vector<8x128xf32>
    %cst_143 = arith.constant dense<0.000000e+00> : vector<8x128xf32>
    %233 = tpu.matmul %229, %18, %cst_143 {dimension_numbers = #tpu.dot_dimension_numbers<[1], [0], [0], [1], [0, 0, 1, 1], [], []>} : vector<8x128xf32>, vector<128x128xf32>, vector<8x128xf32> -> vector<8x128xf32>
    %234 = arith.addf %232, %233 : vector<8x128xf32>
    %c0_144 = arith.constant 0 : index
    %c0_145 = arith.constant 0 : index
    %235 = vector.load %arg21[%c0_144, %c0_145] : memref<8x128xf32, #tpu.memory_space<vmem>>, vector<8x128xf32>
    %236 = vector.broadcast %6 : vector<1x128xf32> to vector<8x128xf32>
    %237 = arith.mulf %236, %235 : vector<8x128xf32>
    %238 = vector.broadcast %8 : vector<1x128xf32> to vector<8x128xf32>
    %239 = arith.mulf %238, %229 : vector<8x128xf32>
    %240 = arith.addf %237, %239 : vector<8x128xf32>
    %cst_146 = arith.constant 1.800000e+00 : f32
    %241 = vector.broadcast %cst_146 : f32 to vector<8x128xf32>
    %242 = arith.mulf %241, %240 : vector<8x128xf32>
    %cst_147 = arith.constant 0.00999999977 : f32
    %243 = vector.broadcast %cst_147 : f32 to vector<8x128xf32>
    %244 = arith.addf %243, %242 : vector<8x128xf32>
    %c0_148 = arith.constant 0 : index
    %c0_149 = arith.constant 0 : index
    %245 = vector.load %arg19[%c0_148, %c0_149] : memref<8x128xf32, #tpu.memory_space<vmem>>, vector<8x128xf32>
    %246 = vector.broadcast %3 : vector<1x128xf32> to vector<8x128xf32>
    %247 = arith.mulf %245, %246 : vector<8x128xf32>
    %248 = vector.broadcast %5 : vector<1x128xf32> to vector<8x128xf32>
    %249 = arith.mulf %248, %234 : vector<8x128xf32>
    %250 = arith.addf %247, %249 : vector<8x128xf32>
    %251 = arith.mulf %244, %229 : vector<8x128xf32>
    %252 = arith.subf %250, %251 : vector<8x128xf32>
    %253 = arith.subf %252, %244 : vector<8x128xf32>
    %cst_150 = arith.constant 0.000000e+00 : f32
    %254 = vector.broadcast %cst_150 : f32 to vector<8x128xf32>
    %255 = arith.cmpf ogt, %253, %254 : vector<8x128xf32>
    %256 = arith.extui %255 : vector<8x128xi1> to vector<8x128xi32>
    %257 = arith.sitofp %256 : vector<8x128xi32> to vector<8x128xf32>
    %c0_151 = arith.constant 0 : index
    %c0_152 = arith.constant 0 : index
    %258 = vector.load %arg21[%c0_151, %c0_152] : memref<8x128xf32, #tpu.memory_space<vmem>>, vector<8x128xf32>
    tpu.vector_store %arg21[%c0_151, %c0_152], %240 {strides = array<i32>} : memref<8x128xf32, #tpu.memory_space<vmem>>, vector<8x128xf32>,
    %c0_153 = arith.constant 0 : index
    %c0_154 = arith.constant 0 : index
    %259 = vector.load %arg19[%c0_153, %c0_154] : memref<8x128xf32, #tpu.memory_space<vmem>>, vector<8x128xf32>
    tpu.vector_store %arg19[%c0_153, %c0_154], %252 {strides = array<i32>} : memref<8x128xf32, #tpu.memory_space<vmem>>, vector<8x128xf32>,
    %c0_155 = arith.constant 0 : index
    %c0_156 = arith.constant 0 : index
    %260 = vector.load %arg20[%c0_155, %c0_156] : memref<8x128xf32, #tpu.memory_space<vmem>>, vector<8x128xf32>
    tpu.vector_store %arg20[%c0_155, %c0_156], %257 {strides = array<i32>} : memref<8x128xf32, #tpu.memory_space<vmem>>, vector<8x128xf32>,
    %261 = tpu.concatenate %257, %230 in 1 : vector<8x128xf32>, vector<8x128xf32> -> vector<8x256xf32>
    %cst_157 = arith.constant dense<0.000000e+00> : vector<8x128xf32>
    %262 = tpu.matmul %261, %19, %cst_157 {dimension_numbers = #tpu.dot_dimension_numbers<[1], [0], [0], [1], [0, 0, 1, 1], [], []>} : vector<8x256xf32>, vector<256x128xf32>, vector<8x128xf32> -> vector<8x128xf32>
    %263 = vector.broadcast %20 : vector<1x128xf32> to vector<8x128xf32>
    %264 = arith.addf %262, %263 : vector<8x128xf32>
    %c0_158 = arith.constant 0 : index
    %c0_159 = arith.constant 0 : index
    %265 = vector.load %arg24[%c0_158, %c0_159] : memref<8x128xf32, #tpu.memory_space<vmem>>, vector<8x128xf32>
    %266 = vector.broadcast %12 : vector<1x128xf32> to vector<8x128xf32>
    %267 = arith.mulf %266, %265 : vector<8x128xf32>
    %268 = vector.broadcast %14 : vector<1x128xf32> to vector<8x128xf32>
    %269 = arith.mulf %268, %230 : vector<8x128xf32>
    %270 = arith.addf %267, %269 : vector<8x128xf32>
    %cst_160 = arith.constant 1.800000e+00 : f32
    %271 = vector.broadcast %cst_160 : f32 to vector<8x128xf32>
    %272 = arith.mulf %271, %270 : vector<8x128xf32>
    %cst_161 = arith.constant 0.00999999977 : f32
    %273 = vector.broadcast %cst_161 : f32 to vector<8x128xf32>
    %274 = arith.addf %273, %272 : vector<8x128xf32>
    %c0_162 = arith.constant 0 : index
    %c0_163 = arith.constant 0 : index
    %275 = vector.load %arg22[%c0_162, %c0_163] : memref<8x128xf32, #tpu.memory_space<vmem>>, vector<8x128xf32>
    %276 = vector.broadcast %9 : vector<1x128xf32> to vector<8x128xf32>
    %277 = arith.mulf %275, %276 : vector<8x128xf32>
    %278 = vector.broadcast %11 : vector<1x128xf32> to vector<8x128xf32>
    %279 = arith.mulf %278, %264 : vector<8x128xf32>
    %280 = arith.addf %277, %279 : vector<8x128xf32>
    %281 = arith.mulf %274, %230 : vector<8x128xf32>
    %282 = arith.subf %280, %281 : vector<8x128xf32>
    %283 = arith.subf %282, %274 : vector<8x128xf32>
    %cst_164 = arith.constant 0.000000e+00 : f32
    %284 = vector.broadcast %cst_164 : f32 to vector<8x128xf32>
    %285 = arith.cmpf ogt, %283, %284 : vector<8x128xf32>
    %286 = arith.extui %285 : vector<8x128xi1> to vector<8x128xi32>
    %287 = arith.sitofp %286 : vector<8x128xi32> to vector<8x128xf32>
    %c0_165 = arith.constant 0 : index
    %c0_166 = arith.constant 0 : index
    %288 = vector.load %arg24[%c0_165, %c0_166] : memref<8x128xf32, #tpu.memory_space<vmem>>, vector<8x128xf32>
    tpu.vector_store %arg24[%c0_165, %c0_166], %270 {strides = array<i32>} : memref<8x128xf32, #tpu.memory_space<vmem>>, vector<8x128xf32>,
    %c0_167 = arith.constant 0 : index
    %c0_168 = arith.constant 0 : index
    %289 = vector.load %arg22[%c0_167, %c0_168] : memref<8x128xf32, #tpu.memory_space<vmem>>, vector<8x128xf32>
    tpu.vector_store %arg22[%c0_167, %c0_168], %282 {strides = array<i32>} : memref<8x128xf32, #tpu.memory_space<vmem>>, vector<8x128xf32>,
    %c0_169 = arith.constant 0 : index
    %c0_170 = arith.constant 0 : index
    %290 = vector.load %arg23[%c0_169, %c0_170] : memref<8x128xf32, #tpu.memory_space<vmem>>, vector<8x128xf32>
    tpu.vector_store %arg23[%c0_169, %c0_170], %287 {strides = array<i32>} : memref<8x128xf32, #tpu.memory_space<vmem>>, vector<8x128xf32>,
    %cst_171 = arith.constant dense<0.000000e+00> : vector<8x128xf32>
    %291 = tpu.matmul %287, %21, %cst_171 {dimension_numbers = #tpu.dot_dimension_numbers<[1], [0], [0], [1], [0, 0, 1, 1], [], []>} : vector<8x128xf32>, vector<128x128xf32>, vector<8x128xf32> -> vector<8x128xf32>
    %292 = vector.broadcast %22 : vector<1x128xf32> to vector<8x128xf32>
    %293 = arith.addf %291, %292 : vector<8x128xf32>
    %c0_172 = arith.constant 0 : index
    %c0_173 = arith.constant 0 : index
    %294 = vector.load %arg25[%c0_172, %c0_173] : memref<8x128xf32, #tpu.memory_space<vmem>>, vector<8x128xf32>
    %295 = vector.broadcast %15 : vector<1x128xf32> to vector<8x128xf32>
    %296 = arith.mulf %294, %295 : vector<8x128xf32>
    %297 = vector.broadcast %17 : vector<1x128xf32> to vector<8x128xf32>
    %298 = arith.mulf %297, %293 : vector<8x128xf32>
    %299 = arith.addf %296, %298 : vector<8x128xf32>
    %c0_174 = arith.constant 0 : index
    %c0_175 = arith.constant 0 : index
    %300 = vector.load %arg25[%c0_174, %c0_175] : memref<8x128xf32, #tpu.memory_space<vmem>>, vector<8x128xf32>
    tpu.vector_store %arg25[%c0_174, %c0_175], %299 {strides = array<i32>} : memref<8x128xf32, #tpu.memory_space<vmem>>, vector<8x128xf32>,
    %c8_i32_176 = arith.constant 8 : i32
    %301 = arith.muli %arg0, %c8_i32_176 : i32
    %c2_i32 = arith.constant 2 : i32
    %302 = arith.addi %301, %c2_i32 : i32
    %cst_177 = arith.constant dense<0xFF800000> : vector<8xf32>
    %303 = vector.multi_reduction <maximumf>, %299, %cst_177 [1] : vector<8x128xf32> to vector<8xf32>
    %304 = vector.shape_cast %303 : vector<8xf32> to vector<8x1xf32>
    %305 = vector.broadcast %304 : vector<8x1xf32> to vector<8x128xf32>
    %306 = arith.subf %299, %305 : vector<8x128xf32>
    %307 = math.exp %306 : vector<8x128xf32>
    %cst_178 = arith.constant dense<0.000000e+00> : vector<8xf32>
    %308 = vector.multi_reduction <add>, %307, %cst_178 [1] : vector<8x128xf32> to vector<8xf32>
    %309 = vector.shape_cast %308 : vector<8xf32> to vector<8x1xf32>
    %310 = tpu.reciprocal %309 {approx = true} : vector<8x1xf32> -> vector<8x1xf32>
    %311 = vector.broadcast %310 : vector<8x1xf32> to vector<8x128xf32>
    %312 = arith.mulf %307, %311 : vector<8x128xf32>
    %c10_i32_179 = arith.constant 10 : i32
    %313 = arith.cmpi sgt, %302, %c10_i32_179 : i32
    %c16_i32_180 = arith.constant 16 : i32
    %314 = arith.cmpi slt, %302, %c16_i32_180 : i32
    %315 = arith.andi %313, %314 : i1
    %316 = arith.extui %315 : i1 to i32
    %317 = arith.sitofp %316 : i32 to f32
    %c0_181 = arith.constant 0 : index
    %c0_182 = arith.constant 0 : index
    %318 = vector.load %arg15[%c0_181, %c0_182] : memref<8x128xf32, #tpu.memory_space<vmem>>, vector<8x128xf32>
    %319 = vector.broadcast %317 : f32 to vector<8x128xf32>
    %320 = arith.mulf %319, %312 : vector<8x128xf32>
    %321 = arith.addf %318, %320 : vector<8x128xf32>
    %c0_183 = arith.constant 0 : index
    %c0_184 = arith.constant 0 : index
    %322 = vector.load %arg15[%c0_183, %c0_184] : memref<8x128xf32, #tpu.memory_space<vmem>>, vector<8x128xf32>
    tpu.vector_store %arg15[%c0_183, %c0_184], %321 {strides = array<i32>} : memref<8x128xf32, #tpu.memory_space<vmem>>, vector<8x128xf32>,
    %c2_185 = arith.constant 2 : index
    %c0_186 = arith.constant 0 : index
    %c0_187 = arith.constant 0 : index
    %323 = vector.load %arg16[%c2_185, %c0_186, %c0_187] : memref<8x8x128xf32, #tpu.memory_space<vmem>>, vector<1x8x128xf32>
    %324 = vector.shape_cast %323 : vector<1x8x128xf32> to vector<8x128xf32>
    %325 = vector.shape_cast %257 : vector<8x128xf32> to vector<1x8x128xf32>
    tpu.vector_store %arg16[%c2_185, %c0_186, %c0_187], %325 {strides = array<i32>} : memref<8x8x128xf32, #tpu.memory_space<vmem>>, vector<1x8x128xf32>,
    %c2_188 = arith.constant 2 : index
    %c0_189 = arith.constant 0 : index
    %c0_190 = arith.constant 0 : index
    %326 = vector.load %arg17[%c2_188, %c0_189, %c0_190] : memref<8x8x128xf32, #tpu.memory_space<vmem>>, vector<1x8x128xf32>
    %327 = vector.shape_cast %326 : vector<1x8x128xf32> to vector<8x128xf32>
    %328 = vector.shape_cast %252 : vector<8x128xf32> to vector<1x8x128xf32>
    tpu.vector_store %arg17[%c2_188, %c0_189, %c0_190], %328 {strides = array<i32>} : memref<8x8x128xf32, #tpu.memory_space<vmem>>, vector<1x8x128xf32>,
    %c2_191 = arith.constant 2 : index
    %c0_192 = arith.constant 0 : index
    %c0_193 = arith.constant 0 : index
    %329 = vector.load %arg18[%c2_191, %c0_192, %c0_193] : memref<8x8x128xf32, #tpu.memory_space<vmem>>, vector<1x8x128xf32>
    %330 = vector.shape_cast %329 : vector<1x8x128xf32> to vector<8x128xf32>
    %331 = vector.shape_cast %299 : vector<8x128xf32> to vector<1x8x128xf32>
    tpu.vector_store %arg18[%c2_191, %c0_192, %c0_193], %331 {strides = array<i32>} : memref<8x8x128xf32, #tpu.memory_space<vmem>>, vector<1x8x128xf32>,
    %c0_194 = arith.constant 0 : index
    %c0_195 = arith.constant 0 : index
    %332 = vector.load %arg20[%c0_194, %c0_195] : memref<8x128xf32, #tpu.memory_space<vmem>>, vector<8x128xf32>
    %c0_196 = arith.constant 0 : index
    %c0_197 = arith.constant 0 : index
    %333 = vector.load %arg23[%c0_196, %c0_197] : memref<8x128xf32, #tpu.memory_space<vmem>>, vector<8x128xf32>
    %c3 = arith.constant 3 : index
    %c0_198 = arith.constant 0 : index
    %c0_199 = arith.constant 0 : index
    %334 = vector.load %arg1[%c3, %c0_198, %c0_199] : memref<8x8x128xf32, #tpu.memory_space<vmem>>, vector<1x8x128xf32>
    %335 = vector.shape_cast %334 : vector<1x8x128xf32> to vector<8x128xf32>
    %cst_200 = arith.constant dense<0.000000e+00> : vector<8x128xf32>
    %336 = tpu.matmul %332, %18, %cst_200 {dimension_numbers = #tpu.dot_dimension_numbers<[1], [0], [0], [1], [0, 0, 1, 1], [], []>} : vector<8x128xf32>, vector<128x128xf32>, vector<8x128xf32> -> vector<8x128xf32>
    %337 = arith.addf %335, %336 : vector<8x128xf32>
    %c0_201 = arith.constant 0 : index
    %c0_202 = arith.constant 0 : index
    %338 = vector.load %arg21[%c0_201, %c0_202] : memref<8x128xf32, #tpu.memory_space<vmem>>, vector<8x128xf32>
    %339 = vector.broadcast %6 : vector<1x128xf32> to vector<8x128xf32>
    %340 = arith.mulf %339, %338 : vector<8x128xf32>
    %341 = vector.broadcast %8 : vector<1x128xf32> to vector<8x128xf32>
    %342 = arith.mulf %341, %332 : vector<8x128xf32>
    %343 = arith.addf %340, %342 : vector<8x128xf32>
    %cst_203 = arith.constant 1.800000e+00 : f32
    %344 = vector.broadcast %cst_203 : f32 to vector<8x128xf32>
    %345 = arith.mulf %344, %343 : vector<8x128xf32>
    %cst_204 = arith.constant 0.00999999977 : f32
    %346 = vector.broadcast %cst_204 : f32 to vector<8x128xf32>
    %347 = arith.addf %346, %345 : vector<8x128xf32>
    %c0_205 = arith.constant 0 : index
    %c0_206 = arith.constant 0 : index
    %348 = vector.load %arg19[%c0_205, %c0_206] : memref<8x128xf32, #tpu.memory_space<vmem>>, vector<8x128xf32>
    %349 = vector.broadcast %3 : vector<1x128xf32> to vector<8x128xf32>
    %350 = arith.mulf %348, %349 : vector<8x128xf32>
    %351 = vector.broadcast %5 : vector<1x128xf32> to vector<8x128xf32>
    %352 = arith.mulf %351, %337 : vector<8x128xf32>
    %353 = arith.addf %350, %352 : vector<8x128xf32>
    %354 = arith.mulf %347, %332 : vector<8x128xf32>
    %355 = arith.subf %353, %354 : vector<8x128xf32>
    %356 = arith.subf %355, %347 : vector<8x128xf32>
    %cst_207 = arith.constant 0.000000e+00 : f32
    %357 = vector.broadcast %cst_207 : f32 to vector<8x128xf32>
    %358 = arith.cmpf ogt, %356, %357 : vector<8x128xf32>
    %359 = arith.extui %358 : vector<8x128xi1> to vector<8x128xi32>
    %360 = arith.sitofp %359 : vector<8x128xi32> to vector<8x128xf32>
    %c0_208 = arith.constant 0 : index
    %c0_209 = arith.constant 0 : index
    %361 = vector.load %arg21[%c0_208, %c0_209] : memref<8x128xf32, #tpu.memory_space<vmem>>, vector<8x128xf32>
    tpu.vector_store %arg21[%c0_208, %c0_209], %343 {strides = array<i32>} : memref<8x128xf32, #tpu.memory_space<vmem>>, vector<8x128xf32>,
    %c0_210 = arith.constant 0 : index
    %c0_211 = arith.constant 0 : index
    %362 = vector.load %arg19[%c0_210, %c0_211] : memref<8x128xf32, #tpu.memory_space<vmem>>, vector<8x128xf32>
    tpu.vector_store %arg19[%c0_210, %c0_211], %355 {strides = array<i32>} : memref<8x128xf32, #tpu.memory_space<vmem>>, vector<8x128xf32>,
    %c0_212 = arith.constant 0 : index
    %c0_213 = arith.constant 0 : index
    %363 = vector.load %arg20[%c0_212, %c0_213] : memref<8x128xf32, #tpu.memory_space<vmem>>, vector<8x128xf32>
    tpu.vector_store %arg20[%c0_212, %c0_213], %360 {strides = array<i32>} : memref<8x128xf32, #tpu.memory_space<vmem>>, vector<8x128xf32>,
    %364 = tpu.concatenate %360, %333 in 1 : vector<8x128xf32>, vector<8x128xf32> -> vector<8x256xf32>
    %cst_214 = arith.constant dense<0.000000e+00> : vector<8x128xf32>
    %365 = tpu.matmul %364, %19, %cst_214 {dimension_numbers = #tpu.dot_dimension_numbers<[1], [0], [0], [1], [0, 0, 1, 1], [], []>} : vector<8x256xf32>, vector<256x128xf32>, vector<8x128xf32> -> vector<8x128xf32>
    %366 = vector.broadcast %20 : vector<1x128xf32> to vector<8x128xf32>
    %367 = arith.addf %365, %366 : vector<8x128xf32>
    %c0_215 = arith.constant 0 : index
    %c0_216 = arith.constant 0 : index
    %368 = vector.load %arg24[%c0_215, %c0_216] : memref<8x128xf32, #tpu.memory_space<vmem>>, vector<8x128xf32>
    %369 = vector.broadcast %12 : vector<1x128xf32> to vector<8x128xf32>
    %370 = arith.mulf %369, %368 : vector<8x128xf32>
    %371 = vector.broadcast %14 : vector<1x128xf32> to vector<8x128xf32>
    %372 = arith.mulf %371, %333 : vector<8x128xf32>
    %373 = arith.addf %370, %372 : vector<8x128xf32>
    %cst_217 = arith.constant 1.800000e+00 : f32
    %374 = vector.broadcast %cst_217 : f32 to vector<8x128xf32>
    %375 = arith.mulf %374, %373 : vector<8x128xf32>
    %cst_218 = arith.constant 0.00999999977 : f32
    %376 = vector.broadcast %cst_218 : f32 to vector<8x128xf32>
    %377 = arith.addf %376, %375 : vector<8x128xf32>
    %c0_219 = arith.constant 0 : index
    %c0_220 = arith.constant 0 : index
    %378 = vector.load %arg22[%c0_219, %c0_220] : memref<8x128xf32, #tpu.memory_space<vmem>>, vector<8x128xf32>
    %379 = vector.broadcast %9 : vector<1x128xf32> to vector<8x128xf32>
    %380 = arith.mulf %378, %379 : vector<8x128xf32>
    %381 = vector.broadcast %11 : vector<1x128xf32> to vector<8x128xf32>
    %382 = arith.mulf %381, %367 : vector<8x128xf32>
    %383 = arith.addf %380, %382 : vector<8x128xf32>
    %384 = arith.mulf %377, %333 : vector<8x128xf32>
    %385 = arith.subf %383, %384 : vector<8x128xf32>
    %386 = arith.subf %385, %377 : vector<8x128xf32>
    %cst_221 = arith.constant 0.000000e+00 : f32
    %387 = vector.broadcast %cst_221 : f32 to vector<8x128xf32>
    %388 = arith.cmpf ogt, %386, %387 : vector<8x128xf32>
    %389 = arith.extui %388 : vector<8x128xi1> to vector<8x128xi32>
    %390 = arith.sitofp %389 : vector<8x128xi32> to vector<8x128xf32>
    %c0_222 = arith.constant 0 : index
    %c0_223 = arith.constant 0 : index
    %391 = vector.load %arg24[%c0_222, %c0_223] : memref<8x128xf32, #tpu.memory_space<vmem>>, vector<8x128xf32>
    tpu.vector_store %arg24[%c0_222, %c0_223], %373 {strides = array<i32>} : memref<8x128xf32, #tpu.memory_space<vmem>>, vector<8x128xf32>,
    %c0_224 = arith.constant 0 : index
    %c0_225 = arith.constant 0 : index
    %392 = vector.load %arg22[%c0_224, %c0_225] : memref<8x128xf32, #tpu.memory_space<vmem>>, vector<8x128xf32>
    tpu.vector_store %arg22[%c0_224, %c0_225], %385 {strides = array<i32>} : memref<8x128xf32, #tpu.memory_space<vmem>>, vector<8x128xf32>,
    %c0_226 = arith.constant 0 : index
    %c0_227 = arith.constant 0 : index
    %393 = vector.load %arg23[%c0_226, %c0_227] : memref<8x128xf32, #tpu.memory_space<vmem>>, vector<8x128xf32>
    tpu.vector_store %arg23[%c0_226, %c0_227], %390 {strides = array<i32>} : memref<8x128xf32, #tpu.memory_space<vmem>>, vector<8x128xf32>,
    %cst_228 = arith.constant dense<0.000000e+00> : vector<8x128xf32>
    %394 = tpu.matmul %390, %21, %cst_228 {dimension_numbers = #tpu.dot_dimension_numbers<[1], [0], [0], [1], [0, 0, 1, 1], [], []>} : vector<8x128xf32>, vector<128x128xf32>, vector<8x128xf32> -> vector<8x128xf32>
    %395 = vector.broadcast %22 : vector<1x128xf32> to vector<8x128xf32>
    %396 = arith.addf %394, %395 : vector<8x128xf32>
    %c0_229 = arith.constant 0 : index
    %c0_230 = arith.constant 0 : index
    %397 = vector.load %arg25[%c0_229, %c0_230] : memref<8x128xf32, #tpu.memory_space<vmem>>, vector<8x128xf32>
    %398 = vector.broadcast %15 : vector<1x128xf32> to vector<8x128xf32>
    %399 = arith.mulf %397, %398 : vector<8x128xf32>
    %400 = vector.broadcast %17 : vector<1x128xf32> to vector<8x128xf32>
    %401 = arith.mulf %400, %396 : vector<8x128xf32>
    %402 = arith.addf %399, %401 : vector<8x128xf32>
    %c0_231 = arith.constant 0 : index
    %c0_232 = arith.constant 0 : index
    %403 = vector.load %arg25[%c0_231, %c0_232] : memref<8x128xf32, #tpu.memory_space<vmem>>, vector<8x128xf32>
    tpu.vector_store %arg25[%c0_231, %c0_232], %402 {strides = array<i32>} : memref<8x128xf32, #tpu.memory_space<vmem>>, vector<8x128xf32>,
    %c8_i32_233 = arith.constant 8 : i32
    %404 = arith.muli %arg0, %c8_i32_233 : i32
    %c3_i32 = arith.constant 3 : i32
    %405 = arith.addi %404, %c3_i32 : i32
    %cst_234 = arith.constant dense<0xFF800000> : vector<8xf32>
    %406 = vector.multi_reduction <maximumf>, %402, %cst_234 [1] : vector<8x128xf32> to vector<8xf32>
    %407 = vector.shape_cast %406 : vector<8xf32> to vector<8x1xf32>
    %408 = vector.broadcast %407 : vector<8x1xf32> to vector<8x128xf32>
    %409 = arith.subf %402, %408 : vector<8x128xf32>
    %410 = math.exp %409 : vector<8x128xf32>
    %cst_235 = arith.constant dense<0.000000e+00> : vector<8xf32>
    %411 = vector.multi_reduction <add>, %410, %cst_235 [1] : vector<8x128xf32> to vector<8xf32>
    %412 = vector.shape_cast %411 : vector<8xf32> to vector<8x1xf32>
    %413 = tpu.reciprocal %412 {approx = true} : vector<8x1xf32> -> vector<8x1xf32>
    %414 = vector.broadcast %413 : vector<8x1xf32> to vector<8x128xf32>
    %415 = arith.mulf %410, %414 : vector<8x128xf32>
    %c10_i32_236 = arith.constant 10 : i32
    %416 = arith.cmpi sgt, %405, %c10_i32_236 : i32
    %c16_i32_237 = arith.constant 16 : i32
    %417 = arith.cmpi slt, %405, %c16_i32_237 : i32
    %418 = arith.andi %416, %417 : i1
    %419 = arith.extui %418 : i1 to i32
    %420 = arith.sitofp %419 : i32 to f32
    %c0_238 = arith.constant 0 : index
    %c0_239 = arith.constant 0 : index
    %421 = vector.load %arg15[%c0_238, %c0_239] : memref<8x128xf32, #tpu.memory_space<vmem>>, vector<8x128xf32>
    %422 = vector.broadcast %420 : f32 to vector<8x128xf32>
    %423 = arith.mulf %422, %415 : vector<8x128xf32>
    %424 = arith.addf %421, %423 : vector<8x128xf32>
    %c0_240 = arith.constant 0 : index
    %c0_241 = arith.constant 0 : index
    %425 = vector.load %arg15[%c0_240, %c0_241] : memref<8x128xf32, #tpu.memory_space<vmem>>, vector<8x128xf32>
    tpu.vector_store %arg15[%c0_240, %c0_241], %424 {strides = array<i32>} : memref<8x128xf32, #tpu.memory_space<vmem>>, vector<8x128xf32>,
    %c3_242 = arith.constant 3 : index
    %c0_243 = arith.constant 0 : index
    %c0_244 = arith.constant 0 : index
    %426 = vector.load %arg16[%c3_242, %c0_243, %c0_244] : memref<8x8x128xf32, #tpu.memory_space<vmem>>, vector<1x8x128xf32>
    %427 = vector.shape_cast %426 : vector<1x8x128xf32> to vector<8x128xf32>
    %428 = vector.shape_cast %360 : vector<8x128xf32> to vector<1x8x128xf32>
    tpu.vector_store %arg16[%c3_242, %c0_243, %c0_244], %428 {strides = array<i32>} : memref<8x8x128xf32, #tpu.memory_space<vmem>>, vector<1x8x128xf32>,
    %c3_245 = arith.constant 3 : index
    %c0_246 = arith.constant 0 : index
    %c0_247 = arith.constant 0 : index
    %429 = vector.load %arg17[%c3_245, %c0_246, %c0_247] : memref<8x8x128xf32, #tpu.memory_space<vmem>>, vector<1x8x128xf32>
    %430 = vector.shape_cast %429 : vector<1x8x128xf32> to vector<8x128xf32>
    %431 = vector.shape_cast %355 : vector<8x128xf32> to vector<1x8x128xf32>
    tpu.vector_store %arg17[%c3_245, %c0_246, %c0_247], %431 {strides = array<i32>} : memref<8x8x128xf32, #tpu.memory_space<vmem>>, vector<1x8x128xf32>,
    %c3_248 = arith.constant 3 : index
    %c0_249 = arith.constant 0 : index
    %c0_250 = arith.constant 0 : index
    %432 = vector.load %arg18[%c3_248, %c0_249, %c0_250] : memref<8x8x128xf32, #tpu.memory_space<vmem>>, vector<1x8x128xf32>
    %433 = vector.shape_cast %432 : vector<1x8x128xf32> to vector<8x128xf32>
    %434 = vector.shape_cast %402 : vector<8x128xf32> to vector<1x8x128xf32>
    tpu.vector_store %arg18[%c3_248, %c0_249, %c0_250], %434 {strides = array<i32>} : memref<8x8x128xf32, #tpu.memory_space<vmem>>, vector<1x8x128xf32>,
    %c0_251 = arith.constant 0 : index
    %c0_252 = arith.constant 0 : index
    %435 = vector.load %arg20[%c0_251, %c0_252] : memref<8x128xf32, #tpu.memory_space<vmem>>, vector<8x128xf32>
    %c0_253 = arith.constant 0 : index
    %c0_254 = arith.constant 0 : index
    %436 = vector.load %arg23[%c0_253, %c0_254] : memref<8x128xf32, #tpu.memory_space<vmem>>, vector<8x128xf32>
    %c4 = arith.constant 4 : index
    %c0_255 = arith.constant 0 : index
    %c0_256 = arith.constant 0 : index
    %437 = vector.load %arg1[%c4, %c0_255, %c0_256] : memref<8x8x128xf32, #tpu.memory_space<vmem>>, vector<1x8x128xf32>
    %438 = vector.shape_cast %437 : vector<1x8x128xf32> to vector<8x128xf32>
    %cst_257 = arith.constant dense<0.000000e+00> : vector<8x128xf32>
    %439 = tpu.matmul %435, %18, %cst_257 {dimension_numbers = #tpu.dot_dimension_numbers<[1], [0], [0], [1], [0, 0, 1, 1], [], []>} : vector<8x128xf32>, vector<128x128xf32>, vector<8x128xf32> -> vector<8x128xf32>
    %440 = arith.addf %438, %439 : vector<8x128xf32>
    %c0_258 = arith.constant 0 : index
    %c0_259 = arith.constant 0 : index
    %441 = vector.load %arg21[%c0_258, %c0_259] : memref<8x128xf32, #tpu.memory_space<vmem>>, vector<8x128xf32>
    %442 = vector.broadcast %6 : vector<1x128xf32> to vector<8x128xf32>
    %443 = arith.mulf %442, %441 : vector<8x128xf32>
    %444 = vector.broadcast %8 : vector<1x128xf32> to vector<8x128xf32>
    %445 = arith.mulf %444, %435 : vector<8x128xf32>
    %446 = arith.addf %443, %445 : vector<8x128xf32>
    %cst_260 = arith.constant 1.800000e+00 : f32
    %447 = vector.broadcast %cst_260 : f32 to vector<8x128xf32>
    %448 = arith.mulf %447, %446 : vector<8x128xf32>
    %cst_261 = arith.constant 0.00999999977 : f32
    %449 = vector.broadcast %cst_261 : f32 to vector<8x128xf32>
    %450 = arith.addf %449, %448 : vector<8x128xf32>
    %c0_262 = arith.constant 0 : index
    %c0_263 = arith.constant 0 : index
    %451 = vector.load %arg19[%c0_262, %c0_263] : memref<8x128xf32, #tpu.memory_space<vmem>>, vector<8x128xf32>
    %452 = vector.broadcast %3 : vector<1x128xf32> to vector<8x128xf32>
    %453 = arith.mulf %451, %452 : vector<8x128xf32>
    %454 = vector.broadcast %5 : vector<1x128xf32> to vector<8x128xf32>
    %455 = arith.mulf %454, %440 : vector<8x128xf32>
    %456 = arith.addf %453, %455 : vector<8x128xf32>
    %457 = arith.mulf %450, %435 : vector<8x128xf32>
    %458 = arith.subf %456, %457 : vector<8x128xf32>
    %459 = arith.subf %458, %450 : vector<8x128xf32>
    %cst_264 = arith.constant 0.000000e+00 : f32
    %460 = vector.broadcast %cst_264 : f32 to vector<8x128xf32>
    %461 = arith.cmpf ogt, %459, %460 : vector<8x128xf32>
    %462 = arith.extui %461 : vector<8x128xi1> to vector<8x128xi32>
    %463 = arith.sitofp %462 : vector<8x128xi32> to vector<8x128xf32>
    %c0_265 = arith.constant 0 : index
    %c0_266 = arith.constant 0 : index
    %464 = vector.load %arg21[%c0_265, %c0_266] : memref<8x128xf32, #tpu.memory_space<vmem>>, vector<8x128xf32>
    tpu.vector_store %arg21[%c0_265, %c0_266], %446 {strides = array<i32>} : memref<8x128xf32, #tpu.memory_space<vmem>>, vector<8x128xf32>,
    %c0_267 = arith.constant 0 : index
    %c0_268 = arith.constant 0 : index
    %465 = vector.load %arg19[%c0_267, %c0_268] : memref<8x128xf32, #tpu.memory_space<vmem>>, vector<8x128xf32>
    tpu.vector_store %arg19[%c0_267, %c0_268], %458 {strides = array<i32>} : memref<8x128xf32, #tpu.memory_space<vmem>>, vector<8x128xf32>,
    %c0_269 = arith.constant 0 : index
    %c0_270 = arith.constant 0 : index
    %466 = vector.load %arg20[%c0_269, %c0_270] : memref<8x128xf32, #tpu.memory_space<vmem>>, vector<8x128xf32>
    tpu.vector_store %arg20[%c0_269, %c0_270], %463 {strides = array<i32>} : memref<8x128xf32, #tpu.memory_space<vmem>>, vector<8x128xf32>,
    %467 = tpu.concatenate %463, %436 in 1 : vector<8x128xf32>, vector<8x128xf32> -> vector<8x256xf32>
    %cst_271 = arith.constant dense<0.000000e+00> : vector<8x128xf32>
    %468 = tpu.matmul %467, %19, %cst_271 {dimension_numbers = #tpu.dot_dimension_numbers<[1], [0], [0], [1], [0, 0, 1, 1], [], []>} : vector<8x256xf32>, vector<256x128xf32>, vector<8x128xf32> -> vector<8x128xf32>
    %469 = vector.broadcast %20 : vector<1x128xf32> to vector<8x128xf32>
    %470 = arith.addf %468, %469 : vector<8x128xf32>
    %c0_272 = arith.constant 0 : index
    %c0_273 = arith.constant 0 : index
    %471 = vector.load %arg24[%c0_272, %c0_273] : memref<8x128xf32, #tpu.memory_space<vmem>>, vector<8x128xf32>
    %472 = vector.broadcast %12 : vector<1x128xf32> to vector<8x128xf32>
    %473 = arith.mulf %472, %471 : vector<8x128xf32>
    %474 = vector.broadcast %14 : vector<1x128xf32> to vector<8x128xf32>
    %475 = arith.mulf %474, %436 : vector<8x128xf32>
    %476 = arith.addf %473, %475 : vector<8x128xf32>
    %cst_274 = arith.constant 1.800000e+00 : f32
    %477 = vector.broadcast %cst_274 : f32 to vector<8x128xf32>
    %478 = arith.mulf %477, %476 : vector<8x128xf32>
    %cst_275 = arith.constant 0.00999999977 : f32
    %479 = vector.broadcast %cst_275 : f32 to vector<8x128xf32>
    %480 = arith.addf %479, %478 : vector<8x128xf32>
    %c0_276 = arith.constant 0 : index
    %c0_277 = arith.constant 0 : index
    %481 = vector.load %arg22[%c0_276, %c0_277] : memref<8x128xf32, #tpu.memory_space<vmem>>, vector<8x128xf32>
    %482 = vector.broadcast %9 : vector<1x128xf32> to vector<8x128xf32>
    %483 = arith.mulf %481, %482 : vector<8x128xf32>
    %484 = vector.broadcast %11 : vector<1x128xf32> to vector<8x128xf32>
    %485 = arith.mulf %484, %470 : vector<8x128xf32>
    %486 = arith.addf %483, %485 : vector<8x128xf32>
    %487 = arith.mulf %480, %436 : vector<8x128xf32>
    %488 = arith.subf %486, %487 : vector<8x128xf32>
    %489 = arith.subf %488, %480 : vector<8x128xf32>
    %cst_278 = arith.constant 0.000000e+00 : f32
    %490 = vector.broadcast %cst_278 : f32 to vector<8x128xf32>
    %491 = arith.cmpf ogt, %489, %490 : vector<8x128xf32>
    %492 = arith.extui %491 : vector<8x128xi1> to vector<8x128xi32>
    %493 = arith.sitofp %492 : vector<8x128xi32> to vector<8x128xf32>
    %c0_279 = arith.constant 0 : index
    %c0_280 = arith.constant 0 : index
    %494 = vector.load %arg24[%c0_279, %c0_280] : memref<8x128xf32, #tpu.memory_space<vmem>>, vector<8x128xf32>
    tpu.vector_store %arg24[%c0_279, %c0_280], %476 {strides = array<i32>} : memref<8x128xf32, #tpu.memory_space<vmem>>, vector<8x128xf32>,
    %c0_281 = arith.constant 0 : index
    %c0_282 = arith.constant 0 : index
    %495 = vector.load %arg22[%c0_281, %c0_282] : memref<8x128xf32, #tpu.memory_space<vmem>>, vector<8x128xf32>
    tpu.vector_store %arg22[%c0_281, %c0_282], %488 {strides = array<i32>} : memref<8x128xf32, #tpu.memory_space<vmem>>, vector<8x128xf32>,
    %c0_283 = arith.constant 0 : index
    %c0_284 = arith.constant 0 : index
    %496 = vector.load %arg23[%c0_283, %c0_284] : memref<8x128xf32, #tpu.memory_space<vmem>>, vector<8x128xf32>
    tpu.vector_store %arg23[%c0_283, %c0_284], %493 {strides = array<i32>} : memref<8x128xf32, #tpu.memory_space<vmem>>, vector<8x128xf32>,
    %cst_285 = arith.constant dense<0.000000e+00> : vector<8x128xf32>
    %497 = tpu.matmul %493, %21, %cst_285 {dimension_numbers = #tpu.dot_dimension_numbers<[1], [0], [0], [1], [0, 0, 1, 1], [], []>} : vector<8x128xf32>, vector<128x128xf32>, vector<8x128xf32> -> vector<8x128xf32>
    %498 = vector.broadcast %22 : vector<1x128xf32> to vector<8x128xf32>
    %499 = arith.addf %497, %498 : vector<8x128xf32>
    %c0_286 = arith.constant 0 : index
    %c0_287 = arith.constant 0 : index
    %500 = vector.load %arg25[%c0_286, %c0_287] : memref<8x128xf32, #tpu.memory_space<vmem>>, vector<8x128xf32>
    %501 = vector.broadcast %15 : vector<1x128xf32> to vector<8x128xf32>
    %502 = arith.mulf %500, %501 : vector<8x128xf32>
    %503 = vector.broadcast %17 : vector<1x128xf32> to vector<8x128xf32>
    %504 = arith.mulf %503, %499 : vector<8x128xf32>
    %505 = arith.addf %502, %504 : vector<8x128xf32>
    %c0_288 = arith.constant 0 : index
    %c0_289 = arith.constant 0 : index
    %506 = vector.load %arg25[%c0_288, %c0_289] : memref<8x128xf32, #tpu.memory_space<vmem>>, vector<8x128xf32>
    tpu.vector_store %arg25[%c0_288, %c0_289], %505 {strides = array<i32>} : memref<8x128xf32, #tpu.memory_space<vmem>>, vector<8x128xf32>,
    %c8_i32_290 = arith.constant 8 : i32
    %507 = arith.muli %arg0, %c8_i32_290 : i32
    %c4_i32 = arith.constant 4 : i32
    %508 = arith.addi %507, %c4_i32 : i32
    %cst_291 = arith.constant dense<0xFF800000> : vector<8xf32>
    %509 = vector.multi_reduction <maximumf>, %505, %cst_291 [1] : vector<8x128xf32> to vector<8xf32>
    %510 = vector.shape_cast %509 : vector<8xf32> to vector<8x1xf32>
    %511 = vector.broadcast %510 : vector<8x1xf32> to vector<8x128xf32>
    %512 = arith.subf %505, %511 : vector<8x128xf32>
    %513 = math.exp %512 : vector<8x128xf32>
    %cst_292 = arith.constant dense<0.000000e+00> : vector<8xf32>
    %514 = vector.multi_reduction <add>, %513, %cst_292 [1] : vector<8x128xf32> to vector<8xf32>
    %515 = vector.shape_cast %514 : vector<8xf32> to vector<8x1xf32>
    %516 = tpu.reciprocal %515 {approx = true} : vector<8x1xf32> -> vector<8x1xf32>
    %517 = vector.broadcast %516 : vector<8x1xf32> to vector<8x128xf32>
    %518 = arith.mulf %513, %517 : vector<8x128xf32>
    %c10_i32_293 = arith.constant 10 : i32
    %519 = arith.cmpi sgt, %508, %c10_i32_293 : i32
    %c16_i32_294 = arith.constant 16 : i32
    %520 = arith.cmpi slt, %508, %c16_i32_294 : i32
    %521 = arith.andi %519, %520 : i1
    %522 = arith.extui %521 : i1 to i32
    %523 = arith.sitofp %522 : i32 to f32
    %c0_295 = arith.constant 0 : index
    %c0_296 = arith.constant 0 : index
    %524 = vector.load %arg15[%c0_295, %c0_296] : memref<8x128xf32, #tpu.memory_space<vmem>>, vector<8x128xf32>
    %525 = vector.broadcast %523 : f32 to vector<8x128xf32>
    %526 = arith.mulf %525, %518 : vector<8x128xf32>
    %527 = arith.addf %524, %526 : vector<8x128xf32>
    %c0_297 = arith.constant 0 : index
    %c0_298 = arith.constant 0 : index
    %528 = vector.load %arg15[%c0_297, %c0_298] : memref<8x128xf32, #tpu.memory_space<vmem>>, vector<8x128xf32>
    tpu.vector_store %arg15[%c0_297, %c0_298], %527 {strides = array<i32>} : memref<8x128xf32, #tpu.memory_space<vmem>>, vector<8x128xf32>,
    %c4_299 = arith.constant 4 : index
    %c0_300 = arith.constant 0 : index
    %c0_301 = arith.constant 0 : index
    %529 = vector.load %arg16[%c4_299, %c0_300, %c0_301] : memref<8x8x128xf32, #tpu.memory_space<vmem>>, vector<1x8x128xf32>
    %530 = vector.shape_cast %529 : vector<1x8x128xf32> to vector<8x128xf32>
    %531 = vector.shape_cast %463 : vector<8x128xf32> to vector<1x8x128xf32>
    tpu.vector_store %arg16[%c4_299, %c0_300, %c0_301], %531 {strides = array<i32>} : memref<8x8x128xf32, #tpu.memory_space<vmem>>, vector<1x8x128xf32>,
    %c4_302 = arith.constant 4 : index
    %c0_303 = arith.constant 0 : index
    %c0_304 = arith.constant 0 : index
    %532 = vector.load %arg17[%c4_302, %c0_303, %c0_304] : memref<8x8x128xf32, #tpu.memory_space<vmem>>, vector<1x8x128xf32>
    %533 = vector.shape_cast %532 : vector<1x8x128xf32> to vector<8x128xf32>
    %534 = vector.shape_cast %458 : vector<8x128xf32> to vector<1x8x128xf32>
    tpu.vector_store %arg17[%c4_302, %c0_303, %c0_304], %534 {strides = array<i32>} : memref<8x8x128xf32, #tpu.memory_space<vmem>>, vector<1x8x128xf32>,
    %c4_305 = arith.constant 4 : index
    %c0_306 = arith.constant 0 : index
    %c0_307 = arith.constant 0 : index
    %535 = vector.load %arg18[%c4_305, %c0_306, %c0_307] : memref<8x8x128xf32, #tpu.memory_space<vmem>>, vector<1x8x128xf32>
    %536 = vector.shape_cast %535 : vector<1x8x128xf32> to vector<8x128xf32>
    %537 = vector.shape_cast %505 : vector<8x128xf32> to vector<1x8x128xf32>
    tpu.vector_store %arg18[%c4_305, %c0_306, %c0_307], %537 {strides = array<i32>} : memref<8x8x128xf32, #tpu.memory_space<vmem>>, vector<1x8x128xf32>,
    %c0_308 = arith.constant 0 : index
    %c0_309 = arith.constant 0 : index
    %538 = vector.load %arg20[%c0_308, %c0_309] : memref<8x128xf32, #tpu.memory_space<vmem>>, vector<8x128xf32>
    %c0_310 = arith.constant 0 : index
    %c0_311 = arith.constant 0 : index
    %539 = vector.load %arg23[%c0_310, %c0_311] : memref<8x128xf32, #tpu.memory_space<vmem>>, vector<8x128xf32>
    %c5 = arith.constant 5 : index
    %c0_312 = arith.constant 0 : index
    %c0_313 = arith.constant 0 : index
    %540 = vector.load %arg1[%c5, %c0_312, %c0_313] : memref<8x8x128xf32, #tpu.memory_space<vmem>>, vector<1x8x128xf32>
    %541 = vector.shape_cast %540 : vector<1x8x128xf32> to vector<8x128xf32>
    %cst_314 = arith.constant dense<0.000000e+00> : vector<8x128xf32>
    %542 = tpu.matmul %538, %18, %cst_314 {dimension_numbers = #tpu.dot_dimension_numbers<[1], [0], [0], [1], [0, 0, 1, 1], [], []>} : vector<8x128xf32>, vector<128x128xf32>, vector<8x128xf32> -> vector<8x128xf32>
    %543 = arith.addf %541, %542 : vector<8x128xf32>
    %c0_315 = arith.constant 0 : index
    %c0_316 = arith.constant 0 : index
    %544 = vector.load %arg21[%c0_315, %c0_316] : memref<8x128xf32, #tpu.memory_space<vmem>>, vector<8x128xf32>
    %545 = vector.broadcast %6 : vector<1x128xf32> to vector<8x128xf32>
    %546 = arith.mulf %545, %544 : vector<8x128xf32>
    %547 = vector.broadcast %8 : vector<1x128xf32> to vector<8x128xf32>
    %548 = arith.mulf %547, %538 : vector<8x128xf32>
    %549 = arith.addf %546, %548 : vector<8x128xf32>
    %cst_317 = arith.constant 1.800000e+00 : f32
    %550 = vector.broadcast %cst_317 : f32 to vector<8x128xf32>
    %551 = arith.mulf %550, %549 : vector<8x128xf32>
    %cst_318 = arith.constant 0.00999999977 : f32
    %552 = vector.broadcast %cst_318 : f32 to vector<8x128xf32>
    %553 = arith.addf %552, %551 : vector<8x128xf32>
    %c0_319 = arith.constant 0 : index
    %c0_320 = arith.constant 0 : index
    %554 = vector.load %arg19[%c0_319, %c0_320] : memref<8x128xf32, #tpu.memory_space<vmem>>, vector<8x128xf32>
    %555 = vector.broadcast %3 : vector<1x128xf32> to vector<8x128xf32>
    %556 = arith.mulf %554, %555 : vector<8x128xf32>
    %557 = vector.broadcast %5 : vector<1x128xf32> to vector<8x128xf32>
    %558 = arith.mulf %557, %543 : vector<8x128xf32>
    %559 = arith.addf %556, %558 : vector<8x128xf32>
    %560 = arith.mulf %553, %538 : vector<8x128xf32>
    %561 = arith.subf %559, %560 : vector<8x128xf32>
    %562 = arith.subf %561, %553 : vector<8x128xf32>
    %cst_321 = arith.constant 0.000000e+00 : f32
    %563 = vector.broadcast %cst_321 : f32 to vector<8x128xf32>
    %564 = arith.cmpf ogt, %562, %563 : vector<8x128xf32>
    %565 = arith.extui %564 : vector<8x128xi1> to vector<8x128xi32>
    %566 = arith.sitofp %565 : vector<8x128xi32> to vector<8x128xf32>
    %c0_322 = arith.constant 0 : index
    %c0_323 = arith.constant 0 : index
    %567 = vector.load %arg21[%c0_322, %c0_323] : memref<8x128xf32, #tpu.memory_space<vmem>>, vector<8x128xf32>
    tpu.vector_store %arg21[%c0_322, %c0_323], %549 {strides = array<i32>} : memref<8x128xf32, #tpu.memory_space<vmem>>, vector<8x128xf32>,
    %c0_324 = arith.constant 0 : index
    %c0_325 = arith.constant 0 : index
    %568 = vector.load %arg19[%c0_324, %c0_325] : memref<8x128xf32, #tpu.memory_space<vmem>>, vector<8x128xf32>
    tpu.vector_store %arg19[%c0_324, %c0_325], %561 {strides = array<i32>} : memref<8x128xf32, #tpu.memory_space<vmem>>, vector<8x128xf32>,
    %c0_326 = arith.constant 0 : index
    %c0_327 = arith.constant 0 : index
    %569 = vector.load %arg20[%c0_326, %c0_327] : memref<8x128xf32, #tpu.memory_space<vmem>>, vector<8x128xf32>
    tpu.vector_store %arg20[%c0_326, %c0_327], %566 {strides = array<i32>} : memref<8x128xf32, #tpu.memory_space<vmem>>, vector<8x128xf32>,
    %570 = tpu.concatenate %566, %539 in 1 : vector<8x128xf32>, vector<8x128xf32> -> vector<8x256xf32>
    %cst_328 = arith.constant dense<0.000000e+00> : vector<8x128xf32>
    %571 = tpu.matmul %570, %19, %cst_328 {dimension_numbers = #tpu.dot_dimension_numbers<[1], [0], [0], [1], [0, 0, 1, 1], [], []>} : vector<8x256xf32>, vector<256x128xf32>, vector<8x128xf32> -> vector<8x128xf32>
    %572 = vector.broadcast %20 : vector<1x128xf32> to vector<8x128xf32>
    %573 = arith.addf %571, %572 : vector<8x128xf32>
    %c0_329 = arith.constant 0 : index
    %c0_330 = arith.constant 0 : index
    %574 = vector.load %arg24[%c0_329, %c0_330] : memref<8x128xf32, #tpu.memory_space<vmem>>, vector<8x128xf32>
    %575 = vector.broadcast %12 : vector<1x128xf32> to vector<8x128xf32>
    %576 = arith.mulf %575, %574 : vector<8x128xf32>
    %577 = vector.broadcast %14 : vector<1x128xf32> to vector<8x128xf32>
    %578 = arith.mulf %577, %539 : vector<8x128xf32>
    %579 = arith.addf %576, %578 : vector<8x128xf32>
    %cst_331 = arith.constant 1.800000e+00 : f32
    %580 = vector.broadcast %cst_331 : f32 to vector<8x128xf32>
    %581 = arith.mulf %580, %579 : vector<8x128xf32>
    %cst_332 = arith.constant 0.00999999977 : f32
    %582 = vector.broadcast %cst_332 : f32 to vector<8x128xf32>
    %583 = arith.addf %582, %581 : vector<8x128xf32>
    %c0_333 = arith.constant 0 : index
    %c0_334 = arith.constant 0 : index
    %584 = vector.load %arg22[%c0_333, %c0_334] : memref<8x128xf32, #tpu.memory_space<vmem>>, vector<8x128xf32>
    %585 = vector.broadcast %9 : vector<1x128xf32> to vector<8x128xf32>
    %586 = arith.mulf %584, %585 : vector<8x128xf32>
    %587 = vector.broadcast %11 : vector<1x128xf32> to vector<8x128xf32>
    %588 = arith.mulf %587, %573 : vector<8x128xf32>
    %589 = arith.addf %586, %588 : vector<8x128xf32>
    %590 = arith.mulf %583, %539 : vector<8x128xf32>
    %591 = arith.subf %589, %590 : vector<8x128xf32>
    %592 = arith.subf %591, %583 : vector<8x128xf32>
    %cst_335 = arith.constant 0.000000e+00 : f32
    %593 = vector.broadcast %cst_335 : f32 to vector<8x128xf32>
    %594 = arith.cmpf ogt, %592, %593 : vector<8x128xf32>
    %595 = arith.extui %594 : vector<8x128xi1> to vector<8x128xi32>
    %596 = arith.sitofp %595 : vector<8x128xi32> to vector<8x128xf32>
    %c0_336 = arith.constant 0 : index
    %c0_337 = arith.constant 0 : index
    %597 = vector.load %arg24[%c0_336, %c0_337] : memref<8x128xf32, #tpu.memory_space<vmem>>, vector<8x128xf32>
    tpu.vector_store %arg24[%c0_336, %c0_337], %579 {strides = array<i32>} : memref<8x128xf32, #tpu.memory_space<vmem>>, vector<8x128xf32>,
    %c0_338 = arith.constant 0 : index
    %c0_339 = arith.constant 0 : index
    %598 = vector.load %arg22[%c0_338, %c0_339] : memref<8x128xf32, #tpu.memory_space<vmem>>, vector<8x128xf32>
    tpu.vector_store %arg22[%c0_338, %c0_339], %591 {strides = array<i32>} : memref<8x128xf32, #tpu.memory_space<vmem>>, vector<8x128xf32>,
    %c0_340 = arith.constant 0 : index
    %c0_341 = arith.constant 0 : index
    %599 = vector.load %arg23[%c0_340, %c0_341] : memref<8x128xf32, #tpu.memory_space<vmem>>, vector<8x128xf32>
    tpu.vector_store %arg23[%c0_340, %c0_341], %596 {strides = array<i32>} : memref<8x128xf32, #tpu.memory_space<vmem>>, vector<8x128xf32>,
    %cst_342 = arith.constant dense<0.000000e+00> : vector<8x128xf32>
    %600 = tpu.matmul %596, %21, %cst_342 {dimension_numbers = #tpu.dot_dimension_numbers<[1], [0], [0], [1], [0, 0, 1, 1], [], []>} : vector<8x128xf32>, vector<128x128xf32>, vector<8x128xf32> -> vector<8x128xf32>
    %601 = vector.broadcast %22 : vector<1x128xf32> to vector<8x128xf32>
    %602 = arith.addf %600, %601 : vector<8x128xf32>
    %c0_343 = arith.constant 0 : index
    %c0_344 = arith.constant 0 : index
    %603 = vector.load %arg25[%c0_343, %c0_344] : memref<8x128xf32, #tpu.memory_space<vmem>>, vector<8x128xf32>
    %604 = vector.broadcast %15 : vector<1x128xf32> to vector<8x128xf32>
    %605 = arith.mulf %603, %604 : vector<8x128xf32>
    %606 = vector.broadcast %17 : vector<1x128xf32> to vector<8x128xf32>
    %607 = arith.mulf %606, %602 : vector<8x128xf32>
    %608 = arith.addf %605, %607 : vector<8x128xf32>
    %c0_345 = arith.constant 0 : index
    %c0_346 = arith.constant 0 : index
    %609 = vector.load %arg25[%c0_345, %c0_346] : memref<8x128xf32, #tpu.memory_space<vmem>>, vector<8x128xf32>
    tpu.vector_store %arg25[%c0_345, %c0_346], %608 {strides = array<i32>} : memref<8x128xf32, #tpu.memory_space<vmem>>, vector<8x128xf32>,
    %c8_i32_347 = arith.constant 8 : i32
    %610 = arith.muli %arg0, %c8_i32_347 : i32
    %c5_i32 = arith.constant 5 : i32
    %611 = arith.addi %610, %c5_i32 : i32
    %cst_348 = arith.constant dense<0xFF800000> : vector<8xf32>
    %612 = vector.multi_reduction <maximumf>, %608, %cst_348 [1] : vector<8x128xf32> to vector<8xf32>
    %613 = vector.shape_cast %612 : vector<8xf32> to vector<8x1xf32>
    %614 = vector.broadcast %613 : vector<8x1xf32> to vector<8x128xf32>
    %615 = arith.subf %608, %614 : vector<8x128xf32>
    %616 = math.exp %615 : vector<8x128xf32>
    %cst_349 = arith.constant dense<0.000000e+00> : vector<8xf32>
    %617 = vector.multi_reduction <add>, %616, %cst_349 [1] : vector<8x128xf32> to vector<8xf32>
    %618 = vector.shape_cast %617 : vector<8xf32> to vector<8x1xf32>
    %619 = tpu.reciprocal %618 {approx = true} : vector<8x1xf32> -> vector<8x1xf32>
    %620 = vector.broadcast %619 : vector<8x1xf32> to vector<8x128xf32>
    %621 = arith.mulf %616, %620 : vector<8x128xf32>
    %c10_i32_350 = arith.constant 10 : i32
    %622 = arith.cmpi sgt, %611, %c10_i32_350 : i32
    %c16_i32_351 = arith.constant 16 : i32
    %623 = arith.cmpi slt, %611, %c16_i32_351 : i32
    %624 = arith.andi %622, %623 : i1
    %625 = arith.extui %624 : i1 to i32
    %626 = arith.sitofp %625 : i32 to f32
    %c0_352 = arith.constant 0 : index
    %c0_353 = arith.constant 0 : index
    %627 = vector.load %arg15[%c0_352, %c0_353] : memref<8x128xf32, #tpu.memory_space<vmem>>, vector<8x128xf32>
    %628 = vector.broadcast %626 : f32 to vector<8x128xf32>
    %629 = arith.mulf %628, %621 : vector<8x128xf32>
    %630 = arith.addf %627, %629 : vector<8x128xf32>
    %c0_354 = arith.constant 0 : index
    %c0_355 = arith.constant 0 : index
    %631 = vector.load %arg15[%c0_354, %c0_355] : memref<8x128xf32, #tpu.memory_space<vmem>>, vector<8x128xf32>
    tpu.vector_store %arg15[%c0_354, %c0_355], %630 {strides = array<i32>} : memref<8x128xf32, #tpu.memory_space<vmem>>, vector<8x128xf32>,
    %c5_356 = arith.constant 5 : index
    %c0_357 = arith.constant 0 : index
    %c0_358 = arith.constant 0 : index
    %632 = vector.load %arg16[%c5_356, %c0_357, %c0_358] : memref<8x8x128xf32, #tpu.memory_space<vmem>>, vector<1x8x128xf32>
    %633 = vector.shape_cast %632 : vector<1x8x128xf32> to vector<8x128xf32>
    %634 = vector.shape_cast %566 : vector<8x128xf32> to vector<1x8x128xf32>
    tpu.vector_store %arg16[%c5_356, %c0_357, %c0_358], %634 {strides = array<i32>} : memref<8x8x128xf32, #tpu.memory_space<vmem>>, vector<1x8x128xf32>,
    %c5_359 = arith.constant 5 : index
    %c0_360 = arith.constant 0 : index
    %c0_361 = arith.constant 0 : index
    %635 = vector.load %arg17[%c5_359, %c0_360, %c0_361] : memref<8x8x128xf32, #tpu.memory_space<vmem>>, vector<1x8x128xf32>
    %636 = vector.shape_cast %635 : vector<1x8x128xf32> to vector<8x128xf32>
    %637 = vector.shape_cast %561 : vector<8x128xf32> to vector<1x8x128xf32>
    tpu.vector_store %arg17[%c5_359, %c0_360, %c0_361], %637 {strides = array<i32>} : memref<8x8x128xf32, #tpu.memory_space<vmem>>, vector<1x8x128xf32>,
    %c5_362 = arith.constant 5 : index
    %c0_363 = arith.constant 0 : index
    %c0_364 = arith.constant 0 : index
    %638 = vector.load %arg18[%c5_362, %c0_363, %c0_364] : memref<8x8x128xf32, #tpu.memory_space<vmem>>, vector<1x8x128xf32>
    %639 = vector.shape_cast %638 : vector<1x8x128xf32> to vector<8x128xf32>
    %640 = vector.shape_cast %608 : vector<8x128xf32> to vector<1x8x128xf32>
    tpu.vector_store %arg18[%c5_362, %c0_363, %c0_364], %640 {strides = array<i32>} : memref<8x8x128xf32, #tpu.memory_space<vmem>>, vector<1x8x128xf32>,
    %c0_365 = arith.constant 0 : index
    %c0_366 = arith.constant 0 : index
    %641 = vector.load %arg20[%c0_365, %c0_366] : memref<8x128xf32, #tpu.memory_space<vmem>>, vector<8x128xf32>
    %c0_367 = arith.constant 0 : index
    %c0_368 = arith.constant 0 : index
    %642 = vector.load %arg23[%c0_367, %c0_368] : memref<8x128xf32, #tpu.memory_space<vmem>>, vector<8x128xf32>
    %c6 = arith.constant 6 : index
    %c0_369 = arith.constant 0 : index
    %c0_370 = arith.constant 0 : index
    %643 = vector.load %arg1[%c6, %c0_369, %c0_370] : memref<8x8x128xf32, #tpu.memory_space<vmem>>, vector<1x8x128xf32>
    %644 = vector.shape_cast %643 : vector<1x8x128xf32> to vector<8x128xf32>
    %cst_371 = arith.constant dense<0.000000e+00> : vector<8x128xf32>
    %645 = tpu.matmul %641, %18, %cst_371 {dimension_numbers = #tpu.dot_dimension_numbers<[1], [0], [0], [1], [0, 0, 1, 1], [], []>} : vector<8x128xf32>, vector<128x128xf32>, vector<8x128xf32> -> vector<8x128xf32>
    %646 = arith.addf %644, %645 : vector<8x128xf32>
    %c0_372 = arith.constant 0 : index
    %c0_373 = arith.constant 0 : index
    %647 = vector.load %arg21[%c0_372, %c0_373] : memref<8x128xf32, #tpu.memory_space<vmem>>, vector<8x128xf32>
    %648 = vector.broadcast %6 : vector<1x128xf32> to vector<8x128xf32>
    %649 = arith.mulf %648, %647 : vector<8x128xf32>
    %650 = vector.broadcast %8 : vector<1x128xf32> to vector<8x128xf32>
    %651 = arith.mulf %650, %641 : vector<8x128xf32>
    %652 = arith.addf %649, %651 : vector<8x128xf32>
    %cst_374 = arith.constant 1.800000e+00 : f32
    %653 = vector.broadcast %cst_374 : f32 to vector<8x128xf32>
    %654 = arith.mulf %653, %652 : vector<8x128xf32>
    %cst_375 = arith.constant 0.00999999977 : f32
    %655 = vector.broadcast %cst_375 : f32 to vector<8x128xf32>
    %656 = arith.addf %655, %654 : vector<8x128xf32>
    %c0_376 = arith.constant 0 : index
    %c0_377 = arith.constant 0 : index
    %657 = vector.load %arg19[%c0_376, %c0_377] : memref<8x128xf32, #tpu.memory_space<vmem>>, vector<8x128xf32>
    %658 = vector.broadcast %3 : vector<1x128xf32> to vector<8x128xf32>
    %659 = arith.mulf %657, %658 : vector<8x128xf32>
    %660 = vector.broadcast %5 : vector<1x128xf32> to vector<8x128xf32>
    %661 = arith.mulf %660, %646 : vector<8x128xf32>
    %662 = arith.addf %659, %661 : vector<8x128xf32>
    %663 = arith.mulf %656, %641 : vector<8x128xf32>
    %664 = arith.subf %662, %663 : vector<8x128xf32>
    %665 = arith.subf %664, %656 : vector<8x128xf32>
    %cst_378 = arith.constant 0.000000e+00 : f32
    %666 = vector.broadcast %cst_378 : f32 to vector<8x128xf32>
    %667 = arith.cmpf ogt, %665, %666 : vector<8x128xf32>
    %668 = arith.extui %667 : vector<8x128xi1> to vector<8x128xi32>
    %669 = arith.sitofp %668 : vector<8x128xi32> to vector<8x128xf32>
    %c0_379 = arith.constant 0 : index
    %c0_380 = arith.constant 0 : index
    %670 = vector.load %arg21[%c0_379, %c0_380] : memref<8x128xf32, #tpu.memory_space<vmem>>, vector<8x128xf32>
    tpu.vector_store %arg21[%c0_379, %c0_380], %652 {strides = array<i32>} : memref<8x128xf32, #tpu.memory_space<vmem>>, vector<8x128xf32>,
    %c0_381 = arith.constant 0 : index
    %c0_382 = arith.constant 0 : index
    %671 = vector.load %arg19[%c0_381, %c0_382] : memref<8x128xf32, #tpu.memory_space<vmem>>, vector<8x128xf32>
    tpu.vector_store %arg19[%c0_381, %c0_382], %664 {strides = array<i32>} : memref<8x128xf32, #tpu.memory_space<vmem>>, vector<8x128xf32>,
    %c0_383 = arith.constant 0 : index
    %c0_384 = arith.constant 0 : index
    %672 = vector.load %arg20[%c0_383, %c0_384] : memref<8x128xf32, #tpu.memory_space<vmem>>, vector<8x128xf32>
    tpu.vector_store %arg20[%c0_383, %c0_384], %669 {strides = array<i32>} : memref<8x128xf32, #tpu.memory_space<vmem>>, vector<8x128xf32>,
    %673 = tpu.concatenate %669, %642 in 1 : vector<8x128xf32>, vector<8x128xf32> -> vector<8x256xf32>
    %cst_385 = arith.constant dense<0.000000e+00> : vector<8x128xf32>
    %674 = tpu.matmul %673, %19, %cst_385 {dimension_numbers = #tpu.dot_dimension_numbers<[1], [0], [0], [1], [0, 0, 1, 1], [], []>} : vector<8x256xf32>, vector<256x128xf32>, vector<8x128xf32> -> vector<8x128xf32>
    %675 = vector.broadcast %20 : vector<1x128xf32> to vector<8x128xf32>
    %676 = arith.addf %674, %675 : vector<8x128xf32>
    %c0_386 = arith.constant 0 : index
    %c0_387 = arith.constant 0 : index
    %677 = vector.load %arg24[%c0_386, %c0_387] : memref<8x128xf32, #tpu.memory_space<vmem>>, vector<8x128xf32>
    %678 = vector.broadcast %12 : vector<1x128xf32> to vector<8x128xf32>
    %679 = arith.mulf %678, %677 : vector<8x128xf32>
    %680 = vector.broadcast %14 : vector<1x128xf32> to vector<8x128xf32>
    %681 = arith.mulf %680, %642 : vector<8x128xf32>
    %682 = arith.addf %679, %681 : vector<8x128xf32>
    %cst_388 = arith.constant 1.800000e+00 : f32
    %683 = vector.broadcast %cst_388 : f32 to vector<8x128xf32>
    %684 = arith.mulf %683, %682 : vector<8x128xf32>
    %cst_389 = arith.constant 0.00999999977 : f32
    %685 = vector.broadcast %cst_389 : f32 to vector<8x128xf32>
    %686 = arith.addf %685, %684 : vector<8x128xf32>
    %c0_390 = arith.constant 0 : index
    %c0_391 = arith.constant 0 : index
    %687 = vector.load %arg22[%c0_390, %c0_391] : memref<8x128xf32, #tpu.memory_space<vmem>>, vector<8x128xf32>
    %688 = vector.broadcast %9 : vector<1x128xf32> to vector<8x128xf32>
    %689 = arith.mulf %687, %688 : vector<8x128xf32>
    %690 = vector.broadcast %11 : vector<1x128xf32> to vector<8x128xf32>
    %691 = arith.mulf %690, %676 : vector<8x128xf32>
    %692 = arith.addf %689, %691 : vector<8x128xf32>
    %693 = arith.mulf %686, %642 : vector<8x128xf32>
    %694 = arith.subf %692, %693 : vector<8x128xf32>
    %695 = arith.subf %694, %686 : vector<8x128xf32>
    %cst_392 = arith.constant 0.000000e+00 : f32
    %696 = vector.broadcast %cst_392 : f32 to vector<8x128xf32>
    %697 = arith.cmpf ogt, %695, %696 : vector<8x128xf32>
    %698 = arith.extui %697 : vector<8x128xi1> to vector<8x128xi32>
    %699 = arith.sitofp %698 : vector<8x128xi32> to vector<8x128xf32>
    %c0_393 = arith.constant 0 : index
    %c0_394 = arith.constant 0 : index
    %700 = vector.load %arg24[%c0_393, %c0_394] : memref<8x128xf32, #tpu.memory_space<vmem>>, vector<8x128xf32>
    tpu.vector_store %arg24[%c0_393, %c0_394], %682 {strides = array<i32>} : memref<8x128xf32, #tpu.memory_space<vmem>>, vector<8x128xf32>,
    %c0_395 = arith.constant 0 : index
    %c0_396 = arith.constant 0 : index
    %701 = vector.load %arg22[%c0_395, %c0_396] : memref<8x128xf32, #tpu.memory_space<vmem>>, vector<8x128xf32>
    tpu.vector_store %arg22[%c0_395, %c0_396], %694 {strides = array<i32>} : memref<8x128xf32, #tpu.memory_space<vmem>>, vector<8x128xf32>,
    %c0_397 = arith.constant 0 : index
    %c0_398 = arith.constant 0 : index
    %702 = vector.load %arg23[%c0_397, %c0_398] : memref<8x128xf32, #tpu.memory_space<vmem>>, vector<8x128xf32>
    tpu.vector_store %arg23[%c0_397, %c0_398], %699 {strides = array<i32>} : memref<8x128xf32, #tpu.memory_space<vmem>>, vector<8x128xf32>,
    %cst_399 = arith.constant dense<0.000000e+00> : vector<8x128xf32>
    %703 = tpu.matmul %699, %21, %cst_399 {dimension_numbers = #tpu.dot_dimension_numbers<[1], [0], [0], [1], [0, 0, 1, 1], [], []>} : vector<8x128xf32>, vector<128x128xf32>, vector<8x128xf32> -> vector<8x128xf32>
    %704 = vector.broadcast %22 : vector<1x128xf32> to vector<8x128xf32>
    %705 = arith.addf %703, %704 : vector<8x128xf32>
    %c0_400 = arith.constant 0 : index
    %c0_401 = arith.constant 0 : index
    %706 = vector.load %arg25[%c0_400, %c0_401] : memref<8x128xf32, #tpu.memory_space<vmem>>, vector<8x128xf32>
    %707 = vector.broadcast %15 : vector<1x128xf32> to vector<8x128xf32>
    %708 = arith.mulf %706, %707 : vector<8x128xf32>
    %709 = vector.broadcast %17 : vector<1x128xf32> to vector<8x128xf32>
    %710 = arith.mulf %709, %705 : vector<8x128xf32>
    %711 = arith.addf %708, %710 : vector<8x128xf32>
    %c0_402 = arith.constant 0 : index
    %c0_403 = arith.constant 0 : index
    %712 = vector.load %arg25[%c0_402, %c0_403] : memref<8x128xf32, #tpu.memory_space<vmem>>, vector<8x128xf32>
    tpu.vector_store %arg25[%c0_402, %c0_403], %711 {strides = array<i32>} : memref<8x128xf32, #tpu.memory_space<vmem>>, vector<8x128xf32>,
    %c8_i32_404 = arith.constant 8 : i32
    %713 = arith.muli %arg0, %c8_i32_404 : i32
    %c6_i32 = arith.constant 6 : i32
    %714 = arith.addi %713, %c6_i32 : i32
    %cst_405 = arith.constant dense<0xFF800000> : vector<8xf32>
    %715 = vector.multi_reduction <maximumf>, %711, %cst_405 [1] : vector<8x128xf32> to vector<8xf32>
    %716 = vector.shape_cast %715 : vector<8xf32> to vector<8x1xf32>
    %717 = vector.broadcast %716 : vector<8x1xf32> to vector<8x128xf32>
    %718 = arith.subf %711, %717 : vector<8x128xf32>
    %719 = math.exp %718 : vector<8x128xf32>
    %cst_406 = arith.constant dense<0.000000e+00> : vector<8xf32>
    %720 = vector.multi_reduction <add>, %719, %cst_406 [1] : vector<8x128xf32> to vector<8xf32>
    %721 = vector.shape_cast %720 : vector<8xf32> to vector<8x1xf32>
    %722 = tpu.reciprocal %721 {approx = true} : vector<8x1xf32> -> vector<8x1xf32>
    %723 = vector.broadcast %722 : vector<8x1xf32> to vector<8x128xf32>
    %724 = arith.mulf %719, %723 : vector<8x128xf32>
    %c10_i32_407 = arith.constant 10 : i32
    %725 = arith.cmpi sgt, %714, %c10_i32_407 : i32
    %c16_i32_408 = arith.constant 16 : i32
    %726 = arith.cmpi slt, %714, %c16_i32_408 : i32
    %727 = arith.andi %725, %726 : i1
    %728 = arith.extui %727 : i1 to i32
    %729 = arith.sitofp %728 : i32 to f32
    %c0_409 = arith.constant 0 : index
    %c0_410 = arith.constant 0 : index
    %730 = vector.load %arg15[%c0_409, %c0_410] : memref<8x128xf32, #tpu.memory_space<vmem>>, vector<8x128xf32>
    %731 = vector.broadcast %729 : f32 to vector<8x128xf32>
    %732 = arith.mulf %731, %724 : vector<8x128xf32>
    %733 = arith.addf %730, %732 : vector<8x128xf32>
    %c0_411 = arith.constant 0 : index
    %c0_412 = arith.constant 0 : index
    %734 = vector.load %arg15[%c0_411, %c0_412] : memref<8x128xf32, #tpu.memory_space<vmem>>, vector<8x128xf32>
    tpu.vector_store %arg15[%c0_411, %c0_412], %733 {strides = array<i32>} : memref<8x128xf32, #tpu.memory_space<vmem>>, vector<8x128xf32>,
    %c6_413 = arith.constant 6 : index
    %c0_414 = arith.constant 0 : index
    %c0_415 = arith.constant 0 : index
    %735 = vector.load %arg16[%c6_413, %c0_414, %c0_415] : memref<8x8x128xf32, #tpu.memory_space<vmem>>, vector<1x8x128xf32>
    %736 = vector.shape_cast %735 : vector<1x8x128xf32> to vector<8x128xf32>
    %737 = vector.shape_cast %669 : vector<8x128xf32> to vector<1x8x128xf32>
    tpu.vector_store %arg16[%c6_413, %c0_414, %c0_415], %737 {strides = array<i32>} : memref<8x8x128xf32, #tpu.memory_space<vmem>>, vector<1x8x128xf32>,
    %c6_416 = arith.constant 6 : index
    %c0_417 = arith.constant 0 : index
    %c0_418 = arith.constant 0 : index
    %738 = vector.load %arg17[%c6_416, %c0_417, %c0_418] : memref<8x8x128xf32, #tpu.memory_space<vmem>>, vector<1x8x128xf32>
    %739 = vector.shape_cast %738 : vector<1x8x128xf32> to vector<8x128xf32>
    %740 = vector.shape_cast %664 : vector<8x128xf32> to vector<1x8x128xf32>
    tpu.vector_store %arg17[%c6_416, %c0_417, %c0_418], %740 {strides = array<i32>} : memref<8x8x128xf32, #tpu.memory_space<vmem>>, vector<1x8x128xf32>,
    %c6_419 = arith.constant 6 : index
    %c0_420 = arith.constant 0 : index
    %c0_421 = arith.constant 0 : index
    %741 = vector.load %arg18[%c6_419, %c0_420, %c0_421] : memref<8x8x128xf32, #tpu.memory_space<vmem>>, vector<1x8x128xf32>
    %742 = vector.shape_cast %741 : vector<1x8x128xf32> to vector<8x128xf32>
    %743 = vector.shape_cast %711 : vector<8x128xf32> to vector<1x8x128xf32>
    tpu.vector_store %arg18[%c6_419, %c0_420, %c0_421], %743 {strides = array<i32>} : memref<8x8x128xf32, #tpu.memory_space<vmem>>, vector<1x8x128xf32>,
    %c0_422 = arith.constant 0 : index
    %c0_423 = arith.constant 0 : index
    %744 = vector.load %arg20[%c0_422, %c0_423] : memref<8x128xf32, #tpu.memory_space<vmem>>, vector<8x128xf32>
    %c0_424 = arith.constant 0 : index
    %c0_425 = arith.constant 0 : index
    %745 = vector.load %arg23[%c0_424, %c0_425] : memref<8x128xf32, #tpu.memory_space<vmem>>, vector<8x128xf32>
    %c7 = arith.constant 7 : index
    %c0_426 = arith.constant 0 : index
    %c0_427 = arith.constant 0 : index
    %746 = vector.load %arg1[%c7, %c0_426, %c0_427] : memref<8x8x128xf32, #tpu.memory_space<vmem>>, vector<1x8x128xf32>
    %747 = vector.shape_cast %746 : vector<1x8x128xf32> to vector<8x128xf32>
    %cst_428 = arith.constant dense<0.000000e+00> : vector<8x128xf32>
    %748 = tpu.matmul %744, %18, %cst_428 {dimension_numbers = #tpu.dot_dimension_numbers<[1], [0], [0], [1], [0, 0, 1, 1], [], []>} : vector<8x128xf32>, vector<128x128xf32>, vector<8x128xf32> -> vector<8x128xf32>
    %749 = arith.addf %747, %748 : vector<8x128xf32>
    %c0_429 = arith.constant 0 : index
    %c0_430 = arith.constant 0 : index
    %750 = vector.load %arg21[%c0_429, %c0_430] : memref<8x128xf32, #tpu.memory_space<vmem>>, vector<8x128xf32>
    %751 = vector.broadcast %6 : vector<1x128xf32> to vector<8x128xf32>
    %752 = arith.mulf %751, %750 : vector<8x128xf32>
    %753 = vector.broadcast %8 : vector<1x128xf32> to vector<8x128xf32>
    %754 = arith.mulf %753, %744 : vector<8x128xf32>
    %755 = arith.addf %752, %754 : vector<8x128xf32>
    %cst_431 = arith.constant 1.800000e+00 : f32
    %756 = vector.broadcast %cst_431 : f32 to vector<8x128xf32>
    %757 = arith.mulf %756, %755 : vector<8x128xf32>
    %cst_432 = arith.constant 0.00999999977 : f32
    %758 = vector.broadcast %cst_432 : f32 to vector<8x128xf32>
    %759 = arith.addf %758, %757 : vector<8x128xf32>
    %c0_433 = arith.constant 0 : index
    %c0_434 = arith.constant 0 : index
    %760 = vector.load %arg19[%c0_433, %c0_434] : memref<8x128xf32, #tpu.memory_space<vmem>>, vector<8x128xf32>
    %761 = vector.broadcast %3 : vector<1x128xf32> to vector<8x128xf32>
    %762 = arith.mulf %760, %761 : vector<8x128xf32>
    %763 = vector.broadcast %5 : vector<1x128xf32> to vector<8x128xf32>
    %764 = arith.mulf %763, %749 : vector<8x128xf32>
    %765 = arith.addf %762, %764 : vector<8x128xf32>
    %766 = arith.mulf %759, %744 : vector<8x128xf32>
    %767 = arith.subf %765, %766 : vector<8x128xf32>
    %768 = arith.subf %767, %759 : vector<8x128xf32>
    %cst_435 = arith.constant 0.000000e+00 : f32
    %769 = vector.broadcast %cst_435 : f32 to vector<8x128xf32>
    %770 = arith.cmpf ogt, %768, %769 : vector<8x128xf32>
    %771 = arith.extui %770 : vector<8x128xi1> to vector<8x128xi32>
    %772 = arith.sitofp %771 : vector<8x128xi32> to vector<8x128xf32>
    %c0_436 = arith.constant 0 : index
    %c0_437 = arith.constant 0 : index
    %773 = vector.load %arg21[%c0_436, %c0_437] : memref<8x128xf32, #tpu.memory_space<vmem>>, vector<8x128xf32>
    tpu.vector_store %arg21[%c0_436, %c0_437], %755 {strides = array<i32>} : memref<8x128xf32, #tpu.memory_space<vmem>>, vector<8x128xf32>,
    %c0_438 = arith.constant 0 : index
    %c0_439 = arith.constant 0 : index
    %774 = vector.load %arg19[%c0_438, %c0_439] : memref<8x128xf32, #tpu.memory_space<vmem>>, vector<8x128xf32>
    tpu.vector_store %arg19[%c0_438, %c0_439], %767 {strides = array<i32>} : memref<8x128xf32, #tpu.memory_space<vmem>>, vector<8x128xf32>,
    %c0_440 = arith.constant 0 : index
    %c0_441 = arith.constant 0 : index
    %775 = vector.load %arg20[%c0_440, %c0_441] : memref<8x128xf32, #tpu.memory_space<vmem>>, vector<8x128xf32>
    tpu.vector_store %arg20[%c0_440, %c0_441], %772 {strides = array<i32>} : memref<8x128xf32, #tpu.memory_space<vmem>>, vector<8x128xf32>,
    %776 = tpu.concatenate %772, %745 in 1 : vector<8x128xf32>, vector<8x128xf32> -> vector<8x256xf32>
    %cst_442 = arith.constant dense<0.000000e+00> : vector<8x128xf32>
    %777 = tpu.matmul %776, %19, %cst_442 {dimension_numbers = #tpu.dot_dimension_numbers<[1], [0], [0], [1], [0, 0, 1, 1], [], []>} : vector<8x256xf32>, vector<256x128xf32>, vector<8x128xf32> -> vector<8x128xf32>
    %778 = vector.broadcast %20 : vector<1x128xf32> to vector<8x128xf32>
    %779 = arith.addf %777, %778 : vector<8x128xf32>
    %c0_443 = arith.constant 0 : index
    %c0_444 = arith.constant 0 : index
    %780 = vector.load %arg24[%c0_443, %c0_444] : memref<8x128xf32, #tpu.memory_space<vmem>>, vector<8x128xf32>
    %781 = vector.broadcast %12 : vector<1x128xf32> to vector<8x128xf32>
    %782 = arith.mulf %781, %780 : vector<8x128xf32>
    %783 = vector.broadcast %14 : vector<1x128xf32> to vector<8x128xf32>
    %784 = arith.mulf %783, %745 : vector<8x128xf32>
    %785 = arith.addf %782, %784 : vector<8x128xf32>
    %cst_445 = arith.constant 1.800000e+00 : f32
    %786 = vector.broadcast %cst_445 : f32 to vector<8x128xf32>
    %787 = arith.mulf %786, %785 : vector<8x128xf32>
    %cst_446 = arith.constant 0.00999999977 : f32
    %788 = vector.broadcast %cst_446 : f32 to vector<8x128xf32>
    %789 = arith.addf %788, %787 : vector<8x128xf32>
    %c0_447 = arith.constant 0 : index
    %c0_448 = arith.constant 0 : index
    %790 = vector.load %arg22[%c0_447, %c0_448] : memref<8x128xf32, #tpu.memory_space<vmem>>, vector<8x128xf32>
    %791 = vector.broadcast %9 : vector<1x128xf32> to vector<8x128xf32>
    %792 = arith.mulf %790, %791 : vector<8x128xf32>
    %793 = vector.broadcast %11 : vector<1x128xf32> to vector<8x128xf32>
    %794 = arith.mulf %793, %779 : vector<8x128xf32>
    %795 = arith.addf %792, %794 : vector<8x128xf32>
    %796 = arith.mulf %789, %745 : vector<8x128xf32>
    %797 = arith.subf %795, %796 : vector<8x128xf32>
    %798 = arith.subf %797, %789 : vector<8x128xf32>
    %cst_449 = arith.constant 0.000000e+00 : f32
    %799 = vector.broadcast %cst_449 : f32 to vector<8x128xf32>
    %800 = arith.cmpf ogt, %798, %799 : vector<8x128xf32>
    %801 = arith.extui %800 : vector<8x128xi1> to vector<8x128xi32>
    %802 = arith.sitofp %801 : vector<8x128xi32> to vector<8x128xf32>
    %c0_450 = arith.constant 0 : index
    %c0_451 = arith.constant 0 : index
    %803 = vector.load %arg24[%c0_450, %c0_451] : memref<8x128xf32, #tpu.memory_space<vmem>>, vector<8x128xf32>
    tpu.vector_store %arg24[%c0_450, %c0_451], %785 {strides = array<i32>} : memref<8x128xf32, #tpu.memory_space<vmem>>, vector<8x128xf32>,
    %c0_452 = arith.constant 0 : index
    %c0_453 = arith.constant 0 : index
    %804 = vector.load %arg22[%c0_452, %c0_453] : memref<8x128xf32, #tpu.memory_space<vmem>>, vector<8x128xf32>
    tpu.vector_store %arg22[%c0_452, %c0_453], %797 {strides = array<i32>} : memref<8x128xf32, #tpu.memory_space<vmem>>, vector<8x128xf32>,
    %c0_454 = arith.constant 0 : index
    %c0_455 = arith.constant 0 : index
    %805 = vector.load %arg23[%c0_454, %c0_455] : memref<8x128xf32, #tpu.memory_space<vmem>>, vector<8x128xf32>
    tpu.vector_store %arg23[%c0_454, %c0_455], %802 {strides = array<i32>} : memref<8x128xf32, #tpu.memory_space<vmem>>, vector<8x128xf32>,
    %cst_456 = arith.constant dense<0.000000e+00> : vector<8x128xf32>
    %806 = tpu.matmul %802, %21, %cst_456 {dimension_numbers = #tpu.dot_dimension_numbers<[1], [0], [0], [1], [0, 0, 1, 1], [], []>} : vector<8x128xf32>, vector<128x128xf32>, vector<8x128xf32> -> vector<8x128xf32>
    %807 = vector.broadcast %22 : vector<1x128xf32> to vector<8x128xf32>
    %808 = arith.addf %806, %807 : vector<8x128xf32>
    %c0_457 = arith.constant 0 : index
    %c0_458 = arith.constant 0 : index
    %809 = vector.load %arg25[%c0_457, %c0_458] : memref<8x128xf32, #tpu.memory_space<vmem>>, vector<8x128xf32>
    %810 = vector.broadcast %15 : vector<1x128xf32> to vector<8x128xf32>
    %811 = arith.mulf %809, %810 : vector<8x128xf32>
    %812 = vector.broadcast %17 : vector<1x128xf32> to vector<8x128xf32>
    %813 = arith.mulf %812, %808 : vector<8x128xf32>
    %814 = arith.addf %811, %813 : vector<8x128xf32>
    %c0_459 = arith.constant 0 : index
    %c0_460 = arith.constant 0 : index
    %815 = vector.load %arg25[%c0_459, %c0_460] : memref<8x128xf32, #tpu.memory_space<vmem>>, vector<8x128xf32>
    tpu.vector_store %arg25[%c0_459, %c0_460], %814 {strides = array<i32>} : memref<8x128xf32, #tpu.memory_space<vmem>>, vector<8x128xf32>,
    %c8_i32_461 = arith.constant 8 : i32
    %816 = arith.muli %arg0, %c8_i32_461 : i32
    %c7_i32 = arith.constant 7 : i32
    %817 = arith.addi %816, %c7_i32 : i32
    %cst_462 = arith.constant dense<0xFF800000> : vector<8xf32>
    %818 = vector.multi_reduction <maximumf>, %814, %cst_462 [1] : vector<8x128xf32> to vector<8xf32>
    %819 = vector.shape_cast %818 : vector<8xf32> to vector<8x1xf32>
    %820 = vector.broadcast %819 : vector<8x1xf32> to vector<8x128xf32>
    %821 = arith.subf %814, %820 : vector<8x128xf32>
    %822 = math.exp %821 : vector<8x128xf32>
    %cst_463 = arith.constant dense<0.000000e+00> : vector<8xf32>
    %823 = vector.multi_reduction <add>, %822, %cst_463 [1] : vector<8x128xf32> to vector<8xf32>
    %824 = vector.shape_cast %823 : vector<8xf32> to vector<8x1xf32>
    %825 = tpu.reciprocal %824 {approx = true} : vector<8x1xf32> -> vector<8x1xf32>
    %826 = vector.broadcast %825 : vector<8x1xf32> to vector<8x128xf32>
    %827 = arith.mulf %822, %826 : vector<8x128xf32>
    %c10_i32_464 = arith.constant 10 : i32
    %828 = arith.cmpi sgt, %817, %c10_i32_464 : i32
    %c16_i32_465 = arith.constant 16 : i32
    %829 = arith.cmpi slt, %817, %c16_i32_465 : i32
    %830 = arith.andi %828, %829 : i1
    %831 = arith.extui %830 : i1 to i32
    %832 = arith.sitofp %831 : i32 to f32
    %c0_466 = arith.constant 0 : index
    %c0_467 = arith.constant 0 : index
    %833 = vector.load %arg15[%c0_466, %c0_467] : memref<8x128xf32, #tpu.memory_space<vmem>>, vector<8x128xf32>
    %834 = vector.broadcast %832 : f32 to vector<8x128xf32>
    %835 = arith.mulf %834, %827 : vector<8x128xf32>
    %836 = arith.addf %833, %835 : vector<8x128xf32>
    %c0_468 = arith.constant 0 : index
    %c0_469 = arith.constant 0 : index
    %837 = vector.load %arg15[%c0_468, %c0_469] : memref<8x128xf32, #tpu.memory_space<vmem>>, vector<8x128xf32>
    tpu.vector_store %arg15[%c0_468, %c0_469], %836 {strides = array<i32>} : memref<8x128xf32, #tpu.memory_space<vmem>>, vector<8x128xf32>,
    %c7_470 = arith.constant 7 : index
    %c0_471 = arith.constant 0 : index
    %c0_472 = arith.constant 0 : index
    %838 = vector.load %arg16[%c7_470, %c0_471, %c0_472] : memref<8x8x128xf32, #tpu.memory_space<vmem>>, vector<1x8x128xf32>
    %839 = vector.shape_cast %838 : vector<1x8x128xf32> to vector<8x128xf32>
    %840 = vector.shape_cast %772 : vector<8x128xf32> to vector<1x8x128xf32>
    tpu.vector_store %arg16[%c7_470, %c0_471, %c0_472], %840 {strides = array<i32>} : memref<8x8x128xf32, #tpu.memory_space<vmem>>, vector<1x8x128xf32>,
    %c7_473 = arith.constant 7 : index
    %c0_474 = arith.constant 0 : index
    %c0_475 = arith.constant 0 : index
    %841 = vector.load %arg17[%c7_473, %c0_474, %c0_475] : memref<8x8x128xf32, #tpu.memory_space<vmem>>, vector<1x8x128xf32>
    %842 = vector.shape_cast %841 : vector<1x8x128xf32> to vector<8x128xf32>
    %843 = vector.shape_cast %767 : vector<8x128xf32> to vector<1x8x128xf32>
    tpu.vector_store %arg17[%c7_473, %c0_474, %c0_475], %843 {strides = array<i32>} : memref<8x8x128xf32, #tpu.memory_space<vmem>>, vector<1x8x128xf32>,
    %c7_476 = arith.constant 7 : index
    %c0_477 = arith.constant 0 : index
    %c0_478 = arith.constant 0 : index
    %844 = vector.load %arg18[%c7_476, %c0_477, %c0_478] : memref<8x8x128xf32, #tpu.memory_space<vmem>>, vector<1x8x128xf32>
    %845 = vector.shape_cast %844 : vector<1x8x128xf32> to vector<8x128xf32>
    %846 = vector.shape_cast %814 : vector<8x128xf32> to vector<1x8x128xf32>
    tpu.vector_store %arg18[%c7_476, %c0_477, %c0_478], %846 {strides = array<i32>} : memref<8x8x128xf32, #tpu.memory_space<vmem>>, vector<1x8x128xf32>,
    return
  }
  func.func @transform_0(%arg0: i32) -> (i32, i32, i32) {
    %c0_i32 = arith.constant 0 : i32
    %c0_i32_0 = arith.constant 0 : i32
    %c0_i32_1 = arith.constant 0 : i32
    return %arg0, %c0_i32, %c0_i32_0 : i32, i32, i32
  }
  func.func @transform_1(%arg0: i32) -> (i32, i32) {
    %c0_i32 = arith.constant 0 : i32
    %c0_i32_0 = arith.constant 0 : i32
    %c0_i32_1 = arith.constant 0 : i32
    return %c0_i32, %c0_i32_0 : i32, i32
  }
  func.func @transform_2(%arg0: i32) -> (i32, i32) {
    %c0_i32 = arith.constant 0 : i32
    %c0_i32_0 = arith.constant 0 : i32
    %c0_i32_1 = arith.constant 0 : i32
    return %c0_i32, %c0_i32_0 : i32, i32
  }
  func.func @transform_3(%arg0: i32) -> (i32, i32) {
    %c0_i32 = arith.constant 0 : i32
    %c0_i32_0 = arith.constant 0 : i32
    %c0_i32_1 = arith.constant 0 : i32
    return %c0_i32, %c0_i32_0 : i32, i32
  }
  func.func @transform_4(%arg0: i32) -> (i32, i32) {
    %c0_i32 = arith.constant 0 : i32
    %c0_i32_0 = arith.constant 0 : i32
    %c0_i32_1 = arith.constant 0 : i32
    return %c0_i32, %c0_i32_0 : i32, i32
  }
  func.func @transform_5(%arg0: i32) -> (i32, i32) {
    %c0_i32 = arith.constant 0 : i32
    %c0_i32_0 = arith.constant 0 : i32
    %c0_i32_1 = arith.constant 0 : i32
    return %c0_i32, %c0_i32_0 : i32, i32
  }
  func.func @transform_6(%arg0: i32) -> (i32, i32) {
    %c0_i32 = arith.constant 0 : i32
    %c0_i32_0 = arith.constant 0 : i32
    %c0_i32_1 = arith.constant 0 : i32
    return %c0_i32, %c0_i32_0 : i32, i32
  }
  func.func @transform_7(%arg0: i32) -> (i32, i32) {
    %c0_i32 = arith.constant 0 : i32
    %c0_i32_0 = arith.constant 0 : i32
    %c0_i32_1 = arith.constant 0 : i32
    return %c0_i32, %c0_i32_0 : i32, i32
  }
  func.func @transform_8(%arg0: i32) -> (i32, i32) {
    %c0_i32 = arith.constant 0 : i32
    %c0_i32_0 = arith.constant 0 : i32
    %c0_i32_1 = arith.constant 0 : i32
    return %c0_i32, %c0_i32_0 : i32, i32
  }
  func.func @transform_9(%arg0: i32) -> (i32, i32) {
    %c0_i32 = arith.constant 0 : i32
    %c0_i32_0 = arith.constant 0 : i32
    %c0_i32_1 = arith.constant 0 : i32
    return %c0_i32, %c0_i32_0 : i32, i32
  }
  func.func @transform_10(%arg0: i32) -> (i32, i32) {
    %c0_i32 = arith.constant 0 : i32
    %c0_i32_0 = arith.constant 0 : i32
    %c0_i32_1 = arith.constant 0 : i32
    return %c0_i32, %c0_i32_0 : i32, i32
  }
  func.func @transform_11(%arg0: i32) -> (i32, i32) {
    %c0_i32 = arith.constant 0 : i32
    %c0_i32_0 = arith.constant 0 : i32
    %c0_i32_1 = arith.constant 0 : i32
    return %c0_i32, %c0_i32_0 : i32, i32
  }
  func.func @transform_12(%arg0: i32) -> (i32, i32) {
    %c0_i32 = arith.constant 0 : i32
    %c0_i32_0 = arith.constant 0 : i32
    %c0_i32_1 = arith.constant 0 : i32
    return %c0_i32, %c0_i32_0 : i32, i32
  }
  func.func @transform_13(%arg0: i32) -> (i32, i32) {
    %c0_i32 = arith.constant 0 : i32
    %c0_i32_0 = arith.constant 0 : i32
    %c0_i32_1 = arith.constant 0 : i32
    return %c0_i32, %c0_i32_0 : i32, i32
  }
  func.func @transform_14(%arg0: i32) -> (i32, i32) {
    %c0_i32 = arith.constant 0 : i32
    %c0_i32_0 = arith.constant 0 : i32
    %c0_i32_1 = arith.constant 0 : i32
    return %c0_i32, %c0_i32_0 : i32, i32
  }
  func.func @transform_15(%arg0: i32) -> (i32, i32, i32) {
    %c0_i32 = arith.constant 0 : i32
    %c0_i32_0 = arith.constant 0 : i32
    %c0_i32_1 = arith.constant 0 : i32
    return %arg0, %c0_i32, %c0_i32_0 : i32, i32, i32
  }
  func.func @transform_16(%arg0: i32) -> (i32, i32, i32) {
    %c0_i32 = arith.constant 0 : i32
    %c0_i32_0 = arith.constant 0 : i32
    %c0_i32_1 = arith.constant 0 : i32
    return %arg0, %c0_i32, %c0_i32_0 : i32, i32, i32
  }
  func.func @transform_17(%arg0: i32) -> (i32, i32, i32) {
    %c0_i32 = arith.constant 0 : i32
    %c0_i32_0 = arith.constant 0 : i32
    %c0_i32_1 = arith.constant 0 : i32
    return %arg0, %c0_i32, %c0_i32_0 : i32, i32, i32
  }
}

</mosaic_0001>

<bundles_post_ra>
// kernel: tpu_custom_call.1
= control target key start
LH: loop header
LB: loop body
LE: loop exit
PB: predicated region body
PF: predicated region fallthrough
CT: control target
= control target key end

     0   :  { %s5111_s0 = inlined_call_operand.hbm [shape: f32[16,8,128], index: 0, kind: input, shape index: {}]   ;;  %s5112_s1 = inlined_call_operand.hbm [shape: f32[128,128], index: 1, kind: input, shape index: {}]   ;;  %s5113_s2 = inlined_call_operand.hbm [shape: f32[256,128], index: 2, kind: input, shape index: {}]   ;;  %s5114_s3 = inlined_call_operand.vmem [shape: f32[1,128], index: 3, kind: input, shape index: {}]   ;;  %s5115_s4 = inlined_call_operand.hbm [shape: f32[128,128], index: 4, kind: input, shape index: {}]   ;;  %s5116_s5 = inlined_call_operand.vmem [shape: f32[1,128], index: 5, kind: input, shape index: {}]   ;;  %s5117_s6 = inlined_call_operand.hbm [shape: f32[1,128], index: 6, kind: input, shape index: {}]   ;;  %s5118_s7 = inlined_call_operand.hbm [shape: f32[1,128], index: 7, kind: input, shape index: {}]   ;;  %s5119_s8 = inlined_call_operand.hbm [shape: f32[1,128], index: 8, kind: input, shape index: {}]   ;;  %s5120_s9 = inlined_call_operand.hbm [shape: f32[1,128], index: 9, kind: input, shape index: {}]   ;;  %s5121_s10 = inlined_call_operand.hbm [shape: f32[1,128], index: 10, kind: input, shape index: {}]   ;;  %s5122_s11 = inlined_call_operand.vmem [shape: f32[8,128], index: 11, kind: input, shape index: {}]   ;;  %s5123_s12 = inlined_call_operand.hbm [shape: f32[8,128], index: 12, kind: input, shape index: {}]   ;;  %s5124_s13 = inlined_call_operand.hbm [shape: f32[8,128], index: 13, kind: input, shape index: {}]   ;;  %s5125_s14 = inlined_call_operand.hbm [shape: f32[8,128], index: 14, kind: output, shape index: {0}]   ;;  %s5126_s15 = inlined_call_operand.hbm [shape: f32[16,8,128], index: 15, kind: output, shape index: {1}]   ;;  %s5127_s16 = inlined_call_operand.hbm [shape: f32[16,8,128], index: 16, kind: output, shape index: {2}]   ;;  %s5128_s17 = inlined_call_operand.hbm [shape: f32[16,8,128], index: 17, kind: output, shape index: {3}]  }
   0x1   :  { %5265 = sst [smem:[#allocation87_spill]] %s5111_s0 }
   0x2   :  { %5266 = sst [smem:[#allocation88_spill]] %s5112_s1 }
   0x3   :  { %5267 = sst [smem:[#allocation89_spill]] %s5113_s2 }
   0x4   :  { %5268 = sst [smem:[#allocation90_spill]] %s5114_s3 }
   0x5   :  { %5269 = sst [smem:[#allocation91_spill]] %s5115_s4 }
   0x6   :  { %5270 = sst [smem:[#allocation92_spill]] %s5116_s5 }
   0x7   :  { %5271 = sst [smem:[#allocation93_spill]] %s5117_s6 }
   0x8   :  { %5272 = sst [smem:[#allocation94_spill]] %s5118_s7 }
   0x9   :  { %5273 = sst [smem:[#allocation95_spill]] %s5119_s8 }
   0xa   :  { %5274 = sst [smem:[#allocation96_spill]] %s5120_s9 }
   0xb   :  { %5275 = sst [smem:[#allocation97_spill]] %s5121_s10 }
   0xc   :  { %5276 = sst [smem:[#allocation98_spill]] %s5122_s11 }
   0xd   :  { %5277 = sst [smem:[#allocation99_spill]] %s5123_s12 }
   0xe   :  { %5278 = sst [smem:[#allocation100_spill]] %s5124_s13 }
   0xf   :  { %5279 = sst [smem:[#allocation101_spill]] %s5125_s14 }
  0x10   :  { %5280 = sst [smem:[#allocation102_spill]] %s5126_s15 }
  0x11   :  { %5281 = sst [smem:[#allocation103_spill]] %s5127_s16 }
  0x12   :  { %5282 = sst [smem:[#allocation104_spill]] %s5128_s17 }
  0x13   :  { %23 = vsyncpa [#allocation10], 0 }
  0x14   :  { %25 = vsyncpa [#allocation10 + $0x1], 0 }
  0x15   :  { %26 = vsyncpa [#allocation13], 0 }
  0x16   :  { %27 = vsyncpa [#allocation16], 0 }
  0x17   :  { %28 = vsyncpa [#allocation19], 0 }
  0x18   :  { %29 = vsyncpa [#allocation22], 0 }
  0x19   :  { %30 = vsyncpa [#allocation25], 0 }
  0x1a   :  { %31 = vsyncpa [#allocation11], 0 }
  0x1b   :  { %32 = vsyncpa [#allocation29], 0 }
  0x1c   :  { %34 = vsyncpa [#allocation29 + $0x1], 0 }
  0x1d   :  { %35 = vsyncpa [#allocation32], 0 }
  0x1e   :  { %37 = vsyncpa [#allocation32 + $0x1], 0  ;;  %s3453_s24 = smov 0   ;;  %s3455_s25 = smov 0  }
  0x1f   :  { %s3457_s26 = smov 0   ;;  %s3459_s27 = smov 0  }
  0x20 LB: > { %s5283_s0 = sld [smem:[#allocation88_spill]]  ;;  %s3477_s18 = sadd.s32 4294967295, %s3342_s27   ;;  %s3342_s27 = sphi %s3459_s27, %s5497_s27   ;;  %s3338_s26 = sphi %s3457_s26, %s5496_s26   ;;  %s3334_s25 = sphi %s3455_s25, %s5495_s25   ;;  %s3330_s24 = sphi %s3453_s24, %s5494_s24  }
  0x21   : > { %p2421_p0 = scmp.ge.s32.totalorder %s3342_s27, 1  ;;  %p64_p1 = scmp.eq.s32.totalorder %s3477_s18, 0 }
  0x22   : > { %p446_p2 = scmp.lt.s32.totalorder %s3342_s27, 3  ;;  %s3344_s1 = smov [#allocation12]  }
  0x23   : > { %s459_s20 = sshll.u32 %s3344_s1, 4  ;;  %s5285_s4 = sld [smem:[#allocation91_spill]]  ;;  %s460_s20 = int_to_ptr.vmem [resolvable:$true] %s459_s20 }
  0x24   : > { %p3483_p4 = pnand %p2421_p0, %p446_p2  ;;  %s5287_s7 = sld [smem:[#allocation94_spill]] }
  0x25   : > { %s3345_s14 = smov [#allocation15]   ;;  %s5134_s16 = smov 128  }
  0x26   : > { %s457_s30 = sshll.u32 %s5283_s0, 4  ;;  %p2590_p5 = pneg %p3483_p4  ;;  %s458_s30 = int_to_ptr.hbm [resolvable:$true] %s457_s30 }
  0x27   : > { %s490_s17 = sshll.u32 %s3345_s14, 4  ;;  %s5135_s15 = smov 8   ;;  %s491_s17 = int_to_ptr.vmem [resolvable:$true] %s490_s17 }
  0x28   : > { %p3495_p7 = pnand %p2590_p5, %p64_p1  ;;  %s5288_s9 = sld [smem:[#allocation96_spill]] }
  0x29   : > { %s488_s23 = sshll.u32 %s5285_s4, 4  ;;  %s3348_s14 = smov [#allocation18]   ;;  %s489_s23 = int_to_ptr.hbm [resolvable:$true] %s488_s23 }
  0x2a   : > { %s518_s1 = sshll.u32 %s5287_s7, 4  ;;  %s520_s0 = sshll.u32 %s3348_s14, 4  ;;  %s519_s1 = int_to_ptr.hbm [resolvable:$true] %s518_s1  ;;  %s521_s0 = int_to_ptr.vmem [resolvable:$true] %s520_s0 }
  0x2b   : > { %2593 = dma.hbm_to_vmem [thread:$0]  (!%p3495_p7), %s458_s30, 2048, %s460_s20, [#allocation13], %s5134_s16, %s5134_s16, %s5135_s15  }
  0x2c   : > { %2599 = dma.hbm_to_vmem [thread:$0]  (!%p3495_p7), %s489_s23, 2048, %s491_s17, [#allocation16], %s5134_s16, %s5134_s16, %s5135_s15  }
  0x2d   : > { %2605 = dma.hbm_to_vmem [thread:$0]  (!%p3495_p7), %s519_s1, 16, %s521_s0, [#allocation19]  }
  0x2e   : > { %s542_s29 = sshll.u32 %s5288_s9, 4  ;;  %s3349_s4 = smov [#allocation21]   ;;  %s543_s29 = int_to_ptr.hbm [resolvable:$true] %s542_s29 }
  0x2f   : > { %s544_s30 = sshll.u32 %s3349_s4, 4  ;;  %s5289_s12 = sld [smem:[#allocation99_spill]]  ;;  %s545_s30 = int_to_ptr.vmem [resolvable:$true] %s544_s30 }
  0x30   : > { %2611 = dma.hbm_to_vmem [thread:$0]  (!%p3495_p7), %s543_s29, 16, %s545_s30, [#allocation22]  }
  0x31   : > { %s5290_s2 = sld [smem:[#allocation89_spill]]  ;;  %s3350_s22 = smov [#allocation24]  }
  0x32   : > { %s571_s14 = sshll.u32 %s3350_s22, 4  ;;  %s3351_s4 = smov [#allocation14]   ;;  %s572_s14 = int_to_ptr.vmem [resolvable:$true] %s571_s14 }
  0x33   : > { %s473_s1 = sshll.u32 %s3351_s4, 4  ;;  %s5291_s6 = sld [smem:[#allocation93_spill]]  ;;  %s474_s1 = int_to_ptr.vmem [resolvable:$true] %s473_s1 }
  0x34   : > { %s5292_s8 = sld [smem:[#allocation95_spill]]  ;;  %s3352_s23 = smov [#allocation17]  }
  0x35   : > { %s569_s5 = sshll.u32 %s5289_s12, 4  ;;  %s3353_s22 = smov [#allocation20]   ;;  %s570_s5 = int_to_ptr.hbm [resolvable:$true] %s569_s5 }
  0x36   : > { %2617 = dma.hbm_to_vmem [thread:$0]  (!%p3495_p7), %s570_s5, 128, %s572_s14, [#allocation25]  }
  0x37   : > { %s471_s21 = sshll.u32 %s5290_s2, 4  ;;  %s508_s5 = sshll.u32 %s3352_s23, 4  ;;  %s472_s21 = int_to_ptr.hbm [resolvable:$true] %s471_s21  ;;  %s509_s5 = int_to_ptr.vmem [resolvable:$true] %s508_s5 }
  0x38   : > { %2596 = dma.hbm_to_vmem [thread:$0]  (!%p3495_p7), %s472_s21, 4096, %s474_s1, [#allocation13], %s5134_s16, %s5134_s16, %s5135_s15  }
  0x39   : > { %s506_s20 = sshll.u32 %s5291_s6, 4  ;;  %s532_s14 = sshll.u32 %s3353_s22, 4  ;;  %s507_s20 = int_to_ptr.hbm [resolvable:$true] %s506_s20  ;;  %s533_s14 = int_to_ptr.vmem [resolvable:$true] %s532_s14 }
  0x3a   : > { %s530_s17 = sshll.u32 %s5292_s8, 4  ;;  %s5293_s10 = sld [smem:[#allocation97_spill]]  ;;  %s531_s17 = int_to_ptr.hbm [resolvable:$true] %s530_s17 }
  0x3b   : > { %2602 = dma.hbm_to_vmem [thread:$0]  (!%p3495_p7), %s507_s20, 16, %s509_s5, [#allocation16]  }
  0x3c   : > { %2608 = dma.hbm_to_vmem [thread:$0]  (!%p3495_p7), %s531_s17, 16, %s533_s14, [#allocation19]  }
  0x3d   : > { %s5294_s13 = sld [smem:[#allocation100_spill]]  ;;  %s3354_s29 = smov [#allocation23]  }
  0x3e   : > { %s556_s30 = sshll.u32 %s3354_s29, 4  ;;  %s3355_s23 = smov [#allocation26]   ;;  %s557_s30 = int_to_ptr.vmem [resolvable:$true] %s556_s30 }
  0x3f   : > { %s583_s17 = sshll.u32 %s3355_s23, 4  ;;  %s5136_s5 = sadd.s32 4294967294, %s3342_s27   ;;  %s584_s17 = int_to_ptr.vmem [resolvable:$true] %s583_s17 }
  0x40   : > { %s554_s21 = sshll.u32 %s5293_s10, 4  ;;  %s3554_s22 = sadd.s32 1, %s3342_s27   ;;  %s555_s21 = int_to_ptr.hbm [resolvable:$true] %s554_s21 }
  0x41   : > { %2614 = dma.hbm_to_vmem [thread:$0]  (!%p3495_p7), %s555_s21, 16, %s557_s30, [#allocation22]  }
  0x42   : > { %s47_s14 = ssub.s32 %s3342_s27, %s3554_s22  ;;  %s50_s4 = sadd.s32 1, %s3338_s26 }
  0x43   : > { %s581_s20 = sshll.u32 %s5294_s13, 4  ;;  %p48_p8 = scmp.eq.s32.totalorder %s47_s14, 0  ;;  %s582_s20 = int_to_ptr.hbm [resolvable:$true] %s581_s20 }
  0x44   : > { %2620 = dma.hbm_to_vmem [thread:$0]  (!%p3495_p7), %s582_s20, 128, %s584_s17, [#allocation25]  }
  0x45   : > { %p57_p9 = scmp.ne.s32.totalorder %s3338_s26, %s3334_s25  ;;  %p58_p10 = scmp.eq.s32.totalorder %s3342_s27, 0 }
  0x46   : > { %p63_p11 = scmp.ne.s32.totalorder %s3334_s25, %s3330_s24  ;;  %p5137_p0 = scmp.eq.s32.totalorder %s3477_s18, 1 }
  0x47   : > { %s3565_s7 = scalar_select %p48_p8, %s3338_s26, %s50_s4  }
  0x48   : > { %p3567_p12 = por %p58_p10, %p57_p9  ;;  %p3573_p13 = por %p64_p1, %p63_p11 }
  0x49   : > { %p387_p2 = scmp.eq.s32.totalorder %s5136_s5, 1  ;;  %p2645_p5 = scmp.lt.s32.totalorder %s3342_s27, 2 }
  0x4a   : > { %s594_s1 = sand.u32 1, %s3338_s26   ;;  %p3584_p7 = por %p5137_p0, %p57_p9 }
  0x4b   : > { %p3588_p8 = por %p387_p2, %p63_p11  ;;  %s2433_s29 = sshll.u32 %s594_s1, 6 }
  0x4c   : > { %s2534_s30 = sshll.u32 %s3342_s27, 6  ;;  %s5299_s14 = sld [smem:[#allocation87_spill]] }
  0x4d   : > { %s598_s16 = scalar_lea.vmem [#allocation9], %s2433_s29  ;;  %p3598_p9 = pnand %p2645_p5, %p3567_p12 }
  0x4e   : > { %s606_s15 = sshll.u32 %s598_s16, 4  ;;  %s595_s6 = scalar_lea.sflag [#allocation10], %s594_s1  ;;  %s607_s15 = int_to_ptr.vmem [resolvable:$true] %s606_s15 }
  0x4f   : > { %p3138_p11 = pneg %p3598_p9 }
  0x52   : > { %s603_s4 = scalar_lea.hbm %s5299_s14, %s2534_s30  ;;  %s3141_s30 = scalar_lea.hbm %s5299_s14, 128 }
  0x53   : > { %s604_s5 = sshll.u32 %s603_s4, 4  ;;  %s605_s5 = int_to_ptr.hbm [resolvable:$true] %s604_s5 }
  0x54   : > { %s3134_s8 = sshra.s32 %s605_s5, 4  ;;  %s3135_s8 = int_to_ptr.hbm [resolvable:$true] %s3134_s8 }
  0x55   : > { %s3136_s9 = scalar_lea.hbm %s3135_s8, 64  ;;  %p3142_p12 = scmp.lt.s32.totalorder %s3135_s8, %s5299_s14 }
  0x56   : > { %p3137_p10 = scmp.ne.s32.totalorder %s3135_s8, %s3136_s9  ;;  %p3143_p5 = scmp.lt.s32.totalorder %s3141_s30, %s3136_s9 }
  0x58   : > { %p3139_p2 = pnand %p3138_p11, %p3137_p10  ;;  %p3144_p0 = por %p3143_p5, %p3142_p12 }
  0x5a   : > { %p3140_p6 = pneg %p3139_p2 }
  0x5c   : > { %p3145_p3 = pnand %p3144_p0, %p3140_p6 }
  0x5e   : > { %3148 = shalt.err (!%p3145_p3)
}
  0x5f   : > { %s5301_s1 = smov 8   ;;  %s5302_s17 = smov 128  }
  0x60   : > { %2624 = dma.hbm_to_vmem [thread:$0]  (!%p3598_p9), %s605_s5, 1024, %s607_s15, %s595_s6, %s5302_s17, %s5302_s17, %s5301_s1  }
  0x61   : > { %618 = sbr.rel (%p3483_p4) target bundleno = 1841 (0x731), region = 76 }
  0x66   : > { %s3618_s4 = sand.u32 1, %s3334_s25  }
  0x67   : > { %s2437_s8 = sshll.u32 %s3618_s4, 6  ;;  %s621_s9 = scalar_lea.sflag [#allocation10], %s3618_s4 }
  0x68   : > { %s3622_s29 = scalar_lea.vmem [#allocation9], %s2437_s8 }
  0x69   : > { %3293 = dma.done.wait (%p3573_p13), %s621_s9, 1024  }
  0x6a   : > { %3295 = vsyncadd (%p3573_p13), %s621_s9, 4294966272 }
  0x6b   : > { %3297 = dma.done.wait (%p64_p1), [#allocation13], 6144  }
  0x6c   : > { %3299 = vsyncadd (%p64_p1), [#allocation13], 4294961152 }
  0x6d   : > { %3301 = dma.done.wait (%p64_p1), [#allocation16], 2064  }
  0x6e   : > { %3303 = vsyncadd (%p64_p1), [#allocation16], 4294965232 }
  0x6f   : > { %3305 = dma.done.wait (%p64_p1), [#allocation19], 32  }
  0x70   : > { %3307 = vsyncadd (%p64_p1), [#allocation19], 4294967264 }
  0x71   : > { %3309 = dma.done.wait (%p64_p1), [#allocation22], 32  }
  0x72   : > { %3311 = vsyncadd (%p64_p1), [#allocation22], 4294967264 }
  0x73   : > { %3313 = dma.done.wait (%p64_p1), [#allocation25], 256  }
  0x74   : > { %3315 = vsyncadd (%p64_p1), [#allocation25], 4294967040  ;;  %s3648_s2 = scalar_lea.vmem [#allocation28], %s2437_s8  ;;  %s3650_s6 = scalar_lea.vmem [#allocation30], %s2437_s8 }
  0x75   : > { %s3652_s15 = scalar_lea.vmem [#allocation31], %s2437_s8  ;;  %p5303_p3 = scmp.ne.s32.totalorder %s3477_s18, 0 }
  0x76   : > { %s5304_s11 = sld [smem:[#allocation98_spill]] (!%p5303_p3) }
  0x77   : > { %743 = sbr.rel (%p5303_p3) target bundleno = 133 (0x85), region = 124 }
  0x7c   : > { %v744_v0 = vld [vmem:[%s5304_s11] sm:$0xff]  ;;  %v748_v2 = vld [vmem:[#allocation26] sm:$0xff]  ;;  %v3356_v3 = vmov 0.0   ;;  %v3357_v4 = vmov 0.01  }
  0x7d   : > { %v746_v1 = vld [vmem:[#allocation24] sm:$0xff]  ;;  %745 = vst [vmem:[#allocation2] sm:$0xff] %v744_v0 }
  0x7e   : > { %747 = vst [vmem:[#allocation5] sm:$0xff] %v746_v1 }
  0x7f   : > { %749 = vst [vmem:[#allocation8] sm:$0xff] %v748_v2 }
  0x80   : > { %750 = vst [vmem:[#allocation3] sm:$0xff] %v3356_v3 }
  0x81   : > { %751 = vst [vmem:[#allocation6] sm:$0xff] %v3356_v3 }
  0x82   : > { %754 = vst [vmem:[#allocation27] sm:$0xff] %v3356_v3 }
  0x83   : > { %752 = vst [vmem:[#allocation4] sm:$0xff] %v3357_v4 }
  0x84   : > { %753 = vst [vmem:[#allocation7] sm:$0xff] %v3357_v4 }
  0x85 PF: > { %v3659_v5 = vld [vmem:[#allocation12 + $0x78] sm:$0xff]  ;;  %v3661_v6 = vld [vmem:[#allocation12 + $0x70] sm:$0xff]  ;;  %v3664_v7 = vld [vmem:[#allocation12 + $0x68] sm:$0xff]  ;;  %s5359_s3 = sld [smem:[#allocation90_spill]]  ;;  %s4891_s19 = sshll.u32 %s3477_s18, 6 }
  0x86   : > { %834 = vmatpush.msra.mxu0 %v3659_v5  ;;  %v3667_v8 = vld [vmem:[#allocation12 + $0x60] sm:$0xff]  ;;  %v3670_v9 = vld [vmem:[#allocation12 + $0x58] sm:$0xff]  ;;  %v3674_v11 = vld [vmem:[#allocation14 + $0xf0] sm:$0xff]  ;;  %s5393_s21 = sld [smem:[#allocation92_spill]]  ;;  %s2138_s23 = sshll.u32 %s3648_s2, 4  ;;  %s2139_s23 = int_to_ptr.vmem [resolvable:$true] %s2138_s23 }
  0x87   : > { %v3672_v10 = vld [vmem:[#allocation14 + $0xf8] sm:$0xff]  ;;  %v3680_v13 = vld [vmem:[#allocation14 + $0x70] sm:$0xff]  ;;  %v3685_v15 = vld [vmem:[#allocation14 + $0xe8] sm:$0xff]  ;;  %s5469_s16 = sld [smem:[#allocation102_spill]] }
  0x88   : > { %835 = vmatpush.msra.mxu0 %v3661_v6  ;;  %v3676_v12 = vld [vmem:[#allocation14 + $0x78] sm:$0xff]  ;;  %909 = vmatpush.msra.mxu2 %v3672_v10  ;;  %v3682_v14 = vld [vmem:[#allocation12 + $0x50] sm:$0xff]  ;;  %v3689_v16 = vld [vmem:[#allocation14 + $0x68] sm:$0xff] }
  0x89   : > { %889 = vmatpush.msra.mxu1 %v3676_v12  ;;  %v3691_v17 = vld [vmem:[#allocation12 + $0x48] sm:$0xff]  ;;  %v3694_v18 = vld [vmem:[#allocation14 + $0xe0] sm:$0xff]  ;;  %v3703_v21 = vld [vmem:[#allocation14 + $0xd8] sm:$0xff] }
  0x8a   : > { %836 = vmatpush.msra.mxu0 %v3664_v7  ;;  %910 = vmatpush.msra.mxu2 %v3674_v11  ;;  %v3698_v19 = vld [vmem:[#allocation14 + $0x60] sm:$0xff]  ;;  %v3706_v22 = vld [vmem:[#allocation12 + $0x38] sm:$0xff]  ;;  %v3712_v24 = vld [vmem:[#allocation14 + $0xd0] sm:$0xff] }
  0x8b   : > { %890 = vmatpush.msra.mxu1 %v3680_v13  ;;  %v3700_v20 = vld [vmem:[#allocation12 + $0x40] sm:$0xff]  ;;  %5306 = vst [vmem:[#allocation43_spill] sm:$0xff] %v3706_v22  ;;  %v3709_v23 = vld [vmem:[#allocation14 + $0x58] sm:$0xff]  ;;  %v3716_v25 = vld [vmem:[#allocation14 + $0x50] sm:$0xff] }
  0x8c   : > { %837 = vmatpush.msra.mxu0 %v3667_v8  ;;  %911 = vmatpush.msra.mxu2 %v3685_v15  ;;  %5305 = vst [vmem:[#allocation42_spill] sm:$0xff] %v3700_v20  ;;  %v3718_v26 = vld [vmem:[#allocation12 + $0x30] sm:$0xff]  ;;  %v3721_v27 = vld [vmem:[#allocation14 + $0xc8] sm:$0xff]  ;;  %v3730_v30 = vld [vmem:[#allocation14 + $0xc0] sm:$0xff] }
  0x8d   : > { %891 = vmatpush.msra.mxu1 %v3689_v16  ;;  %5307 = vst [vmem:[#allocation44_spill] sm:$0xff] %v3712_v24  ;;  %v3725_v28 = vld [vmem:[#allocation14 + $0x48] sm:$0xff]  ;;  %v3734_v31 = vld [vmem:[#allocation14 + $0x40] sm:$0xff]  ;;  %v3739_v33 = vld [vmem:[#allocation14 + $0xb8] sm:$0xff]  ;;  %s2137_s30 = scalar_lea.hbm %s5469_s16, %s4891_s19 }
  0x8e   : > { %838 = vmatpush.msra.mxu0 %v3670_v9  ;;  %912 = vmatpush.msra.mxu2 %v3694_v18  ;;  %5308 = vst [vmem:[#allocation45_spill] sm:$0xff] %v3718_v26  ;;  %v3727_v29 = vld [vmem:[#allocation12 + $0x28] sm:$0xff]  ;;  %v3736_v32 = vld [vmem:[#allocation12 + $0x20] sm:$0xff]  ;;  %v3743_v34 = vld [vmem:[#allocation14 + $0x38] sm:$0xff]  ;;  %s2140_s1 = sshll.u32 %s2137_s30, 4  ;;  %s2141_s1 = int_to_ptr.hbm [resolvable:$true] %s2140_s1 }
  0x8f   : > { %892 = vmatpush.msra.mxu1 %v3698_v19  ;;  %5309 = vst [vmem:[#allocation46_spill] sm:$0xff] %v3721_v27  ;;  %v3745_v35 = vld [vmem:[#allocation12 + $0x18] sm:$0xff]  ;;  %v3748_v36 = vld [vmem:[#allocation14 + $0xb0] sm:$0xff]  ;;  %v3757_v39 = vld [vmem:[#allocation14 + $0xa8] sm:$0xff]  ;;  %s3178_s8 = sshra.s32 %s2141_s1, 4  ;;  %s3179_s8 = int_to_ptr.hbm [resolvable:$true] %s3178_s8 }
  0x90   : > { %839 = vmatpush.msra.mxu0 %v3682_v14  ;;  %913 = vmatpush.msra.mxu2 %v3703_v21  ;;  %5310 = vst [vmem:[#allocation47_spill] sm:$0xff] %v3727_v29  ;;  %v3752_v37 = vld [vmem:[#allocation14 + $0x30] sm:$0xff]  ;;  %v3761_v40 = vld [vmem:[#allocation12 + $0x8] sm:$0xff]  ;;  %v3764_v41 = vld [vmem:[#allocation14 + $0xa0] sm:$0xff]  ;;  %s3180_s9 = scalar_lea.hbm %s3179_s8, 64  ;;  %p3185_p13 = scmp.lt.s32.totalorder %s3179_s8, %s5469_s16 }
  0x91   : > { %893 = vmatpush.msra.mxu1 %v3709_v23  ;;  %5311 = vst [vmem:[#allocation48_spill] sm:$0xff] %v3730_v30  ;;  %v3754_v38 = vld [vmem:[#allocation12 + $0x10] sm:$0xff]  ;;  %v3768_v42 = vld [vmem:[#allocation12] sm:$0xff]  ;;  %v3808_v44 = vld [vmem:[#allocation14 + $0x28] sm:$0xff]  ;;  %p3181_p1 = scmp.ne.s32.totalorder %s3179_s8, %s3180_s9 }
  0x92   : > { %840 = vmatpush.msra.mxu0 %v3691_v17  ;;  %914 = vmatpush.msra.mxu2 %v3712_v24  ;;  %5312 = vst [vmem:[#allocation49_spill] sm:$0xff] %v3736_v32  ;;  %v3771_v43 = vld [vmem:[#allocation3] sm:$0xff]  ;;  %v3810_v45 = vld [vmem:[#allocation14 + $0x98] sm:$0xff]  ;;  %v3814_v46 = vld [vmem:[#allocation14 + $0x20] sm:$0xff] }
  0x93   : > { %894 = vmatpush.msra.mxu1 %v3716_v25  ;;  %5313 = vst [vmem:[#allocation50_spill] sm:$0xff] %v3739_v33  ;;  %v3816_v47 = vld [vmem:[#allocation14 + $0x90] sm:$0xff]  ;;  %v3820_v48 = vld [vmem:[#allocation14 + $0x18] sm:$0xff]  ;;  %v3822_v49 = vld [vmem:[#allocation14 + $0x88] sm:$0xff]  ;;  %p3182_p4 = pnand %p3181_p1, %p3584_p7 }
  0x94   : > { %841 = vmatpush.msra.mxu0 %v3700_v20  ;;  %915 = vmatpush.msra.mxu2 %v3721_v27  ;;  %5314 = vst [vmem:[#allocation51_spill] sm:$0xff] %v3743_v34  ;;  %v3826_v50 = vld [vmem:[#allocation14 + $0x10] sm:$0xff]  ;;  %v3828_v51 = vld [vmem:[#allocation14 + $0x80] sm:$0xff]  ;;  %v3830_v52 = vld [vmem:[#allocation6] sm:$0xff] }
  0x95   : > { %895 = vmatpush.msra.mxu1 %v3725_v28  ;;  %5315 = vst [vmem:[#allocation52_spill] sm:$0xff] %v3745_v35  ;;  %v3832_v53 = vld [vmem:[#allocation14 + $0x8] sm:$0xff]  ;;  %v757_v54 = vld [vmem:[#allocation18] sm:$0x1]  ;;  %v3844_v57 = vld [vmem:[#allocation15 + $0x78] sm:$0xff]  ;;  %p3183_p6 = pneg %p3182_p4 }
  0x96   : > { %842 = vmatpush.msra.mxu0 %v3706_v22  ;;  %916 = vmatpush.msra.mxu2 %v3730_v30  ;;  %5316 = vst [vmem:[#allocation53_spill] sm:$0xff] %v3748_v36  ;;  %v3837_v55 = vld [vmem:[#allocation14] sm:$0xff]  ;;  %v758_v56 = vsub.f32 1.0, %v757_v54  ;;  %v3846_v58 = vld [vmem:[#allocation15 + $0x70] sm:$0xff]  ;;  %v3855_v61 = vld [vmem:[#allocation15 + $0x68] sm:$0xff] }
  0x97   : > { %896 = vmatpush.msra.mxu1 %v3734_v31  ;;  %5317 = vst [vmem:[#allocation54_spill] sm:$0xff] %v3752_v37  ;;  %963 = vmatpush.msra.mxu3 %v3844_v57  ;;  %v3853_v60 = vld [vmem:[#allocation18] ss:$0 sm:$0xff]  ;;  %v855_v62 = vld [vmem:[#allocation4] sm:$0xff]  ;;  %v3873_v3 = vld [vmem:[#allocation15 + $0x50] sm:$0xff] }
  0x98   : > { %843 = vmatpush.msra.mxu0 %v3718_v26  ;;  %917 = vmatpush.msra.mxu2 %v3739_v33  ;;  %5318 = vst [vmem:[#allocation55_spill] sm:$0xff] %v3754_v38  ;;  %v3851_v59 = vperm.slane %v758_v56, 0  ;;  %v3860_v63 = vld [vmem:[#allocation15 + $0x60] sm:$0xff]  ;;  %v859_v1 = vmul.f32 %v3853_v60, %v855_v62  ;;  %v3868_v2 = vld [vmem:[#allocation15 + $0x58] sm:$0xff]  ;;  %v3878_v54 = vld [vmem:[#allocation15 + $0x48] sm:$0xff] }
  0x99   : > { %897 = vmatpush.msra.mxu1 %v3743_v34  ;;  %5319 = vst [vmem:[#allocation56_spill] sm:$0xff] %v3757_v39  ;;  %964 = vmatpush.msra.mxu3 %v3846_v58  ;;  %v755_v56 = vld [vmem:[#allocation17] sm:$0x1] }
  0x9a   : > { %844 = vmatpush.msra.mxu0 %v3727_v29  ;;  %918 = vmatpush.msra.mxu2 %v3748_v36  ;;  %5320 = vst [vmem:[#allocation57_spill] sm:$0xff] %v3761_v40  ;;  %v863_v0 = vmul.f32 %v3851_v59, %v3771_v43  ;;  %v3883_v62 = vld [vmem:[#allocation15 + $0x40] sm:$0xff] }
  0x9b   : > { %898 = vmatpush.msra.mxu1 %v3752_v37  ;;  %5321 = vst [vmem:[#allocation58_spill] sm:$0xff] %v3764_v41  ;;  %965 = vmatpush.msra.mxu3 %v3855_v61 }
  0x9c   : > { %845 = vmatpush.msra.mxu0 %v3736_v32  ;;  %919 = vmatpush.msra.mxu2 %v3757_v39  ;;  %5322 = vst [vmem:[#allocation59_spill] sm:$0xff] %v3768_v42  ;;  %v864_v4 = vadd.f32 %v863_v0, %v859_v1  ;;  %v3888_v1 = vld [vmem:[#allocation15 + $0x38] sm:$0xff] }
  0x9d   : > { %5323 = vst [vmem:[#allocation60_spill] sm:$0xff] %v3808_v44  ;;  %899 = vmatpush.msra.mxu1 %v3808_v44  ;;  %966 = vmatpush.msra.mxu3 %v3860_v63 }
  0x9e   : > { %846 = vmatpush.msra.mxu0 %v3745_v35  ;;  %920 = vmatpush.msra.mxu2 %v3764_v41  ;;  %5324 = vst [vmem:[#allocation61_spill] sm:$0xff] %v3810_v45  ;;  %v865_v0 = vmul.f32 1.8, %v864_v4 }
  0x9f   : > { %5325 = vst [vmem:[#allocation62_spill] sm:$0xff] %v3814_v46  ;;  %900 = vmatpush.msra.mxu1 %v3814_v46  ;;  %967 = vmatpush.msra.mxu3 %v3868_v2 }
  0xa0   : > { %847 = vmatpush.msra.mxu0 %v3754_v38  ;;  %921 = vmatpush.msra.mxu2 %v3810_v45  ;;  %5326 = vst [vmem:[#allocation63_spill] sm:$0xff] %v3816_v47 }
  0xa1   : > { %5327 = vst [vmem:[#allocation64_spill] sm:$0xff] %v3820_v48  ;;  %901 = vmatpush.msra.mxu1 %v3820_v48  ;;  %968 = vmatpush.msra.mxu3 %v3873_v3 }
  0xa2   : > { %848 = vmatpush.msra.mxu0 %v3761_v40  ;;  %922 = vmatpush.msra.mxu2 %v3816_v47  ;;  %5328 = vst [vmem:[#allocation65_spill] sm:$0xff] %v3822_v49 }
  0xa3   : > { %5329 = vst [vmem:[#allocation66_spill] sm:$0xff] %v3826_v50  ;;  %902 = vmatpush.msra.mxu1 %v3826_v50  ;;  %969 = vmatpush.msra.mxu3 %v3878_v54 }
  0xa4   : > { %849 = vmatpush.msra.mxu0 %v3768_v42  ;;  %923 = vmatpush.msra.mxu2 %v3822_v49  ;;  %5330 = vst [vmem:[#allocation67_spill] sm:$0xff] %v3828_v51 }
  0xa5   : > { %850 = vmatmul.f32.vlgmr.msra.gmra.mxu0 %v3771_v43  ;;  %5331 = vst [vmem:[#allocation68_spill] sm:$0xff] %v3830_v52  ;;  %903 = vmatpush.msra.mxu1 %v3832_v53 }
  0xa6   : > { %1022 = vmatpush.msrb.mxu0 %v3659_v5  ;;  %5332 = vst [vmem:[#allocation69_spill] sm:$0xff] %v3832_v53  ;;  %924 = vmatpush.msra.mxu2 %v3828_v51 }
  0xa7   : > { %925 = vmatmul.f32.vlgmr.msra.gmra.mxu2 %v3830_v52  ;;  %5333 = vst [vmem:[#allocation70_spill] sm:$0xff] %v3837_v55  ;;  %904 = vmatpush.msra.mxu1 %v3837_v55  ;;  %v833_v52 = vld [vmem:[%s3622_s29] sm:$0xff] }
  0xa8   : > { %1023 = vmatpush.msrb.mxu0 %v3661_v6  ;;  %1082 = vmatpush.msrb.mxu2 %v3672_v10  ;;  %5334 = vst [vmem:[#allocation71_spill] sm:$0xff] %v3844_v57 }
  0xa9   : > { %1062 = vmatpush.msrb.mxu1 %v3676_v12  ;;  %5335 = vst [vmem:[#allocation72_spill] sm:$0xff] %v3846_v58  ;;  %970 = vmatpush.msra.mxu3 %v3883_v62 }
  0xaa   : > { %1024 = vmatpush.msrb.mxu0 %v3664_v7  ;;  %1083 = vmatpush.msrb.mxu2 %v3674_v11  ;;  %5336 = vst [vmem:[#allocation73_spill] sm:$0xff] %v3855_v61 }
  0xab   : > { %1063 = vmatpush.msrb.mxu1 %v3680_v13  ;;  %5337 = vst [vmem:[#allocation74_spill] sm:$0xff] %v3860_v63  ;;  %v867_v63 = vld [vmem:[#allocation2] sm:$0xff]  ;;  %971 = vmatpush.msra.mxu3 %v3888_v1 }
  0xac   : > { %1025 = vmatpush.msrb.mxu0 %v3667_v8  ;;  %1084 = vmatpush.msrb.mxu2 %v3685_v15  ;;  %5338 = vst [vmem:[#allocation75_spill] sm:$0xff] %v3868_v2  ;;  %v756_v2 = vsub.f32 1.0, %v755_v56 }
  0xad   : > { %1064 = vmatpush.msrb.mxu1 %v3689_v16  ;;  %5339 = vst [vmem:[#allocation76_spill] sm:$0xff] %v3873_v3  ;;  %v3893_v3 = vld [vmem:[#allocation17] ss:$0 sm:$0xff] }
  0xae   : > { %1026 = vmatpush.msrb.mxu0 %v3670_v9  ;;  %1085 = vmatpush.msrb.mxu2 %v3694_v18  ;;  %5340 = vst [vmem:[#allocation77_spill] sm:$0xff] %v3878_v54  ;;  %v3899_v56 = vperm.slane %v756_v2, 0  ;;  %v866_v54 = vadd.f32 0.01, %v865_v0  ;;  %v871_v58 = vmul.f32 %v3893_v3, %v867_v63  ;;  %v5158_v63 = vmov 1.0  }
  0xaf   : > { %1065 = vmatpush.msrb.mxu1 %v3698_v19  ;;  %5341 = vst [vmem:[#allocation78_spill] sm:$0xff] %v3883_v62 }
  0xb0   : > { %1027 = vmatpush.msrb.mxu0 %v3682_v14  ;;  %1086 = vmatpush.msrb.mxu2 %v3703_v21  ;;  %5342 = vst [vmem:[#allocation79_spill] sm:$0xff] %v3888_v1  ;;  %v877_v57 = vmul.f32 %v866_v54, %v3771_v43 }
  0xb1   : > { %1066 = vmatpush.msrb.mxu1 %v3709_v23 }
  0xb2   : > { %1028 = vmatpush.msrb.mxu0 %v3691_v17  ;;  %1087 = vmatpush.msrb.mxu2 %v3712_v24 }
  0xb3   : > { %1067 = vmatpush.msrb.mxu1 %v3716_v25 }
  0xb4   : > { %1029 = vmatpush.msrb.mxu0 %v3700_v20  ;;  %1088 = vmatpush.msrb.mxu2 %v3721_v27 }
  0xb5   : > { %1068 = vmatpush.msrb.mxu1 %v3725_v28 }
  0xb6   : > { %1030 = vmatpush.msrb.mxu0 %v3706_v22  ;;  %1089 = vmatpush.msrb.mxu2 %v3730_v30 }
  0xb7   : > { %1069 = vmatpush.msrb.mxu1 %v3734_v31 }
  0xb8   : > { %1031 = vmatpush.msrb.mxu0 %v3718_v26  ;;  %1090 = vmatpush.msrb.mxu2 %v3739_v33 }
  0xb9   : > { %1070 = vmatpush.msrb.mxu1 %v3743_v34 }
  0xba   : > { %1032 = vmatpush.msrb.mxu0 %v3727_v29  ;;  %1091 = vmatpush.msrb.mxu2 %v3748_v36 }
  0xbb   : > { %1071 = vmatpush.msrb.mxu1 %v3752_v37 }
  0xbc   : > { %1033 = vmatpush.msrb.mxu0 %v3736_v32  ;;  %1092 = vmatpush.msrb.mxu2 %v3757_v39 }
  0xbd   : > { %1072 = vmatpush.msrb.mxu1 %v3808_v44 }
  0xbe   : > { %1034 = vmatpush.msrb.mxu0 %v3745_v35  ;;  %1093 = vmatpush.msrb.mxu2 %v3764_v41 }
  0xbf   : > { %1073 = vmatpush.msrb.mxu1 %v3814_v46 }
  0xc0   : > { %1035 = vmatpush.msrb.mxu0 %v3754_v38  ;;  %1094 = vmatpush.msrb.mxu2 %v3810_v45 }
  0xc1   : > { %1074 = vmatpush.msrb.mxu1 %v3820_v48 }
  0xc2   : > { %1036 = vmatpush.msrb.mxu0 %v3761_v40  ;;  %1095 = vmatpush.msrb.mxu2 %v3816_v47 }
  0xc3   : > { %1075 = vmatpush.msrb.mxu1 %v3826_v50 }
  0xc4   : > { %1037 = vmatpush.msrb.mxu0 %v3768_v42  ;;  %1096 = vmatpush.msrb.mxu2 %v3822_v49 }
  0xc5   : > { %1076 = vmatpush.msrb.mxu1 %v3832_v53 }
  0xc6   : > { %1177 = vmatpush.msra.mxu0 %v3659_v5  ;;  %1097 = vmatpush.msrb.mxu2 %v3828_v51 }
  0xc7   : > { %1077 = vmatpush.msrb.mxu1 %v3837_v55 }
  0xc8   : > { %1178 = vmatpush.msra.mxu0 %v3661_v6  ;;  %1237 = vmatpush.msra.mxu2 %v3672_v10 }
  0xca   : > { %1179 = vmatpush.msra.mxu0 %v3664_v7  ;;  %1238 = vmatpush.msra.mxu2 %v3674_v11 }
  0xcc   : > { %1180 = vmatpush.msra.mxu0 %v3667_v8  ;;  %1239 = vmatpush.msra.mxu2 %v3685_v15 }
  0xce   : > { %1181 = vmatpush.msra.mxu0 %v3670_v9  ;;  %1240 = vmatpush.msra.mxu2 %v3694_v18 }
  0xd0   : > { %1182 = vmatpush.msra.mxu0 %v3682_v14  ;;  %1241 = vmatpush.msra.mxu2 %v3703_v21 }
  0xd2   : > { %1183 = vmatpush.msra.mxu0 %v3691_v17  ;;  %1242 = vmatpush.msra.mxu2 %v3712_v24 }
  0xd4   : > { %1184 = vmatpush.msra.mxu0 %v3700_v20  ;;  %1243 = vmatpush.msra.mxu2 %v3721_v27 }
  0xd6   : > { %1185 = vmatpush.msra.mxu0 %v3706_v22  ;;  %1244 = vmatpush.msra.mxu2 %v3730_v30 }
  0xd8   : > { %1186 = vmatpush.msra.mxu0 %v3718_v26  ;;  %1245 = vmatpush.msra.mxu2 %v3739_v33 }
  0xda   : > { %1187 = vmatpush.msra.mxu0 %v3727_v29  ;;  %1246 = vmatpush.msra.mxu2 %v3748_v36 }
  0xdc   : > { %1188 = vmatpush.msra.mxu0 %v3736_v32  ;;  %1247 = vmatpush.msra.mxu2 %v3757_v39  ;;  %v5358_v39 = vld [vmem:[#allocation78_spill] sm:$0xff] }
  0xde   : > { %1189 = vmatpush.msra.mxu0 %v3745_v35  ;;  %1248 = vmatpush.msra.mxu2 %v3764_v41  ;;  %v5356_v41 = vld [vmem:[#allocation76_spill] sm:$0xff] }
  0xe0   : > { %1190 = vmatpush.msra.mxu0 %v3754_v38  ;;  %1249 = vmatpush.msra.mxu2 %v3810_v45  ;;  %v5354_v45 = vld [vmem:[#allocation68_spill] sm:$0xff] }
  0xe2   : > { %1191 = vmatpush.msra.mxu0 %v3761_v40  ;;  %1250 = vmatpush.msra.mxu2 %v3816_v47  ;;  %v929_v47 = vld [vmem:[#allocation7] sm:$0xff] }
  0xe4   : > { %1192 = vmatpush.msra.mxu0 %v3768_v42  ;;  %1251 = vmatpush.msra.mxu2 %v3822_v49  ;;  %v5351_v49 = vld [vmem:[#allocation72_spill] sm:$0xff] }
  0xe6   : > { %1252 = vmatpush.msra.mxu2 %v3828_v51 }
 0x122   : > { %v851_v61 = vpop.f32.mrf.mxu0 }
 0x123   : > { %v854_v62 = vadd.f32 %v851_v61, %v833_v52  ;;  %v5160_v61 = vmov 0.0  }
 0x125   : > { %v875_v1 = vmul.f32 %v3899_v56, %v854_v62 }
 0x127   : > { %v876_v2 = vadd.f32 %v875_v1, %v871_v58  ;;  %v1044_v58 = vmul.f32 %v3853_v60, %v864_v4 }
 0x129   : > { %v3912_v52 = vsub.f32 %v876_v2, %v877_v57  ;;  %v3982_v2 = vld [vmem:[#allocation15 + $0x30] sm:$0xff] }
 0x12a   : > { %5343 = vst [vmem:[#allocation80_spill] sm:$0xff] %v3982_v2  ;;  %972 = vmatpush.msra.mxu3 %v3982_v2 }
 0x12b   : > { %v879_v43 = vsub.f32 %v3912_v52, %v866_v54  ;;  %1016 = vst [vmem:[%s3650_s6] sm:$0xff] %v3912_v52 }
 0x12d   : > { %vm880_vm0 = vcmp.gt.f32.partialorder %v879_v43, 0.0  ;;  %v3985_v43 = vld [vmem:[#allocation15 + $0x28] sm:$0xff] }
 0x12e   : > { %v2452_v57 = vsel %vm880_vm0, 1.0, %v5160_v61  ;;  %2453 = vmatmul.msk.f32.vlgmr.msra.gmra.mxu1 %vm880_vm0, %v5158_v63  ;;  %2820 = vmatmul.msk.f32.vlgmr.msrb.gmra.mxu0 %vm880_vm0, %v5158_v63  ;;  %5344 = vst [vmem:[#allocation81_spill] sm:$0xff] %v3985_v43  ;;  %v761_v63 = vld [vmem:[#allocation21] sm:$0x1] }
 0x12f   : > { %1015 = vst [vmem:[%s3648_s2] sm:$0xff] %v2452_v57  ;;  %v1045_v54 = vmul.f32 %v2452_v57, %v3851_v59  ;;  %1217 = vmatpush.msra.mxu1 %v3676_v12  ;;  %1332 = vmatpush.msrb.mxu0 %v3659_v5  ;;  %v3999_v61 = vld [vmem:[#allocation15] sm:$0xff]  ;;  %v762_v51 = vsub.f32 1.0, %v761_v63 }
 0x130   : > { %973 = vmatpush.msra.mxu3 %v3985_v43  ;;  %5349 = vst [vmem:[#allocation86_spill] sm:$0xff] %v3999_v61 }
 0x131   : > { %v3932_v4 = vadd.f32 %v1045_v54, %v1044_v58  ;;  %1218 = vmatpush.msra.mxu1 %v3680_v13  ;;  %1333 = vmatpush.msrb.mxu0 %v3661_v6  ;;  %v3988_v58 = vld [vmem:[#allocation15 + $0x20] sm:$0xff]  ;;  %v3994_v54 = vld [vmem:[#allocation15 + $0x10] sm:$0xff] }
 0x132   : > { %5345 = vst [vmem:[#allocation82_spill] sm:$0xff] %v3988_v58  ;;  %974 = vmatpush.msra.mxu3 %v3988_v58 }
 0x133   : > { %v1047_v62 = vmul.f32 1.8, %v3932_v4  ;;  %1219 = vmatpush.msra.mxu1 %v3689_v16  ;;  %1334 = vmatpush.msrb.mxu0 %v3664_v7  ;;  %5347 = vst [vmem:[#allocation84_spill] sm:$0xff] %v3994_v54 }
 0x135   : > { %v3941_v0 = vadd.f32 0.01, %v1047_v62  ;;  %1220 = vmatpush.msra.mxu1 %v3698_v19  ;;  %1335 = vmatpush.msrb.mxu0 %v3667_v8  ;;  %v3996_v62 = vld [vmem:[#allocation15 + $0x8] sm:$0xff] }
 0x136   : > { %5348 = vst [vmem:[#allocation85_spill] sm:$0xff] %v3996_v62 }
 0x137   : > { %v3947_v1 = vmul.f32 %v2452_v57, %v3941_v0  ;;  %1221 = vmatpush.msra.mxu1 %v3709_v23  ;;  %1336 = vmatpush.msrb.mxu0 %v3670_v9  ;;  %v3991_v57 = vld [vmem:[#allocation15 + $0x18] sm:$0xff] }
 0x138   : > { %5346 = vst [vmem:[#allocation83_spill] sm:$0xff] %v3991_v57  ;;  %975 = vmatpush.msra.mxu3 %v3991_v57 }
 0x139   : > { %1222 = vmatpush.msra.mxu1 %v3716_v25  ;;  %1337 = vmatpush.msrb.mxu0 %v3682_v14 }
 0x13a   : > { %976 = vmatpush.msra.mxu3 %v3994_v54 }
 0x13b   : > { %1223 = vmatpush.msra.mxu1 %v3725_v28  ;;  %1338 = vmatpush.msrb.mxu0 %v3691_v17 }
 0x13c   : > { %977 = vmatpush.msra.mxu3 %v3996_v62 }
 0x13d   : > { %1224 = vmatpush.msra.mxu1 %v3734_v31  ;;  %1339 = vmatpush.msrb.mxu0 %v3700_v20 }
 0x13e   : > { %978 = vmatpush.msra.mxu3 %v3999_v61 }
 0x13f   : > { %1225 = vmatpush.msra.mxu1 %v3743_v34  ;;  %1340 = vmatpush.msrb.mxu0 %v3706_v22 }
 0x141   : > { %1226 = vmatpush.msra.mxu1 %v3752_v37  ;;  %1341 = vmatpush.msrb.mxu0 %v3718_v26  ;;  %v2458_v26 = vld [vmem:[%s3622_s29 + $0x8] sm:$0xff]  ;;  %v926_v37 = vpop.f32.mrf.mxu2 }
 0x143   : > { %1227 = vmatpush.msra.mxu1 %v3808_v44  ;;  %1342 = vmatpush.msrb.mxu0 %v3727_v29  ;;  %v5361_v44 = vld [vmem:[#allocation79_spill] sm:$0xff] }
 0x145   : > { %1228 = vmatpush.msra.mxu1 %v3814_v46  ;;  %1343 = vmatpush.msrb.mxu0 %v3736_v32  ;;  %v5357_v32 = vld [vmem:[#allocation77_spill] sm:$0xff]  ;;  %v4021_v46 = vld [vmem:[%s5359_s3] ss:$0 sm:$0xff] }
 0x147   : > { %1229 = vmatpush.msra.mxu1 %v3820_v48  ;;  %1344 = vmatpush.msrb.mxu0 %v3745_v35  ;;  %v5355_v35 = vld [vmem:[#allocation75_spill] sm:$0xff] }
 0x149   : > { %1230 = vmatpush.msra.mxu1 %v3826_v50  ;;  %1345 = vmatpush.msrb.mxu0 %v3754_v38  ;;  %v5353_v38 = vld [vmem:[#allocation74_spill] sm:$0xff] }
 0x14b   : > { %1231 = vmatpush.msra.mxu1 %v3832_v53  ;;  %1346 = vmatpush.msrb.mxu0 %v3761_v40  ;;  %v4007_v40 = vld [vmem:[#allocation21] ss:$0 sm:$0xff]  ;;  %v5352_v53 = vld [vmem:[#allocation73_spill] sm:$0xff] }
 0x14c   : > { %v933_v63 = vmul.f32 %v4007_v40, %v929_v47  ;;  %v4024_v47 = vld [vmem:[#allocation20] ss:$0 sm:$0xff] }
 0x14d   : > { %1232 = vmatpush.msra.mxu1 %v3837_v55  ;;  %1347 = vmatpush.msrb.mxu0 %v3768_v42  ;;  %v5350_v42 = vld [vmem:[#allocation71_spill] sm:$0xff]  ;;  %v4005_v55 = vperm.slane %v762_v51, 0  ;;  %v759_v51 = vld [vmem:[#allocation20] sm:$0x1] }
 0x14e   : > { %1121 = vmatpush.msrb.mxu3 %v5350_v42  ;;  %5360 = vst [vmem:[#allocation71_spill] sm:$0xff] %v4021_v46  ;;  %v760_v29 = vsub.f32 1.0, %v759_v51 }
 0x14f   : > { %v937_v50 = vmul.f32 %v4005_v55, %v5354_v45 }
 0x150   : > { %1122 = vmatpush.msrb.mxu3 %v5351_v49  ;;  %v4029_v22 = vperm.slane %v760_v29, 0 }
 0x151   : > { %v938_v48 = vadd.f32 %v937_v50, %v933_v63  ;;  %v941_v50 = vld [vmem:[#allocation5] sm:$0xff] }
 0x152   : > { %1123 = vmatpush.msrb.mxu3 %v5352_v53 }
 0x153   : > { %v939_v36 = vmul.f32 1.8, %v938_v48 }
 0x154   : > { %1124 = vmatpush.msrb.mxu3 %v5353_v38 }
 0x155   : > { %v940_v34 = vadd.f32 0.01, %v939_v36 }
 0x156   : > { %1125 = vmatpush.msrb.mxu3 %v5355_v35 }
 0x157   : > { %v951_v29 = vmul.f32 %v940_v34, %v5354_v45  ;;  %v1103_v45 = vmul.f32 %v4007_v40, %v938_v48 }
 0x158   : > { %1126 = vmatpush.msrb.mxu3 %v5356_v41 }
 0x15a   : > { %1127 = vmatpush.msrb.mxu3 %v5357_v32 }
 0x15c   : > { %1128 = vmatpush.msrb.mxu3 %v5358_v39  ;;  %v1050_v39 = vmul.f32 %v3893_v3, %v3912_v52 }
 0x15e   : > { %1129 = vmatpush.msrb.mxu3 %v5361_v44  ;;  %v945_v44 = vmul.f32 %v4024_v47, %v941_v50 }
 0x160   : > { %1130 = vmatpush.msrb.mxu3 %v3982_v2 }
 0x162   : > { %1131 = vmatpush.msrb.mxu3 %v3985_v43 }
 0x164   : > { %1132 = vmatpush.msrb.mxu3 %v3988_v58 }
 0x166   : > { %1133 = vmatpush.msrb.mxu3 %v3991_v57 }
 0x168   : > { %1134 = vmatpush.msrb.mxu3 %v3994_v54 }
 0x16a   : > { %1135 = vmatpush.msrb.mxu3 %v3996_v62 }
 0x16c   : > { %1136 = vmatpush.msrb.mxu3 %v3999_v61 }
 0x1ab   : > { %v906_v33 = vpop.f32.mrf.mxu1  ;;  %v1039_v30 = vpop.f32.mrf.mxu0 }
 0x1ac   : > { %v907_v63 = vadd.f32 %v4021_v46, %v906_v33  ;;  %v1042_v20 = vadd.f32 %v2458_v26, %v1039_v30 }
 0x1ae   : > { %v927_v51 = vadd.f32 %v926_v37, %v907_v63  ;;  %v1051_v27 = vmul.f32 %v1042_v20, %v3899_v56  ;;  %v5362_v37 = vmov 0.0  }
 0x1b0   : > { %v949_v33 = vmul.f32 %v4029_v22, %v927_v51  ;;  %v1052_v46 = vadd.f32 %v1051_v27, %v1050_v39 }
 0x1b2   : > { %v950_v26 = vadd.f32 %v949_v33, %v945_v44  ;;  %v4041_v30 = vsub.f32 %v1052_v46, %v3947_v1  ;;  %v5363_v44 = vmov 1.0  }
 0x1b4   : > { %v4044_v36 = vsub.f32 %v950_v26, %v951_v29  ;;  %v1055_v20 = vsub.f32 %v4041_v30, %v3941_v0  ;;  %2465 = vst [vmem:[%s3650_s6 + $0x8] sm:$0xff] %v4041_v30  ;;  %v5364_v26 = vld [vmem:[#allocation46_spill] sm:$0xff] }
 0x1b6   : > { %v953_v27 = vsub.f32 %v4044_v36, %v940_v34  ;;  %vm1056_vm1 = vcmp.gt.f32.partialorder %v1055_v20, 0.0  ;;  %v1199_v34 = vmul.f32 %v3853_v60, %v3932_v4  ;;  %v5365_v20 = vld [vmem:[#allocation78_spill] sm:$0xff] }
 0x1b7   : > { %v2459_v39 = vsel %vm1056_vm1, 1.0, %v5362_v37  ;;  %2460 = vmatmul.msk.f32.vlgmr.msrb.gmra.mxu1 %vm1056_vm1, %v5363_v44  ;;  %2821 = vmatmul.msk.f32.vlgmr.msra.gmra.mxu0 %vm1056_vm1, %v5363_v44 }
 0x1b8   : > { %vm954_vm2 = vcmp.gt.f32.partialorder %v953_v27, 0.0  ;;  %2464 = vst [vmem:[%s3648_s2 + $0x8] sm:$0xff] %v2459_v39  ;;  %v1200_v52 = vmul.f32 %v2459_v39, %v3851_v59  ;;  %1372 = vmatpush.msrb.mxu1 %v3676_v12  ;;  %1487 = vmatpush.msra.mxu0 %v3659_v5  ;;  %v5366_v27 = vld [vmem:[#allocation42_spill] sm:$0xff] }
 0x1b9   : > { %v2454_v46 = vsel %vm954_vm2, 1.0, %v5362_v37  ;;  %2455 = vmatmul.msk.f32.vlgmr.msra.gmra.mxu3 %vm954_vm2, %v5363_v44  ;;  %2822 = vmatmul.msk.f32.vlgmr.msrb.gmra.mxu2 %vm954_vm2, %v5363_v44 }
 0x1ba   : > { %v1104_v0 = vmul.f32 %v2454_v46, %v4005_v55  ;;  %v4066_v1 = vadd.f32 %v1200_v52, %v1199_v34  ;;  %1276 = vmatpush.msra.mxu3 %v5350_v42  ;;  %1373 = vmatpush.msrb.mxu1 %v3680_v13  ;;  %v5370_v34 = vld [vmem:[#allocation43_spill] sm:$0xff]  ;;  %v5371_v52 = vld [vmem:[#allocation54_spill] sm:$0xff] }
 0x1bb   : > { %1392 = vmatpush.msrb.mxu2 %v3672_v10  ;;  %1488 = vmatpush.msra.mxu0 %v3661_v6 }
 0x1bc   : > { %v4070_v48 = vadd.f32 %v1104_v0, %v1103_v45  ;;  %v1202_v4 = vmul.f32 1.8, %v4066_v1  ;;  %1277 = vmatpush.msra.mxu3 %v5351_v49  ;;  %1374 = vmatpush.msrb.mxu1 %v3689_v16  ;;  %v5368_v45 = vld [vmem:[#allocation48_spill] sm:$0xff]  ;;  %v5372_v0 = vld [vmem:[#allocation50_spill] sm:$0xff] }
 0x1bd   : > { %1393 = vmatpush.msrb.mxu2 %v3674_v11  ;;  %1489 = vmatpush.msra.mxu0 %v3664_v7 }
 0x1be   : > { %v1106_v50 = vmul.f32 1.8, %v4070_v48  ;;  %v4080_v63 = vadd.f32 0.01, %v1202_v4  ;;  %1278 = vmatpush.msra.mxu3 %v5352_v53  ;;  %1375 = vmatpush.msrb.mxu1 %v3698_v19  ;;  %v5373_v4 = vld [vmem:[#allocation45_spill] sm:$0xff] }
 0x1bf   : > { %1394 = vmatpush.msrb.mxu2 %v3685_v15  ;;  %1490 = vmatpush.msra.mxu0 %v3667_v8 }
 0x1c0   : > { %v4084_v51 = vadd.f32 0.01, %v1106_v50  ;;  %v4089_v33 = vmul.f32 %v2459_v39, %v4080_v63  ;;  %1279 = vmatpush.msra.mxu3 %v5353_v38  ;;  %1376 = vmatpush.msrb.mxu1 %v3709_v23  ;;  %v5367_v39 = vld [vmem:[#allocation51_spill] sm:$0xff]  ;;  %v5374_v50 = vld [vmem:[#allocation60_spill] sm:$0xff] }
 0x1c1   : > { %1395 = vmatpush.msrb.mxu2 %v3694_v18  ;;  %1491 = vmatpush.msra.mxu0 %v3670_v9 }
 0x1c2   : > { %v4094_v29 = vmul.f32 %v2454_v46, %v4084_v51  ;;  %1280 = vmatpush.msra.mxu3 %v5355_v35  ;;  %1377 = vmatpush.msrb.mxu1 %v3716_v25  ;;  %v5369_v46 = vld [vmem:[#allocation79_spill] sm:$0xff] }
 0x1c3   : > { %1396 = vmatpush.msrb.mxu2 %v3703_v21  ;;  %1492 = vmatpush.msra.mxu0 %v3682_v14 }
 0x1c4   : > { %1281 = vmatpush.msra.mxu3 %v5356_v41  ;;  %1378 = vmatpush.msrb.mxu1 %v3725_v28 }
 0x1c5   : > { %1397 = vmatpush.msrb.mxu2 %v3712_v24  ;;  %1493 = vmatpush.msra.mxu0 %v3691_v17 }
 0x1c6   : > { %1282 = vmatpush.msra.mxu3 %v5357_v32  ;;  %1379 = vmatpush.msrb.mxu1 %v3734_v31  ;;  %v5379_v32 = vld [vmem:[#allocation49_spill] sm:$0xff] }
 0x1c7   : > { %1398 = vmatpush.msrb.mxu2 %v5364_v26  ;;  %1494 = vmatpush.msra.mxu0 %v5366_v27  ;;  %v5376_v26 = vld [vmem:[#allocation47_spill] sm:$0xff] }
 0x1c8   : > { %1283 = vmatpush.msra.mxu3 %v5365_v20  ;;  %1380 = vmatpush.msrb.mxu1 %v5367_v39  ;;  %v5375_v20 = vld [vmem:[#allocation53_spill] sm:$0xff] }
 0x1c9   : > { %1399 = vmatpush.msrb.mxu2 %v5368_v45  ;;  %1495 = vmatpush.msra.mxu0 %v5370_v34  ;;  %v5377_v45 = vld [vmem:[#allocation62_spill] sm:$0xff] }
 0x1ca   : > { %1284 = vmatpush.msra.mxu3 %v5369_v46  ;;  %1381 = vmatpush.msrb.mxu1 %v5371_v52  ;;  %v5378_v46 = vld [vmem:[#allocation56_spill] sm:$0xff] }
 0x1cb   : > { %1400 = vmatpush.msrb.mxu2 %v5372_v0  ;;  %1496 = vmatpush.msra.mxu0 %v5373_v4  ;;  %v5380_v0 = vld [vmem:[#allocation64_spill] sm:$0xff] }
 0x1cc   : > { %1285 = vmatpush.msra.mxu3 %v3982_v2  ;;  %1382 = vmatpush.msrb.mxu1 %v5374_v50  ;;  %v5381_v2 = vld [vmem:[#allocation58_spill] sm:$0xff]  ;;  %v5382_v50 = vld [vmem:[#allocation52_spill] sm:$0xff] }
 0x1cd   : > { %1401 = vmatpush.msrb.mxu2 %v5375_v20  ;;  %1497 = vmatpush.msra.mxu0 %v5376_v26  ;;  %v5384_v20 = vld [vmem:[#allocation61_spill] sm:$0xff] }
 0x1ce   : > { %1286 = vmatpush.msra.mxu3 %v3985_v43  ;;  %1383 = vmatpush.msrb.mxu1 %v5377_v45  ;;  %v5383_v43 = vld [vmem:[#allocation66_spill] sm:$0xff] }
 0x1cf   : > { %1402 = vmatpush.msrb.mxu2 %v5378_v46  ;;  %1498 = vmatpush.msra.mxu0 %v5379_v32  ;;  %v5385_v46 = vld [vmem:[#allocation55_spill] sm:$0xff] }
 0x1d0   : > { %1287 = vmatpush.msra.mxu3 %v3988_v58  ;;  %1384 = vmatpush.msrb.mxu1 %v5380_v0  ;;  %v5386_v58 = vld [vmem:[#allocation69_spill] sm:$0xff]  ;;  %v5387_v32 = vld [vmem:[#allocation63_spill] sm:$0xff] }
 0x1d1   : > { %1403 = vmatpush.msrb.mxu2 %v5381_v2  ;;  %1499 = vmatpush.msra.mxu0 %v5382_v50  ;;  %v5388_v2 = vld [vmem:[#allocation57_spill] sm:$0xff] }
 0x1d2   : > { %1288 = vmatpush.msra.mxu3 %v3991_v57  ;;  %1385 = vmatpush.msrb.mxu1 %v5383_v43  ;;  %v5389_v57 = vld [vmem:[#allocation70_spill] sm:$0xff]  ;;  %v5390_v0 = vld [vmem:[#allocation65_spill] sm:$0xff]  ;;  %v5391_v43 = vld [vmem:[#allocation59_spill] sm:$0xff] }
 0x1d3   : > { %1404 = vmatpush.msrb.mxu2 %v5384_v20  ;;  %1500 = vmatpush.msra.mxu0 %v5385_v46  ;;  %v5392_v20 = vld [vmem:[#allocation67_spill] sm:$0xff] }
 0x1d4   : > { %1289 = vmatpush.msra.mxu3 %v3994_v54  ;;  %1386 = vmatpush.msrb.mxu1 %v5386_v58  ;;  %v763_v54 = vld [vmem:[#allocation23] sm:$0x1]  ;;  %v2467_v46 = vld [vmem:[%s3622_s29 + $0x10] sm:$0xff] }
 0x1d5   : > { %1405 = vmatpush.msrb.mxu2 %v5387_v32  ;;  %1501 = vmatpush.msra.mxu0 %v5388_v2  ;;  %v764_v58 = vsub.f32 1.0, %v763_v54  ;;  %v4151_v32 = vld [vmem:[#allocation23] ss:$0 sm:$0xff] }
 0x1d6   : > { %1290 = vmatpush.msra.mxu3 %v3996_v62  ;;  %1387 = vmatpush.msrb.mxu1 %v5389_v57  ;;  %v4149_v62 = vld [vmem:[%s5393_s21] ss:$0 sm:$0xff] }
 0x1d7   : > { %1406 = vmatpush.msrb.mxu2 %v5390_v0  ;;  %1502 = vmatpush.msra.mxu0 %v5391_v43  ;;  %v4156_v57 = vperm.slane %v764_v58, 0 }
 0x1d8   : > { %1291 = vmatpush.msra.mxu3 %v3999_v61  ;;  %v1205_v61 = vmul.f32 %v3893_v3, %v4041_v30 }
 0x1d9   : > { %1407 = vmatpush.msrb.mxu2 %v5392_v20  ;;  %v983_v20 = vld [vmem:[#allocation8] sm:$0xff] }
 0x1da   : > { %v987_v4 = vmul.f32 %v4151_v32, %v983_v20 }
 0x234   : > { %v1194_v50 = vpop.f32.mrf.mxu0  ;;  %v1079_v0 = vpop.f32.mrf.mxu1 }
 0x235   : > { %v1197_v45 = vadd.f32 %v2467_v46, %v1194_v50  ;;  %v5394_v46 = vld [vmem:[#allocation71_spill] sm:$0xff] }
 0x236   : > { %v1080_v50 = vadd.f32 %v5394_v46, %v1079_v0  ;;  %v5412_v0 = vld [vmem:[#allocation66_spill] sm:$0xff] }
 0x237   : > { %v1206_v43 = vmul.f32 %v1197_v45, %v3899_v56 }
 0x239   : > { %v1207_v2 = vadd.f32 %v1206_v43, %v1205_v61  ;;  %v1109_v43 = vmul.f32 %v4024_v47, %v4044_v36 }
 0x23b   : > { %v4162_v52 = vsub.f32 %v1207_v2, %v4089_v33 }
 0x23c   : > { %v980_v54 = vpop.f32.mrf.mxu3  ;;  %v1099_v24 = vpop.f32.mrf.mxu2 }
 0x23d   : > { %v981_v26 = vadd.f32 %v4149_v62, %v980_v54  ;;  %v1100_v34 = vadd.f32 %v1099_v24, %v1080_v50  ;;  %2474 = vst [vmem:[%s3650_s6 + $0x10] sm:$0xff] %v4162_v52  ;;  %v1210_v61 = vsub.f32 %v4162_v52, %v4080_v63  ;;  %v1354_v24 = vmul.f32 %v3853_v60, %v4066_v1  ;;  %v5414_v54 = vld [vmem:[#allocation81_spill] sm:$0xff]  ;;  %v5415_v50 = vld [vmem:[#allocation55_spill] sm:$0xff] }
 0x23f   : > { %v991_v30 = vmul.f32 %v4156_v57, %v981_v26  ;;  %v1110_v58 = vmul.f32 %v1100_v34, %v4029_v22  ;;  %vm1211_vm3 = vcmp.gt.f32.partialorder %v1210_v61, 0.0  ;;  %v5411_v34 = vld [vmem:[#allocation52_spill] sm:$0xff] }
 0x240   : > { %v2468_v2 = vsel %vm1211_vm3, 1.0, %v5362_v37  ;;  %2469 = vmatmul.msk.f32.vlgmr.msra.gmra.mxu1 %vm1211_vm3, %v5363_v44  ;;  %2823 = vmatmul.msk.f32.vlgmr.msrb.gmra.mxu0 %vm1211_vm3, %v5363_v44  ;;  %v5417_v61 = vld [vmem:[#allocation56_spill] sm:$0xff] }
 0x241   : > { %v4172_v45 = vadd.f32 %v991_v30, %v987_v4  ;;  %v1111_v20 = vadd.f32 %v1110_v58, %v1109_v43  ;;  %v1355_v36 = vmul.f32 %v2468_v2, %v3851_v59  ;;  %2473 = vst [vmem:[%s3648_s2 + $0x10] sm:$0xff] %v2468_v2  ;;  %1527 = vmatpush.msra.mxu1 %v3676_v12  ;;  %v5413_v4 = vld [vmem:[#allocation53_spill] sm:$0xff]  ;;  %v5418_v43 = vld [vmem:[#allocation82_spill] sm:$0xff] }
 0x242   : > { %1642 = vmatpush.msrb.mxu0 %v3659_v5  ;;  %v5416_v30 = vld [vmem:[#allocation69_spill] sm:$0xff] }
 0x243   : > { %1017 = vst [vmem:[%s3652_s15] sm:$0xff] %v4172_v45  ;;  %995 = vmax.xlane.f32.xlu0 %v4172_v45  ;;  %v4184_v63 = vsub.f32 %v1111_v20, %v4094_v29  ;;  %v4189_v33 = vadd.f32 %v1355_v36, %v1354_v24  ;;  %1528 = vmatpush.msra.mxu1 %v3680_v13  ;;  %v5408_v29 = vld [vmem:[#allocation64_spill] sm:$0xff]  ;;  %v5419_v58 = vld [vmem:[#allocation57_spill] sm:$0xff]  ;;  %v5420_v20 = vld [vmem:[#allocation70_spill] sm:$0xff] }
 0x244   : > { %1643 = vmatpush.msrb.mxu0 %v3661_v6  ;;  %v1258_v13 = vmul.f32 %v4007_v40, %v4070_v48  ;;  %v5407_v48 = vld [vmem:[#allocation49_spill] sm:$0xff]  ;;  %v5422_v24 = vld [vmem:[#allocation83_spill] sm:$0xff] }
 0x245   : > { %v1114_v26 = vsub.f32 %v4184_v63, %v4084_v51  ;;  %v1357_v1 = vmul.f32 1.8, %v4189_v33  ;;  %1529 = vmatpush.msra.mxu1 %v3689_v16  ;;  %v5423_v36 = vld [vmem:[#allocation59_spill] sm:$0xff] }
 0x246   : > { %1644 = vmatpush.msrb.mxu0 %v3664_v7 }
 0x247   : > { %vm1115_vm4 = vcmp.gt.f32.partialorder %v1114_v26, 0.0  ;;  %v4200_v5 = vadd.f32 0.01, %v1357_v1  ;;  %1530 = vmatpush.msra.mxu1 %v3698_v19  ;;  %v5401_v19 = vld [vmem:[#allocation46_spill] sm:$0xff]  ;;  %v5424_v26 = vld [vmem:[#allocation61_spill] sm:$0xff]  ;;  %v5425_v1 = vld [vmem:[#allocation84_spill] sm:$0xff] }
 0x248   : > { %v2461_v12 = vsel %vm1115_vm4, 1.0, %v5362_v37  ;;  %2462 = vmatmul.msk.f32.vlgmr.msrb.gmra.mxu3 %vm1115_vm4, %v5363_v44  ;;  %2824 = vmatmul.msk.f32.vlgmr.msra.gmra.mxu2 %vm1115_vm4, %v5363_v44 }
 0x249   : > { %v1259_v6 = vmul.f32 %v2461_v12, %v4005_v55  ;;  %v4208_v51 = vmul.f32 %v2468_v2, %v4200_v5  ;;  %1431 = vmatpush.msrb.mxu3 %v5350_v42  ;;  %1645 = vmatpush.msrb.mxu0 %v3667_v8  ;;  %v5421_v2 = vld [vmem:[#allocation58_spill] sm:$0xff] }
 0x24a   : > { %1531 = vmatpush.msra.mxu1 %v3709_v23  ;;  %1547 = vmatpush.msra.mxu2 %v3672_v10  ;;  %v5395_v10 = vld [vmem:[#allocation43_spill] sm:$0xff]  ;;  %v5402_v23 = vld [vmem:[#allocation78_spill] sm:$0xff] }
 0x24b   : > { %v4212_v7 = vadd.f32 %v1259_v6, %v1258_v13  ;;  %1432 = vmatpush.msrb.mxu3 %v5351_v49  ;;  %1646 = vmatpush.msrb.mxu0 %v3670_v9  ;;  %v5427_v13 = vld [vmem:[#allocation85_spill] sm:$0xff] }
 0x24c   : > { %1532 = vmatpush.msra.mxu1 %v3716_v25  ;;  %1548 = vmatpush.msra.mxu2 %v3674_v11  ;;  %v5396_v11 = vld [vmem:[#allocation54_spill] sm:$0xff]  ;;  %v5403_v25 = vld [vmem:[#allocation47_spill] sm:$0xff]  ;;  %v5428_v6 = vld [vmem:[#allocation65_spill] sm:$0xff] }
 0x24d   : > { %v1261_v16 = vmul.f32 1.8, %v4212_v7  ;;  %1433 = vmatpush.msrb.mxu3 %v5352_v53  ;;  %1647 = vmatpush.msrb.mxu0 %v3682_v14  ;;  %v5397_v14 = vld [vmem:[#allocation44_spill] sm:$0xff] }
 0x24e   : > { %1533 = vmatpush.msra.mxu1 %v3725_v28  ;;  %1549 = vmatpush.msra.mxu2 %v3685_v15  ;;  %v5398_v15 = vld [vmem:[#allocation77_spill] sm:$0xff]  ;;  %v5405_v28 = vld [vmem:[#allocation48_spill] sm:$0xff] }
 0x24f   : > { %v4223_v8 = vadd.f32 0.01, %v1261_v16  ;;  %1434 = vmatpush.msrb.mxu3 %v5353_v38  ;;  %1648 = vmatpush.msrb.mxu0 %v3691_v17  ;;  %v5399_v17 = vld [vmem:[#allocation45_spill] sm:$0xff]  ;;  %v5429_v16 = vld [vmem:[#allocation86_spill] sm:$0xff] }
 0x250   : > { %1534 = vmatpush.msra.mxu1 %v3734_v31  ;;  %1550 = vmatpush.msra.mxu2 %v3694_v18  ;;  %v5400_v18 = vld [vmem:[#allocation60_spill] sm:$0xff]  ;;  %v5406_v31 = vld [vmem:[#allocation79_spill] sm:$0xff] }
 0x251   : > { %v4230_v9 = vmul.f32 %v2461_v12, %v4223_v8  ;;  %1435 = vmatpush.msrb.mxu3 %v5355_v35  ;;  %1649 = vmatpush.msrb.mxu0 %v5366_v27  ;;  %v5409_v27 = vld [vmem:[#allocation50_spill] sm:$0xff]  ;;  %v5426_v12 = vld [vmem:[#allocation63_spill] sm:$0xff] }
 0x252   : > { %1535 = vmatpush.msra.mxu1 %v5367_v39  ;;  %1551 = vmatpush.msra.mxu2 %v3703_v21  ;;  %v5404_v21 = vld [vmem:[#allocation62_spill] sm:$0xff]  ;;  %v5410_v39 = vld [vmem:[#allocation80_spill] sm:$0xff] }
 0x253   : > { %1436 = vmatpush.msrb.mxu3 %v5356_v41  ;;  %1650 = vmatpush.msrb.mxu0 %v5395_v10  ;;  %v5430_v10 = vld [vmem:[#allocation67_spill] sm:$0xff] }
 0x254   : > { %1536 = vmatpush.msra.mxu1 %v5396_v11  ;;  %1552 = vmatpush.msra.mxu2 %v5397_v14  ;;  %v2476_v11 = vld [vmem:[%s3622_s29 + $0x18] sm:$0xff] }
 0x255   : > { %1437 = vmatpush.msrb.mxu3 %v5398_v15  ;;  %1651 = vmatpush.msrb.mxu0 %v5399_v17 }
 0x256   : > { %1537 = vmatpush.msra.mxu1 %v5400_v18  ;;  %1553 = vmatpush.msra.mxu2 %v5401_v19  ;;  %v1360_v19 = vmul.f32 %v3893_v3, %v4162_v52 }
 0x257   : > { %1438 = vmatpush.msrb.mxu3 %v5402_v23  ;;  %1652 = vmatpush.msrb.mxu0 %v5403_v25 }
 0x258   : > { %1538 = vmatpush.msra.mxu1 %v5404_v21  ;;  %1554 = vmatpush.msra.mxu2 %v5405_v28 }
 0x259   : > { %1439 = vmatpush.msrb.mxu3 %v5406_v31  ;;  %1653 = vmatpush.msrb.mxu0 %v5407_v48 }
 0x25a   : > { %1539 = vmatpush.msra.mxu1 %v5408_v29  ;;  %1555 = vmatpush.msra.mxu2 %v5409_v27 }
 0x25b   : > { %1440 = vmatpush.msrb.mxu3 %v5410_v39  ;;  %1654 = vmatpush.msrb.mxu0 %v5411_v34 }
 0x25c   : > { %1540 = vmatpush.msra.mxu1 %v5412_v0  ;;  %1556 = vmatpush.msra.mxu2 %v5413_v4 }
 0x25d   : > { %1441 = vmatpush.msrb.mxu3 %v5414_v54  ;;  %1655 = vmatpush.msrb.mxu0 %v5415_v50 }
 0x25e   : > { %1541 = vmatpush.msra.mxu1 %v5416_v30  ;;  %1557 = vmatpush.msra.mxu2 %v5417_v61 }
 0x25f   : > { %1442 = vmatpush.msrb.mxu3 %v5418_v43  ;;  %1656 = vmatpush.msrb.mxu0 %v5419_v58 }
 0x260   : > { %1542 = vmatpush.msra.mxu1 %v5420_v20  ;;  %1558 = vmatpush.msra.mxu2 %v5421_v2 }
 0x261   : > { %1443 = vmatpush.msrb.mxu3 %v5422_v24  ;;  %1657 = vmatpush.msrb.mxu0 %v5423_v36  ;;  %v1509_v36 = vmul.f32 %v3853_v60, %v4189_v33  ;;  %v4307_v60 = vld [vmem:[#allocation14 + $0x70] sm:$0xff] }
 0x262   : > { %1559 = vmatpush.msra.mxu2 %v5424_v26  ;;  %v4296_v26 = vld [vmem:[#allocation14 + $0x78] sm:$0xff] }
 0x263   : > { %1444 = vmatpush.msrb.mxu3 %v5425_v1 }
 0x264   : > { %1560 = vmatpush.msra.mxu2 %v5426_v12 }
 0x265   : > { %1445 = vmatpush.msrb.mxu3 %v5427_v13 }
 0x266   : > { %1561 = vmatpush.msra.mxu2 %v5428_v6  ;;  %v4299_v6 = vld [vmem:[#allocation12 + $0x78] sm:$0xff] }
 0x267   : > { %1446 = vmatpush.msrb.mxu3 %v5429_v16 }
 0x268   : > { %1562 = vmatpush.msra.mxu2 %v5430_v10  ;;  %v1142_v10 = vmul.f32 %v4151_v32, %v4172_v45 }
 0x2b6   : > { %v996_v27 = vpop.xlane.xlu0 %995 }
 0x2b7   : > { %v997_v50 = vsub.f32 %v4172_v45, %v996_v27  ;;  %v4319_v27 = vld [vmem:[#allocation14 + $0x68] sm:$0xff] }
 0x2b9   : > { %v998_v33 = vmul.f32 1.442695, %v997_v50  ;;  %v4330_v50 = vld [vmem:[#allocation14 + $0x60] sm:$0xff] }
 0x2bb   : > { %2717 = vpow2.f32 %v998_v33 }
 0x2bd   : > { %v1349_v14 = vpop.f32.mrf.mxu0  ;;  %v1234_v34 = vpop.f32.mrf.mxu1 }
 0x2be   : > { %v1352_v17 = vadd.f32 %v2476_v11, %v1349_v14  ;;  %v1235_v61 = vadd.f32 %v5394_v46, %v1234_v34 }
 0x2c0   : > { %v1361_v25 = vmul.f32 %v1352_v17, %v3899_v56  ;;  %v1264_v17 = vmul.f32 %v4024_v47, %v4184_v63 }
 0x2c2   : > { %v1362_v28 = vadd.f32 %v1361_v25, %v1360_v19  ;;  %v4313_v25 = vld [vmem:[#allocation12 + $0x70] sm:$0xff] }
 0x2c4   : > { %v4280_v48 = vsub.f32 %v1362_v28, %v4208_v51 }
 0x2c6   : > { %2483 = vst [vmem:[%s3650_s6 + $0x18] sm:$0xff] %v4280_v48  ;;  %v1365_v4 = vsub.f32 %v4280_v48, %v4200_v5 }
 0x2c8   : > { %vm1366_vm5 = vcmp.gt.f32.partialorder %v1365_v4, 0.0  ;;  %v4322_v4 = vld [vmem:[#allocation12 + $0x68] sm:$0xff] }
 0x2c9   : > { %v2477_v58 = vsel %vm1366_vm5, 1.0, %v5362_v37  ;;  %2478 = vmatmul.msk.f32.vlgmr.msrb.gmra.mxu1 %vm1366_vm5, %v5363_v44  ;;  %2825 = vmatmul.msk.f32.vlgmr.msra.gmra.mxu0 %vm1366_vm5, %v5363_v44 }
 0x2ca   : > { %2482 = vst [vmem:[%s3648_s2 + $0x18] sm:$0xff] %v2477_v58  ;;  %v1510_v5 = vmul.f32 %v2477_v58, %v3851_v59  ;;  %1682 = vmatpush.msrb.mxu1 %v4296_v26  ;;  %1797 = vmatpush.msra.mxu0 %v4299_v6 }
 0x2cb   : > { %v1138_v52 = vpop.f32.mrf.mxu3  ;;  %v1254_v2 = vpop.f32.mrf.mxu2 }
 0x2cc   : > { %v1139_v51 = vadd.f32 %v4149_v62, %v1138_v52  ;;  %v1255_v12 = vadd.f32 %v1254_v2, %v1235_v61  ;;  %v4305_v14 = vadd.f32 %v1510_v5, %v1509_v36  ;;  %1683 = vmatpush.msrb.mxu1 %v4307_v60  ;;  %1798 = vmatpush.msra.mxu0 %v4313_v25  ;;  %v4336_v52 = vld [vmem:[#allocation12 + $0x60] sm:$0xff]  ;;  %v4342_v2 = vld [vmem:[#allocation14 + $0x58] sm:$0xff] }
 0x2cd   : > { %v4347_v5 = vld [vmem:[#allocation12 + $0x58] sm:$0xff] }
 0x2ce   : > { %v1143_v11 = vmul.f32 %v1139_v51, %v4156_v57  ;;  %v1265_v19 = vmul.f32 %v1255_v12, %v4029_v22  ;;  %v1512_v28 = vmul.f32 1.8, %v4305_v14  ;;  %1684 = vmatpush.msrb.mxu1 %v4319_v27  ;;  %1799 = vmatpush.msra.mxu0 %v4322_v4  ;;  %v4353_v12 = vld [vmem:[#allocation12 + $0x50] sm:$0xff] }
 0x2d0   : > { %v4316_v45 = vadd.f32 %v1143_v11, %v1142_v10  ;;  %v1266_v34 = vadd.f32 %v1265_v19, %v1264_v17  ;;  %v4328_v63 = vadd.f32 0.01, %v1512_v28  ;;  %1685 = vmatpush.msrb.mxu1 %v4330_v50  ;;  %1800 = vmatpush.msra.mxu0 %v4336_v52  ;;  %v4358_v10 = vld [vmem:[#allocation14 + $0x48] sm:$0xff]  ;;  %v1413_v11 = vmul.f32 %v4007_v40, %v4212_v7  ;;  %v4369_v17 = vld [vmem:[#allocation14 + $0x40] sm:$0xff]  ;;  %v4381_v7 = vld [vmem:[#allocation14 + $0xf8] sm:$0xff] }
 0x2d1   : > { %v4375_v28 = vld [vmem:[#allocation12 + $0x48] sm:$0xff]  ;;  %5433 = vst [vmem:[#allocation74_spill] sm:$0xff] %v4381_v7 }
 0x2d2   : > { %5431 = vst [vmem:[#allocation72_spill] sm:$0xff] %v4316_v45  ;;  %1147 = vmax.xlane.f32.xlu0 %v4316_v45  ;;  %v4334_v61 = vsub.f32 %v1266_v34, %v4230_v9  ;;  %v4340_v51 = vmul.f32 %v2477_v58, %v4328_v63  ;;  %1686 = vmatpush.msrb.mxu1 %v4342_v2  ;;  %v4350_v9 = vld [vmem:[#allocation14 + $0x50] sm:$0xff]  ;;  %v4378_v34 = vld [vmem:[#allocation14 + $0x38] sm:$0xff] }
 0x2d3   : > { %2466 = vst [vmem:[%s3652_s15 + $0x8] sm:$0xff] %v4316_v45  ;;  %1801 = vmatpush.msra.mxu0 %v4347_v5 }
 0x2d4   : > { %v1269_v36 = vsub.f32 %v4334_v61, %v4223_v8  ;;  %1687 = vmatpush.msrb.mxu1 %v4350_v9  ;;  %v4361_v8 = vpop.eup %2717 }
 0x2d5   : > { %1802 = vmatpush.msra.mxu0 %v4353_v12  ;;  %5432 = vst [vmem:[#allocation73_spill] sm:$0xff] %v4361_v8 }
 0x2d6   : > { %vm1270_vm6 = vcmp.gt.f32.partialorder %v1269_v36, 0.0  ;;  %1688 = vmatpush.msrb.mxu1 %v4358_v10  ;;  %v4386_v36 = vld [vmem:[#allocation12 + $0x40] sm:$0xff] }
 0x2d7   : > { %v2470_v58 = vsel %vm1270_vm6, 1.0, %v5362_v37  ;;  %2471 = vmatmul.msk.f32.vlgmr.msra.gmra.mxu3 %vm1270_vm6, %v5363_v44  ;;  %2826 = vmatmul.msk.f32.vlgmr.msrb.gmra.mxu2 %vm1270_vm6, %v5363_v44 }
 0x2d8   : > { %v1414_v33 = vmul.f32 %v2470_v58, %v4005_v55  ;;  %1586 = vmatpush.msra.mxu3 %v5350_v42  ;;  %1689 = vmatpush.msrb.mxu1 %v4369_v17 }
 0x2d9   : > { %1803 = vmatpush.msra.mxu0 %v4375_v28  ;;  %1702 = vmatpush.msrb.mxu2 %v4381_v7 }
 0x2da   : > { %1000 = vadd.xlane.f32.xlu0 %v4361_v8  ;;  %v4372_v19 = vadd.f32 %v1414_v33, %v1413_v11  ;;  %1587 = vmatpush.msra.mxu3 %v5351_v49  ;;  %v4389_v49 = vld [vmem:[#allocation14 + $0x30] sm:$0xff]  ;;  %v4398_v8 = vld [vmem:[#allocation12 + $0x38] sm:$0xff] }
 0x2db   : > { %1690 = vmatpush.msrb.mxu1 %v4378_v34  ;;  %1804 = vmatpush.msra.mxu0 %v4386_v36  ;;  %v4392_v11 = vld [vmem:[#allocation14 + $0xf0] sm:$0xff] }
 0x2dc   : > { %v1416_v42 = vmul.f32 1.8, %v4372_v19  ;;  %1588 = vmatpush.msra.mxu3 %v5352_v53  ;;  %5434 = vst [vmem:[#allocation68_spill] sm:$0xff] %v4392_v11  ;;  %1703 = vmatpush.msrb.mxu2 %v4392_v11  ;;  %v4402_v53 = vld [vmem:[#allocation14 + $0xe8] sm:$0xff]  ;;  %v4409_v11 = vld [vmem:[#allocation12 + $0x30] sm:$0xff] }
 0x2dd   : > { %1691 = vmatpush.msrb.mxu1 %v4389_v49  ;;  %1805 = vmatpush.msra.mxu0 %v4398_v8 }
 0x2de   : > { %v4395_v33 = vadd.f32 0.01, %v1416_v42  ;;  %1589 = vmatpush.msra.mxu3 %v5353_v38  ;;  %1704 = vmatpush.msrb.mxu2 %v4402_v53  ;;  %v4413_v38 = vld [vmem:[#allocation14 + $0xe0] sm:$0xff]  ;;  %v4463_v42 = vld [vmem:[#allocation14 + $0xa8] sm:$0xff] }
 0x2df   : > { %1692 = vmatpush.msrb.mxu1 %v5400_v18  ;;  %1806 = vmatpush.msra.mxu0 %v4409_v11  ;;  %v4417_v18 = vld [vmem:[#allocation12 + $0x28] sm:$0xff]  ;;  %5437 = vst [vmem:[#allocation42_spill] sm:$0xff] %v4463_v42 }
 0x2e0   : > { %v4406_v7 = vmul.f32 %v2470_v58, %v4395_v33  ;;  %1590 = vmatpush.msra.mxu3 %v5355_v35  ;;  %1705 = vmatpush.msrb.mxu2 %v4413_v38  ;;  %v4421_v58 = vld [vmem:[#allocation14 + $0xd8] sm:$0xff]  ;;  %v4425_v35 = vld [vmem:[#allocation12 + $0x20] sm:$0xff] }
 0x2e1   : > { %1693 = vmatpush.msrb.mxu1 %v5404_v21  ;;  %1807 = vmatpush.msra.mxu0 %v4417_v18  ;;  %v4429_v21 = vld [vmem:[#allocation14 + $0xd0] sm:$0xff] }
 0x2e2   : > { %1591 = vmatpush.msra.mxu3 %v5356_v41  ;;  %1706 = vmatpush.msrb.mxu2 %v4421_v58  ;;  %v4433_v41 = vld [vmem:[#allocation12 + $0x18] sm:$0xff] }
 0x2e3   : > { %1694 = vmatpush.msrb.mxu1 %v5408_v29  ;;  %1808 = vmatpush.msra.mxu0 %v4425_v35  ;;  %v4437_v29 = vld [vmem:[#allocation14 + $0xc8] sm:$0xff] }
 0x2e4   : > { %1592 = vmatpush.msra.mxu3 %v5398_v15  ;;  %1707 = vmatpush.msrb.mxu2 %v4429_v21  ;;  %v4441_v15 = vld [vmem:[#allocation12 + $0x10] sm:$0xff] }
 0x2e5   : > { %1695 = vmatpush.msrb.mxu1 %v5412_v0  ;;  %1809 = vmatpush.msra.mxu0 %v4433_v41  ;;  %v4445_v0 = vld [vmem:[#allocation14 + $0xc0] sm:$0xff] }
 0x2e6   : > { %1593 = vmatpush.msra.mxu3 %v5402_v23  ;;  %1708 = vmatpush.msrb.mxu2 %v4437_v29  ;;  %v4449_v23 = vld [vmem:[#allocation12 + $0x8] sm:$0xff] }
 0x2e7   : > { %1696 = vmatpush.msrb.mxu1 %v5416_v30  ;;  %1810 = vmatpush.msra.mxu0 %v4441_v15  ;;  %v4452_v30 = vld [vmem:[#allocation14 + $0xb8] sm:$0xff] }
 0x2e8   : > { %1594 = vmatpush.msra.mxu3 %v5406_v31  ;;  %1709 = vmatpush.msrb.mxu2 %v4445_v0  ;;  %5435 = vst [vmem:[#allocation75_spill] sm:$0xff] %v4452_v30  ;;  %v4456_v31 = vld [vmem:[#allocation12] sm:$0xff] }
 0x2e9   : > { %1697 = vmatpush.msrb.mxu1 %v5420_v20  ;;  %1811 = vmatpush.msra.mxu0 %v4449_v23  ;;  %v4459_v20 = vld [vmem:[#allocation14 + $0xb0] sm:$0xff] }
 0x2ea   : > { %1595 = vmatpush.msra.mxu3 %v5410_v39  ;;  %1710 = vmatpush.msrb.mxu2 %v4452_v30  ;;  %5436 = vst [vmem:[#allocation76_spill] sm:$0xff] %v4459_v20  ;;  %v4467_v30 = vld [vmem:[#allocation14 + $0xa0] sm:$0xff] }
 0x2eb   : > { %1812 = vmatpush.msra.mxu0 %v4456_v31  ;;  %5438 = vst [vmem:[#allocation51_spill] sm:$0xff] %v4467_v30 }
 0x2ec   : > { %1596 = vmatpush.msra.mxu3 %v5414_v54  ;;  %1711 = vmatpush.msrb.mxu2 %v4459_v20  ;;  %v4471_v54 = vld [vmem:[#allocation14 + $0x98] sm:$0xff] }
 0x2ed   : > { %5439 = vst [vmem:[#allocation71_spill] sm:$0xff] %v4471_v54 }
 0x2ee   : > { %1597 = vmatpush.msra.mxu3 %v5418_v43  ;;  %1712 = vmatpush.msrb.mxu2 %v4463_v42  ;;  %v4475_v43 = vld [vmem:[#allocation14 + $0x90] sm:$0xff] }
 0x2ef   : > { %5440 = vst [vmem:[#allocation43_spill] sm:$0xff] %v4475_v43 }
 0x2f0   : > { %1598 = vmatpush.msra.mxu3 %v5422_v24  ;;  %1713 = vmatpush.msrb.mxu2 %v4467_v30  ;;  %v4479_v24 = vld [vmem:[#allocation14 + $0x88] sm:$0xff]  ;;  %v4482_v30 = vld [vmem:[#allocation14 + $0x80] sm:$0xff] }
 0x2f1   : > { %5441 = vst [vmem:[#allocation54_spill] sm:$0xff] %v4479_v24 }
 0x2f2   : > { %1599 = vmatpush.msra.mxu3 %v5425_v1  ;;  %1714 = vmatpush.msrb.mxu2 %v4471_v54  ;;  %5442 = vst [vmem:[#allocation44_spill] sm:$0xff] %v4482_v30  ;;  %v2485_v1 = vld [vmem:[%s3622_s29 + $0x20] sm:$0xff] }
 0x2f4   : > { %1600 = vmatpush.msra.mxu3 %v5427_v13  ;;  %1715 = vmatpush.msrb.mxu2 %v4475_v43  ;;  %v1515_v13 = vmul.f32 %v3893_v3, %v4280_v48  ;;  %v4500_v3 = vld [vmem:[#allocation18] ss:$0 sm:$0xff] }
 0x2f6   : > { %1601 = vmatpush.msra.mxu3 %v5429_v16  ;;  %1716 = vmatpush.msrb.mxu2 %v4479_v24 }
 0x2f8   : > { %1717 = vmatpush.msrb.mxu2 %v4482_v30 }
 0x346   : > { %v1504_v54 = vpop.f32.mrf.mxu0 }
 0x347   : > { %v1507_v42 = vadd.f32 %v2485_v1, %v1504_v54  ;;  %v1664_v54 = vmul.f32 %v4500_v3, %v4305_v14  ;;  %v1389_v1 = vpop.f32.mrf.mxu1 }
 0x348   : > { %v1390_v48 = vadd.f32 %v5394_v46, %v1389_v1 }
 0x349   : > { %v1516_v20 = vmul.f32 %v1507_v42, %v3899_v56 }
 0x34b   : > { %v1517_v43 = vadd.f32 %v1516_v20, %v1515_v13 }
 0x34d   : > { %v4490_v16 = vsub.f32 %v1517_v43, %v4340_v51 }
 0x34f   : > { %2492 = vst [vmem:[%s3650_s6 + $0x20] sm:$0xff] %v4490_v16  ;;  %v1520_v24 = vsub.f32 %v4490_v16, %v4328_v63 }
 0x351   : > { %vm1521_vm7 = vcmp.gt.f32.partialorder %v1520_v24, 0.0 }
 0x352   : > { %v2486_v30 = vsel %vm1521_vm7, 1.0, %v5362_v37  ;;  %2487 = vmatmul.msk.f32.vlgmr.msra.gmra.mxu1 %vm1521_vm7, %v5363_v44  ;;  %2827 = vmatmul.msk.f32.vlgmr.msrb.gmra.mxu0 %vm1521_vm7, %v5363_v44 }
 0x353   : > { %2491 = vst [vmem:[%s3648_s2 + $0x20] sm:$0xff] %v2486_v30  ;;  %v1665_v43 = vmul.f32 %v2486_v30, %v3851_v59  ;;  %1837 = vmatpush.msra.mxu1 %v4296_v26  ;;  %1952 = vmatpush.msrb.mxu0 %v4299_v6 }
 0x355   : > { %v4507_v24 = vadd.f32 %v1665_v43, %v1664_v54  ;;  %1838 = vmatpush.msra.mxu1 %v4307_v60  ;;  %1953 = vmatpush.msrb.mxu0 %v4313_v25  ;;  %v1297_v25 = vmul.f32 %v4151_v32, %v4316_v45  ;;  %v5454_v45 = vld [vmem:[#allocation71_spill] sm:$0xff] }
 0x357   : > { %v1667_v13 = vmul.f32 1.8, %v4507_v24  ;;  %1839 = vmatpush.msra.mxu1 %v4319_v27  ;;  %1954 = vmatpush.msrb.mxu0 %v4322_v4  ;;  %v1419_v4 = vmul.f32 %v4024_v47, %v4334_v61 }
 0x359   : > { %v4516_v6 = vadd.f32 0.01, %v1667_v13  ;;  %1840 = vmatpush.msra.mxu1 %v4330_v50  ;;  %1955 = vmatpush.msrb.mxu0 %v4336_v52  ;;  %v5443_v13 = vld [vmem:[#allocation74_spill] sm:$0xff] }
 0x35a   : > { %v1293_v14 = vpop.f32.mrf.mxu3  ;;  %v1409_v51 = vpop.f32.mrf.mxu2 }
 0x35b   : > { %v1294_v63 = vadd.f32 %v4149_v62, %v1293_v14  ;;  %v1410_v20 = vadd.f32 %v1409_v51, %v1390_v48  ;;  %v4524_v54 = vmul.f32 %v2486_v30, %v4516_v6  ;;  %1841 = vmatpush.msra.mxu1 %v4342_v2  ;;  %1956 = vmatpush.msrb.mxu0 %v4347_v5  ;;  %v4574_v48 = vld [vmem:[#allocation15 + $0x68] sm:$0xff]  ;;  %v4578_v14 = vld [vmem:[#allocation14 + $0x18] sm:$0xff]  ;;  %v4584_v51 = vld [vmem:[#allocation15 + $0x60] sm:$0xff] }
 0x35d   : > { %v1298_v42 = vmul.f32 %v1294_v63, %v4156_v57  ;;  %v1420_v43 = vmul.f32 %v1410_v20, %v4029_v22  ;;  %1842 = vmatpush.msra.mxu1 %v4350_v9  ;;  %1957 = vmatpush.msrb.mxu0 %v4353_v12  ;;  %v1568_v12 = vmul.f32 %v4007_v40, %v4372_v19  ;;  %v4569_v40 = vld [vmem:[#allocation14 + $0x20] sm:$0xff] }
 0x35f   : > { %v4531_v1 = vadd.f32 %v1298_v42, %v1297_v25  ;;  %v1421_v52 = vadd.f32 %v1420_v43, %v1419_v4  ;;  %1843 = vmatpush.msra.mxu1 %v4358_v10  ;;  %1958 = vmatpush.msrb.mxu0 %v4375_v28  ;;  %v4595_v25 = vld [vmem:[#allocation15 + $0x58] sm:$0xff]  ;;  %v4603_v42 = vld [vmem:[#allocation15 + $0x50] sm:$0xff]  ;;  %v4611_v4 = vld [vmem:[#allocation15 + $0x48] sm:$0xff] }
 0x360   : > { %v4620_v43 = vld [vmem:[#allocation15 + $0x38] sm:$0xff] }
 0x361   : > { %2475 = vst [vmem:[%s3652_s15 + $0x10] sm:$0xff] %v4531_v1  ;;  %1302 = vmax.xlane.f32.xlu1 %v4531_v1  ;;  %v4540_v30 = vsub.f32 %v1421_v52, %v4406_v7  ;;  %1844 = vmatpush.msra.mxu1 %v4369_v17  ;;  %v4556_v7 = vld [vmem:[#allocation15 + $0x78] sm:$0xff] }
 0x362   : > { %1959 = vmatpush.msrb.mxu0 %v4386_v36  ;;  %v4559_v36 = vld [vmem:[#allocation14 + $0x28] sm:$0xff]  ;;  %5445 = vst [vmem:[#allocation77_spill] sm:$0xff] %v4620_v43  ;;  %v5447_v52 = vld [vmem:[#allocation81_spill] sm:$0xff] }
 0x363   : > { %v1424_v61 = vsub.f32 %v4540_v30, %v4395_v33  ;;  %1845 = vmatpush.msra.mxu1 %v4378_v34  ;;  %v4565_v33 = vld [vmem:[#allocation15 + $0x70] sm:$0xff] }
 0x364   : > { %1960 = vmatpush.msrb.mxu0 %v4398_v8 }
 0x365   : > { %vm1425_vm8 = vcmp.gt.f32.partialorder %v1424_v61, 0.0  ;;  %1846 = vmatpush.msra.mxu1 %v4389_v49  ;;  %v5449_v61 = vld [vmem:[#allocation82_spill] sm:$0xff] }
 0x366   : > { %v2479_v5 = vsel %vm1425_vm8, 1.0, %v5362_v37  ;;  %2480 = vmatmul.msk.f32.vlgmr.msrb.gmra.mxu3 %vm1425_vm8, %v5363_v44  ;;  %2828 = vmatmul.msk.f32.vlgmr.msra.gmra.mxu2 %vm1425_vm8, %v5363_v44 }
 0x367   : > { %v1569_v28 = vmul.f32 %v2479_v5, %v4005_v55  ;;  %1741 = vmatpush.msrb.mxu3 %v4556_v7  ;;  %1847 = vmatpush.msra.mxu1 %v4559_v36 }
 0x368   : > { %1961 = vmatpush.msrb.mxu0 %v4409_v11  ;;  %1857 = vmatpush.msra.mxu2 %v5443_v13  ;;  %v5444_v11 = vld [vmem:[#allocation68_spill] sm:$0xff] }
 0x369   : > { %v4563_v8 = vadd.f32 %v1569_v28, %v1568_v12  ;;  %1742 = vmatpush.msrb.mxu3 %v4565_v33  ;;  %1848 = vmatpush.msra.mxu1 %v4569_v40  ;;  %v5451_v12 = vld [vmem:[#allocation83_spill] sm:$0xff] }
 0x36a   : > { %1962 = vmatpush.msrb.mxu0 %v4417_v18  ;;  %1858 = vmatpush.msra.mxu2 %v5444_v11  ;;  %v4588_v18 = vld [vmem:[#allocation14 + $0x10] sm:$0xff] }
 0x36b   : > { %v1571_v19 = vmul.f32 1.8, %v4563_v8  ;;  %1743 = vmatpush.msrb.mxu3 %v4574_v48  ;;  %1849 = vmatpush.msra.mxu1 %v4578_v14  ;;  %v5452_v28 = vld [vmem:[#allocation51_spill] sm:$0xff] }
 0x36c   : > { %1963 = vmatpush.msrb.mxu0 %v4425_v35  ;;  %1859 = vmatpush.msra.mxu2 %v4402_v53  ;;  %v4599_v35 = vld [vmem:[#allocation14 + $0x8] sm:$0xff] }
 0x36d   : > { %v4582_v63 = vadd.f32 0.01, %v1571_v19  ;;  %1744 = vmatpush.msrb.mxu3 %v4584_v51  ;;  %1850 = vmatpush.msra.mxu1 %v4588_v18  ;;  %v5453_v19 = vld [vmem:[#allocation84_spill] sm:$0xff] }
 0x36e   : > { %1964 = vmatpush.msrb.mxu0 %v4433_v41  ;;  %1860 = vmatpush.msra.mxu2 %v4413_v38  ;;  %v4607_v41 = vld [vmem:[#allocation14] sm:$0xff] }
 0x36f   : > { %v4593_v20 = vmul.f32 %v2479_v5, %v4582_v63  ;;  %1745 = vmatpush.msrb.mxu3 %v4595_v25  ;;  %1851 = vmatpush.msra.mxu1 %v4599_v35  ;;  %v5450_v5 = vld [vmem:[#allocation42_spill] sm:$0xff] }
 0x370   : > { %1965 = vmatpush.msrb.mxu0 %v4441_v15  ;;  %1861 = vmatpush.msra.mxu2 %v4421_v58  ;;  %v4616_v15 = vld [vmem:[#allocation15 + $0x40] sm:$0xff] }
 0x371   : > { %1746 = vmatpush.msrb.mxu3 %v4603_v42  ;;  %1852 = vmatpush.msra.mxu1 %v4607_v41 }
 0x372   : > { %1966 = vmatpush.msrb.mxu0 %v4449_v23  ;;  %1862 = vmatpush.msra.mxu2 %v4429_v21  ;;  %v5446_v23 = vld [vmem:[#allocation75_spill] sm:$0xff] }
 0x373   : > { %1747 = vmatpush.msrb.mxu3 %v4611_v4 }
 0x374   : > { %1967 = vmatpush.msrb.mxu0 %v4456_v31  ;;  %1863 = vmatpush.msra.mxu2 %v4437_v29  ;;  %v5448_v31 = vld [vmem:[#allocation76_spill] sm:$0xff] }
 0x375   : > { %1748 = vmatpush.msrb.mxu3 %v4616_v15 }
 0x376   : > { %1864 = vmatpush.msra.mxu2 %v4445_v0 }
 0x377   : > { %1749 = vmatpush.msrb.mxu3 %v4620_v43 }
 0x378   : > { %1865 = vmatpush.msra.mxu2 %v5446_v23  ;;  %v5456_v23 = vld [vmem:[#allocation43_spill] sm:$0xff] }
 0x379   : > { %1750 = vmatpush.msrb.mxu3 %v5410_v39  ;;  %v5455_v39 = vld [vmem:[#allocation85_spill] sm:$0xff] }
 0x37a   : > { %1866 = vmatpush.msra.mxu2 %v5448_v31  ;;  %v5458_v31 = vld [vmem:[#allocation54_spill] sm:$0xff] }
 0x37b   : > { %1751 = vmatpush.msrb.mxu3 %v5447_v52  ;;  %v5457_v52 = vld [vmem:[#allocation86_spill] sm:$0xff] }
 0x37c   : > { %1867 = vmatpush.msra.mxu2 %v5450_v5  ;;  %v2494_v5 = vld [vmem:[%s3622_s29 + $0x28] sm:$0xff] }
 0x37d   : > { %1752 = vmatpush.msrb.mxu3 %v5449_v61  ;;  %v5459_v61 = vld [vmem:[#allocation44_spill] sm:$0xff] }
 0x37e   : > { %1868 = vmatpush.msra.mxu2 %v5452_v28  ;;  %v4640_v28 = vld [vmem:[#allocation17] ss:$0 sm:$0xff] }
 0x37f   : > { %1753 = vmatpush.msrb.mxu3 %v5451_v12 }
 0x380   : > { %1869 = vmatpush.msra.mxu2 %v5454_v45 }
 0x381   : > { %1754 = vmatpush.msrb.mxu3 %v5453_v19  ;;  %v1670_v19 = vmul.f32 %v4640_v28, %v4490_v16  ;;  %v1819_v16 = vmul.f32 %v4500_v3, %v4507_v24 }
 0x382   : > { %1870 = vmatpush.msra.mxu2 %v5456_v23 }
 0x383   : > { %1755 = vmatpush.msrb.mxu3 %v5455_v39 }
 0x384   : > { %1871 = vmatpush.msra.mxu2 %v5458_v31 }
 0x385   : > { %1756 = vmatpush.msrb.mxu3 %v5457_v52 }
 0x386   : > { %1872 = vmatpush.msra.mxu2 %v5459_v61 }
 0x3cf   : > { %v1659_v12 = vpop.f32.mrf.mxu0 }
 0x3d0   : > { %v1662_v43 = vadd.f32 %v2494_v5, %v1659_v12  ;;  %v1544_v5 = vpop.f32.mrf.mxu1 }
 0x3d2   : > { %v1671_v45 = vmul.f32 %v1662_v43, %v3899_v56 }
 0x3d4   : > { %v1672_v39 = vadd.f32 %v1671_v45, %v1670_v19 }
 0x3d6   : > { %v4646_v23 = vsub.f32 %v1672_v39, %v4524_v54 }
 0x3d8   : > { %2501 = vst [vmem:[%s3650_s6 + $0x28] sm:$0xff] %v4646_v23  ;;  %v1675_v52 = vsub.f32 %v4646_v23, %v4516_v6 }
 0x3da   : > { %vm1676_vm9 = vcmp.gt.f32.partialorder %v1675_v52, 0.0  ;;  %v4759_v52 = vld [vmem:[#allocation15] sm:$0xff] }
 0x3db   : > { %v2495_v61 = vsel %vm1676_vm9, 1.0, %v5362_v37  ;;  %2496 = vmatmul.msk.f32.vlgmr.msrb.gmra.mxu1 %vm1676_vm9, %v5363_v44  ;;  %2829 = vmatmul.msk.f32.vlgmr.msra.gmra.mxu0 %vm1676_vm9, %v5363_v44 }
 0x3dc   : > { %2500 = vst [vmem:[%s3648_s2 + $0x28] sm:$0xff] %v2495_v61  ;;  %v1820_v45 = vmul.f32 %v2495_v61, %v3851_v59  ;;  %1992 = vmatpush.msrb.mxu1 %v4296_v26  ;;  %v1545_v26 = vadd.f32 %v5394_v46, %v1544_v5 }
 0x3de   : > { %v4660_v54 = vadd.f32 %v1820_v45, %v1819_v16  ;;  %1993 = vmatpush.msrb.mxu1 %v4307_v60  ;;  %v5467_v16 = vld [vmem:[#allocation44_spill] sm:$0xff] }
 0x3df   : > { %v2503_v45 = vld [vmem:[%s3622_s29 + $0x30] sm:$0xff] }
 0x3e0   : > { %v1822_v6 = vmul.f32 1.8, %v4660_v54  ;;  %1994 = vmatpush.msrb.mxu1 %v4319_v27 }
 0x3e2   : > { %v4665_v43 = vadd.f32 0.01, %v1822_v6  ;;  %1995 = vmatpush.msrb.mxu1 %v4330_v50  ;;  %v1452_v50 = vmul.f32 %v4151_v32, %v4531_v1 }
 0x3e4   : > { %v4669_v12 = vmul.f32 %v2495_v61, %v4665_v43  ;;  %1996 = vmatpush.msrb.mxu1 %v4342_v2  ;;  %v1574_v2 = vmul.f32 %v4024_v47, %v4540_v30 }
 0x3e6   : > { %1997 = vmatpush.msrb.mxu1 %v4350_v9 }
 0x3e8   : > { %1998 = vmatpush.msrb.mxu1 %v4358_v10 }
 0x3e9   : > { %v1448_v60 = vpop.f32.mrf.mxu3  ;;  %v1564_v19 = vpop.f32.mrf.mxu2 }
 0x3ea   : > { %v1449_v24 = vadd.f32 %v4149_v62, %v1448_v60  ;;  %v1565_v27 = vadd.f32 %v1564_v19, %v1545_v26  ;;  %1999 = vmatpush.msrb.mxu1 %v4369_v17  ;;  %v1825_v26 = vmul.f32 %v4640_v28, %v4646_v23 }
 0x3ec   : > { %v1453_v61 = vmul.f32 %v1449_v24, %v4156_v57  ;;  %v1575_v9 = vmul.f32 %v1565_v27, %v4029_v22  ;;  %2000 = vmatpush.msrb.mxu1 %v4378_v34  ;;  %v4701_v34 = vld [vmem:[#allocation21] ss:$0 sm:$0xff] }
 0x3ee   : > { %v4683_v46 = vadd.f32 %v1453_v61, %v1452_v50  ;;  %v1576_v39 = vadd.f32 %v1575_v9, %v1574_v2  ;;  %2001 = vmatpush.msrb.mxu1 %v4389_v49  ;;  %v1723_v49 = vmul.f32 %v4701_v34, %v4563_v8  ;;  %v1974_v50 = vmul.f32 %v4500_v3, %v4660_v54 }
 0x3f0   : > { %2484 = vst [vmem:[%s3652_s15 + $0x18] sm:$0xff] %v4683_v46  ;;  %1457 = vmax.xlane.f32.xlu1 %v4683_v46  ;;  %v4691_v10 = vsub.f32 %v1576_v39, %v4593_v20  ;;  %2002 = vmatpush.msrb.mxu1 %v4559_v36  ;;  %v4751_v20 = vld [vmem:[#allocation15 + $0x10] sm:$0xff]  ;;  %v4780_v39 = vld [vmem:[%s5359_s3] ss:$0 sm:$0xff] }
 0x3f2   : > { %v1579_v47 = vsub.f32 %v4691_v10, %v4582_v63  ;;  %2003 = vmatpush.msrb.mxu1 %v4569_v40  ;;  %v4747_v63 = vld [vmem:[#allocation15 + $0x18] sm:$0xff] }
 0x3f4   : > { %vm1580_vm10 = vcmp.gt.f32.partialorder %v1579_v47, 0.0  ;;  %2004 = vmatpush.msrb.mxu1 %v4578_v14  ;;  %v4739_v14 = vld [vmem:[#allocation15 + $0x28] sm:$0xff] }
 0x3f5   : > { %v2488_v17 = vsel %vm1580_vm10, 1.0, %v5362_v37  ;;  %2489 = vmatmul.msk.f32.vlgmr.msra.gmra.mxu3 %vm1580_vm10, %v5363_v44  ;;  %2830 = vmatmul.msk.f32.vlgmr.msrb.gmra.mxu2 %vm1580_vm10, %v5363_v44 }
 0x3f6   : > { %v1724_v30 = vmul.f32 %v2488_v17, %v4005_v55  ;;  %1896 = vmatpush.msra.mxu3 %v4556_v7  ;;  %2005 = vmatpush.msrb.mxu1 %v4588_v18  ;;  %v5465_v18 = vld [vmem:[#allocation71_spill] sm:$0xff] }
 0x3f7   : > { %2012 = vmatpush.msrb.mxu2 %v5443_v13 }
 0x3f8   : > { %v4709_v36 = vadd.f32 %v1724_v30, %v1723_v49  ;;  %1897 = vmatpush.msra.mxu3 %v4565_v33  ;;  %2006 = vmatpush.msrb.mxu1 %v4599_v35  ;;  %v5466_v35 = vld [vmem:[#allocation43_spill] sm:$0xff] }
 0x3f9   : > { %2013 = vmatpush.msrb.mxu2 %v5444_v11  ;;  %v4735_v11 = vld [vmem:[#allocation15 + $0x30] sm:$0xff] }
 0x3fa   : > { %v1726_v40 = vmul.f32 1.8, %v4709_v36  ;;  %1898 = vmatpush.msra.mxu3 %v4574_v48  ;;  %2007 = vmatpush.msrb.mxu1 %v4607_v41  ;;  %v4755_v41 = vld [vmem:[#allocation15 + $0x8] sm:$0xff] }
 0x3fb   : > { %2014 = vmatpush.msrb.mxu2 %v4402_v53  ;;  %v5460_v53 = vld [vmem:[#allocation77_spill] sm:$0xff] }
 0x3fc   : > { %v4718_v8 = vadd.f32 0.01, %v1726_v40  ;;  %1899 = vmatpush.msra.mxu3 %v4584_v51  ;;  %v4787_v40 = vld [vmem:[#allocation20] ss:$0 sm:$0xff] }
 0x3fd   : > { %2015 = vmatpush.msrb.mxu2 %v4413_v38  ;;  %v5461_v38 = vld [vmem:[#allocation75_spill] sm:$0xff] }
 0x3fe   : > { %v4723_v13 = vmul.f32 %v2488_v17, %v4718_v8  ;;  %1900 = vmatpush.msra.mxu3 %v4595_v25 }
 0x3ff   : > { %2016 = vmatpush.msrb.mxu2 %v4421_v58  ;;  %v5462_v58 = vld [vmem:[#allocation76_spill] sm:$0xff] }
 0x400   : > { %1901 = vmatpush.msra.mxu3 %v4603_v42 }
 0x401   : > { %2017 = vmatpush.msrb.mxu2 %v4429_v21  ;;  %v5463_v21 = vld [vmem:[#allocation42_spill] sm:$0xff] }
 0x402   : > { %1902 = vmatpush.msra.mxu3 %v4611_v4 }
 0x403   : > { %2018 = vmatpush.msrb.mxu2 %v4437_v29  ;;  %v4743_v29 = vld [vmem:[#allocation15 + $0x20] sm:$0xff] }
 0x404   : > { %1903 = vmatpush.msra.mxu3 %v4616_v15 }
 0x405   : > { %2019 = vmatpush.msrb.mxu2 %v4445_v0  ;;  %v5464_v0 = vld [vmem:[#allocation51_spill] sm:$0xff] }
 0x406   : > { %1904 = vmatpush.msra.mxu3 %v5460_v53 }
 0x407   : > { %2020 = vmatpush.msrb.mxu2 %v5461_v38  ;;  %v1729_v38 = vmul.f32 %v4787_v40, %v4691_v10  ;;  %v1878_v10 = vmul.f32 %v4701_v34, %v4709_v36 }
 0x408   : > { %1905 = vmatpush.msra.mxu3 %v4735_v11 }
 0x409   : > { %2021 = vmatpush.msrb.mxu2 %v5462_v58 }
 0x40a   : > { %1906 = vmatpush.msra.mxu3 %v4739_v14 }
 0x40b   : > { %2022 = vmatpush.msrb.mxu2 %v5463_v21 }
 0x40c   : > { %1907 = vmatpush.msra.mxu3 %v4743_v29 }
 0x40d   : > { %2023 = vmatpush.msrb.mxu2 %v5464_v0 }
 0x40e   : > { %1908 = vmatpush.msra.mxu3 %v4747_v63 }
 0x40f   : > { %2024 = vmatpush.msrb.mxu2 %v5465_v18 }
 0x410   : > { %1909 = vmatpush.msra.mxu3 %v4751_v20 }
 0x411   : > { %2025 = vmatpush.msrb.mxu2 %v5466_v35 }
 0x412   : > { %1910 = vmatpush.msra.mxu3 %v4755_v41 }
 0x413   : > { %2026 = vmatpush.msrb.mxu2 %v5458_v31 }
 0x414   : > { %1911 = vmatpush.msra.mxu3 %v4759_v52 }
 0x415   : > { %2027 = vmatpush.msrb.mxu2 %v5467_v16 }
 0x458   : > { %v1814_v6 = vpop.f32.mrf.mxu0 }
 0x459   : > { %v1817_v5 = vadd.f32 %v2503_v45, %v1814_v6 }
 0x45b   : > { %v1826_v60 = vmul.f32 %v1817_v5, %v3899_v56  ;;  %v4839_v5 = vld [vmem:[#allocation23] ss:$0 sm:$0xff] }
 0x45d   : > { %v1827_v24 = vadd.f32 %v1826_v60, %v1825_v26 }
 0x45f   : > { %v1829_v19 = vsub.f32 %v1827_v24, %v4669_v12 }
 0x461   : > { %2510 = vst [vmem:[%s3650_s6 + $0x30] sm:$0xff] %v1829_v19  ;;  %v1830_v31 = vsub.f32 %v1829_v19, %v4665_v43  ;;  %v1699_v43 = vpop.f32.mrf.mxu1 }
 0x462   : > { %v1700_v47 = vadd.f32 %v4780_v39, %v1699_v43 }
 0x463   : > { %vm1831_vm11 = vcmp.gt.f32.partialorder %v1830_v31, 0.0 }
 0x464   : > { %v2504_v27 = vsel %vm1831_vm11, 1.0, %v5362_v37  ;;  %2505 = vmatmul.msk.f32.vlgmr.msra.gmra.mxu1 %vm1831_vm11, %v5363_v44  ;;  %2831 = vmatmul.msk.f32.vlgmr.msrb.gmra.mxu0 %vm1831_vm11, %v5363_v44 }
 0x465   : > { %2509 = vst [vmem:[%s3648_s2 + $0x30] sm:$0xff] %v2504_v27  ;;  %v1975_v23 = vmul.f32 %v2504_v27, %v3851_v59  ;;  %v1607_v59 = vmul.f32 %v4151_v32, %v4683_v46 }
 0x467   : > { %v1976_v61 = vadd.f32 %v1975_v23, %v1974_v50 }
 0x469   : > { %v1977_v2 = vmul.f32 1.8, %v1976_v61  ;;  %1989 = vst [vmem:[#allocation4] sm:$0xff] %v1976_v61 }
 0x46b   : > { %v1978_v12 = vadd.f32 0.01, %v1977_v2 }
 0x46d   : > { %v1983_v9 = vmul.f32 %v2504_v27, %v1978_v12 }
 0x478   : > { %v1603_v17 = vpop.f32.mrf.mxu3  ;;  %v1719_v3 = vpop.f32.mrf.mxu2 }
 0x479   : > { %v1604_v49 = vadd.f32 %v4149_v62, %v1603_v17  ;;  %v1720_v54 = vadd.f32 %v1719_v3, %v1700_v47 }
 0x47b   : > { %v1608_v30 = vmul.f32 %v1604_v49, %v4156_v57  ;;  %v1730_v58 = vmul.f32 %v1720_v54, %v4029_v22 }
 0x47d   : > { %v4792_v21 = vadd.f32 %v1608_v30, %v1607_v59  ;;  %v1731_v0 = vadd.f32 %v1730_v58, %v1729_v38 }
 0x47f   : > { %2493 = vst [vmem:[%s3652_s15 + $0x20] sm:$0xff] %v4792_v21  ;;  %1612 = vmax.xlane.f32.xlu2 %v4792_v21  ;;  %v1733_v62 = vsub.f32 %v1731_v0, %v4723_v13  ;;  %v1762_v26 = vmul.f32 %v4839_v5, %v4792_v21 }
 0x481   : > { %v1734_v32 = vsub.f32 %v1733_v62, %v4718_v8 }
 0x483   : > { %vm1735_vm12 = vcmp.gt.f32.partialorder %v1734_v32, 0.0 }
 0x484   : > { %v2497_v18 = vsel %vm1735_vm12, 1.0, %v5362_v37  ;;  %2498 = vmatmul.msk.f32.vlgmr.msrb.gmra.mxu3 %vm1735_vm12, %v5363_v44  ;;  %2832 = vmatmul.msk.f32.vlgmr.msra.gmra.mxu2 %vm1735_vm12, %v5363_v44 }
 0x485   : > { %v1879_v35 = vmul.f32 %v2497_v18, %v4005_v55  ;;  %2051 = vmatpush.msrb.mxu3 %v4556_v7  ;;  %v2512_v7 = vld [vmem:[%s3622_s29 + $0x38] sm:$0xff]  ;;  %s2103_s29 = sand.u32 1, %s3477_s18  }
 0x486   : > { %s4901_s17 = scalar_lea.sflag [#allocation29], %s2103_s29 }
 0x487   : > { %v4806_v16 = vadd.f32 %v1879_v35, %v1878_v10  ;;  %2052 = vmatpush.msrb.mxu3 %v4565_v33 }
 0x489   : > { %v1881_v8 = vmul.f32 1.8, %v4806_v16  ;;  %2053 = vmatpush.msrb.mxu3 %v4574_v48  ;;  %v2033_v17 = vmul.f32 %v4701_v34, %v4806_v16 }
 0x48b   : > { %v1882_v13 = vadd.f32 0.01, %v1881_v8  ;;  %2054 = vmatpush.msrb.mxu3 %v4584_v51  ;;  %v1980_v51 = vmul.f32 %v4640_v28, %v1829_v19  ;;  %v1884_v19 = vmul.f32 %v4787_v40, %v1733_v62 }
 0x48d   : > { %v1887_v45 = vmul.f32 %v2497_v18, %v1882_v13  ;;  %2055 = vmatpush.msrb.mxu3 %v4595_v25 }
 0x48f   : > { %2056 = vmatpush.msrb.mxu3 %v4603_v42 }
 0x491   : > { %2057 = vmatpush.msrb.mxu3 %v4611_v4 }
 0x493   : > { %2058 = vmatpush.msrb.mxu3 %v4616_v15 }
 0x495   : > { %2059 = vmatpush.msrb.mxu3 %v5460_v53  ;;  %v1148_v53 = vpop.xlane.xlu0 %1147 }
 0x497   : > { %2060 = vmatpush.msrb.mxu3 %v4735_v11  ;;  %v1303_v11 = vpop.xlane.xlu1 %1302 }
 0x498   : > { %v1304_v0 = vsub.f32 %v4531_v1, %v1303_v11 }
 0x499   : > { %2061 = vmatpush.msrb.mxu3 %v4739_v14 }
 0x49a   : > { %v1305_v16 = vmul.f32 1.442695, %v1304_v0 }
 0x49b   : > { %2062 = vmatpush.msrb.mxu3 %v4743_v29  ;;  %v5468_v29 = vld [vmem:[#allocation72_spill] sm:$0xff] }
 0x49d   : > { %2063 = vmatpush.msrb.mxu3 %v4747_v63  ;;  %v1149_v63 = vsub.f32 %v5468_v29, %v1148_v53 }
 0x49f   : > { %2064 = vmatpush.msrb.mxu3 %v4751_v20  ;;  %v4836_v20 = vld [vmem:[%s5393_s21] ss:$0 sm:$0xff]  ;;  %v1150_v24 = vmul.f32 1.442695, %v1149_v63  ;;  %v1458_v27 = vpop.xlane.xlu1 %1457 }
 0x4a0   : > { %v1459_v61 = vsub.f32 %v4683_v46, %v1458_v27 }
 0x4a1   : > { %2065 = vmatpush.msrb.mxu3 %v4755_v41  ;;  %2719 = vpow2.f32 %v1150_v24 }
 0x4a3   : > { %2066 = vmatpush.msrb.mxu3 %v4759_v52 }
 0x4a7   : > { %v4850_v47 = vpop.eup %2719 }
 0x4e1   : > { %v1969_v33 = vpop.f32.mrf.mxu0  ;;  %v1854_v14 = vpop.f32.mrf.mxu1 }
 0x4e2   : > { %v1972_v48 = vadd.f32 %v2512_v7, %v1969_v33 }
 0x4e4   : > { %v1981_v25 = vmul.f32 %v1972_v48, %v3899_v56  ;;  %v1855_v56 = vadd.f32 %v4780_v39, %v1854_v14 }
 0x4e6   : > { %v1982_v42 = vadd.f32 %v1981_v25, %v1980_v51 }
 0x4e8   : > { %v1984_v4 = vsub.f32 %v1982_v42, %v1983_v9  ;;  %v1460_v9 = vmul.f32 1.442695, %v1459_v61 }
 0x4ea   : > { %1990 = vst [vmem:[#allocation2] sm:$0xff] %v1984_v4  ;;  %v1985_v15 = vsub.f32 %v1984_v4, %v1978_v12  ;;  %2721 = vpow2.f32 %v1460_v9 }
 0x4eb   : > { %2519 = vst [vmem:[%s3650_s6 + $0x38] sm:$0xff] %v1984_v4  ;;  %2723 = vpow2.f32 %v1305_v16 }
 0x4ec   : > { %vm1986_vm13 = vcmp.gt.f32.partialorder %v1985_v15, 0.0 }
 0x4ed   : > { %v2513_v36 = vsel %vm1986_vm13, 1.0, %v5362_v37  ;;  %2514 = vmatmul.msk.f32.vlgmr.msrb.gmra.mxu1 %vm1986_vm13, %v5363_v44 }
 0x4ee   : > { %1991 = vst [vmem:[#allocation3] sm:$0xff] %v2513_v36 }
 0x4ef   : > { %2518 = vst [vmem:[%s3648_s2 + $0x38] sm:$0xff] %v2513_v36  ;;  %s3184_s2 = scalar_lea.hbm %s5469_s16, 128 }
 0x4f0   : > { %v4857_v59 = vpop.eup %2721  ;;  %p3186_p0 = scmp.lt.s32.totalorder %s3184_s2, %s3180_s9 }
 0x4f1   : > { %v4870_v42 = vpop.eup %2723 }
 0x4f2   : > { %v1613_v38 = vpop.xlane.xlu2 %1612  ;;  %p3187_p9 = por %p3186_p0, %p3185_p13 }
 0x4f4   : > { %p3188_p10 = pnand %p3187_p9, %p3183_p6 }
 0x507   : > { %v1758_v28 = vpop.f32.mrf.mxu3  ;;  %v1874_v52 = vpop.f32.mrf.mxu2 }
 0x508   : > { %v1759_v41 = vadd.f32 %v4836_v20, %v1758_v28  ;;  %v1875_v6 = vadd.f32 %v1874_v52, %v1855_v56 }
 0x50a   : > { %v1763_v60 = vmul.f32 %v1759_v41, %v4156_v57  ;;  %v1885_v31 = vmul.f32 %v1875_v6, %v4029_v22 }
 0x50c   : > { %v1764_v50 = vadd.f32 %v1763_v60, %v1762_v26  ;;  %v1886_v23 = vadd.f32 %v1885_v31, %v1884_v19 }
 0x50e   : > { %2502 = vst [vmem:[%s3652_s15 + $0x28] sm:$0xff] %v1764_v50  ;;  %1767 = vmax.xlane.f32.xlu2 %v1764_v50  ;;  %v1888_v2 = vsub.f32 %v1886_v23, %v1887_v45  ;;  %v1917_v10 = vmul.f32 %v4839_v5, %v1764_v50 }
 0x510   : > { %v1889_v12 = vsub.f32 %v1888_v2, %v1882_v13  ;;  %v2039_v8 = vmul.f32 %v4787_v40, %v1888_v2 }
 0x512   : > { %vm1890_vm14 = vcmp.gt.f32.partialorder %v1889_v12, 0.0 }
 0x513   : > { %v2506_v43 = vsel %vm1890_vm14, 1.0, %v5362_v37  ;;  %2507 = vmatmul.msk.f32.vlgmr.msra.gmra.mxu3 %vm1890_vm14, %v5363_v44  ;;  %2833 = vmatmul.msk.f32.vlgmr.msrb.gmra.mxu2 %vm1890_vm14, %v5363_v44 }
 0x514   : > { %v2034_v49 = vmul.f32 %v2506_v43, %v4005_v55 }
 0x516   : > { %1152 = vadd.xlane.f32.xlu2 %v4850_v47  ;;  %v2035_v46 = vadd.f32 %v2034_v49, %v2033_v17 }
 0x518   : > { %v2036_v3 = vmul.f32 1.8, %v2035_v46  ;;  %2048 = vst [vmem:[#allocation7] sm:$0xff] %v2035_v46 }
 0x51a   : > { %v2037_v54 = vadd.f32 0.01, %v2036_v3 }
 0x51c   : > { %v2042_v30 = vmul.f32 %v2506_v43, %v2037_v54 }
 0x51e   : > { %1462 = vadd.xlane.f32.xlu2 %v4857_v59 }
 0x56a   : > { %v2009_v58 = vpop.f32.mrf.mxu1 }
 0x56b   : > { %v2010_v34 = vadd.f32 %v4780_v39, %v2009_v58 }
 0x581   : > { %v1768_v45 = vpop.xlane.xlu2 %1767 }
 0x582   : > { %v1769_v1 = vsub.f32 %v1764_v50, %v1768_v45 }
 0x584   : > { %v1770_v51 = vmul.f32 1.442695, %v1769_v1 }
 0x586   : > { %2725 = vpow2.f32 %v1770_v51 }
 0x596   : > { %v1913_v55 = vpop.f32.mrf.mxu3  ;;  %v2029_v32 = vpop.f32.mrf.mxu2 }
 0x597   : > { %v1914_v62 = vadd.f32 %v4836_v20, %v1913_v55  ;;  %v2030_v18 = vadd.f32 %v2029_v32, %v2010_v34 }
 0x599   : > { %v1918_v35 = vmul.f32 %v1914_v62, %v4156_v57  ;;  %v2040_v13 = vmul.f32 %v2030_v18, %v4029_v22  ;;  %v4873_v22 = vpop.eup %2725 }
 0x59b   : > { %v1919_v7 = vadd.f32 %v1918_v35, %v1917_v10  ;;  %v2041_v33 = vadd.f32 %v2040_v13, %v2039_v8 }
 0x59d   : > { %2511 = vst [vmem:[%s3652_s15 + $0x30] sm:$0xff] %v1919_v7  ;;  %1922 = vmax.xlane.f32.xlu1 %v1919_v7  ;;  %v2043_v39 = vsub.f32 %v2041_v33, %v2042_v30  ;;  %v2072_v11 = vmul.f32 %v4839_v5, %v1919_v7 }
 0x59f   : > { %2049 = vst [vmem:[#allocation5] sm:$0xff] %v2043_v39  ;;  %v2044_v48 = vsub.f32 %v2043_v39, %v2037_v54 }
 0x5a1   : > { %vm2045_vm15 = vcmp.gt.f32.partialorder %v2044_v48, 0.0 }
 0x5a2   : > { %v2515_v25 = vsel %vm2045_vm15, 1.0, %v5362_v37  ;;  %2516 = vmatmul.msk.f32.vlgmr.msrb.gmra.mxu3 %vm2045_vm15, %v5363_v44  ;;  %v1614_v37 = vsub.f32 %v4792_v21, %v1613_v38  ;;  %v4887_v21 = vpop.xlane.xlu0 %1000 }
 0x5a3   : > { %2050 = vst [vmem:[#allocation6] sm:$0xff] %v2515_v25 }
 0x5a4   : > { %v1615_v29 = vmul.f32 1.442695, %v1614_v37 }
 0x5a5   : > { %1307 = vadd.xlane.f32.xlu1 %v4870_v42 }
 0x5ad   : > { %1772 = vadd.xlane.f32.xlu1 %v4873_v22 }
 0x610   : > { %v1923_v40 = vpop.xlane.xlu1 %1922 }
 0x611   : > { %v1924_v4 = vsub.f32 %v1919_v7, %v1923_v40 }
 0x613   : > { %v1925_v15 = vmul.f32 1.442695, %v1924_v4 }
 0x615   : > { %2727 = vpow2.f32 %v1925_v15 }
 0x616   : > { %2729 = vpow2.f32 %v1615_v29 }
 0x61b   : > { %v4876_v36 = vpop.eup %2727 }
 0x61c   : > { %1927 = vadd.xlane.f32.xlu2 %v4876_v36  ;;  %v4884_v56 = vpop.eup %2729 }
 0x625   : > { %v2068_v44 = vpop.f32.mrf.mxu3 }
 0x626   : > { %v2069_v53 = vadd.f32 %v4836_v20, %v2068_v44 }
 0x628   : > { %v2073_v14 = vmul.f32 %v2069_v53, %v4156_v57 }
 0x62a   : > { %v2074_v63 = vadd.f32 %v2073_v14, %v2072_v11 }
 0x62c   : > { %2075 = vst [vmem:[#allocation8] sm:$0xff] %v2074_v63  ;;  %2077 = vmax.xlane.f32.xlu0 %v2074_v63 }
 0x62d   : > { %2520 = vst [vmem:[%s3652_s15 + $0x38] sm:$0xff] %v2074_v63 }
 0x634   : > { %1617 = vadd.xlane.f32.xlu0 %v4884_v56 }
 0x69f   : > { %v2078_v28 = vpop.xlane.xlu0 %2077 }
 0x6a0   : > { %v2079_v20 = vsub.f32 %v2074_v63, %v2078_v28 }
 0x6a2   : > { %v2080_v41 = vmul.f32 1.442695, %v2079_v20 }
 0x6a4   : > { %2731 = vpow2.f32 %v2080_v41 }
 0x6aa   : > { %v4898_v57 = vpop.eup %2731 }
 0x6ab   : > { %2082 = vadd.xlane.f32.xlu0 %v4898_v57 }
 0x6ac   : > { %3191 = shalt.err (!%p3188_p10)
}
 0x6ad   : > { %s3360_s29 = smov 128   ;;  %s3361_s10 = smov 8  }
 0x6ae   : > { %2582 = dma.vmem_to_hbm [thread:$0]  (%p3584_p7), %s2139_s23, 1024, %s2141_s1, %s4901_s17, %s3360_s29, %s3360_s29, %s3361_s10  }
 0x6af   : > { %s5470_s28 = sld [smem:[#allocation103_spill]]  ;;  %s2155_s2 = sshll.u32 %s3650_s6, 4  ;;  %s2156_s2 = int_to_ptr.vmem [resolvable:$true] %s2155_s2 }
 0x6b5   : > { %s2154_s8 = scalar_lea.hbm %s5470_s28, %s4891_s19  ;;  %s3212_s14 = scalar_lea.hbm %s5470_s28, 128 }
 0x6b6   : > { %s2157_s9 = sshll.u32 %s2154_s8, 4  ;;  %s2158_s9 = int_to_ptr.hbm [resolvable:$true] %s2157_s9 }
 0x6b7   : > { %s3206_s30 = sshra.s32 %s2158_s9, 4  ;;  %s3207_s30 = int_to_ptr.hbm [resolvable:$true] %s3206_s30 }
 0x6b8   : > { %s3208_s11 = scalar_lea.hbm %s3207_s30, 64  ;;  %p3213_p5 = scmp.lt.s32.totalorder %s3207_s30, %s5470_s28 }
 0x6b9   : > { %p3209_p11 = scmp.ne.s32.totalorder %s3207_s30, %s3208_s11  ;;  %p3214_p3 = scmp.lt.s32.totalorder %s3212_s14, %s3208_s11 }
 0x6bb   : > { %p3210_p2 = pnand %p3209_p11, %p3584_p7  ;;  %p3215_p1 = por %p3214_p3, %p3213_p5 }
 0x6bd   : > { %p3211_p12 = pneg %p3210_p2 }
 0x6bf   : > { %p3216_p4 = pnand %p3215_p1, %p3211_p12 }
 0x6c1   : > { %3219 = shalt.err (!%p3216_p4)
}
 0x6c2   : > { %2583 = dma.vmem_to_hbm [thread:$0]  (%p3584_p7), %s2156_s2, 1024, %s2158_s9, %s4901_s17, %s3360_s29, %s3360_s29, %s3361_s10  }
 0x6c3   : > { %s5471_s6 = sld [smem:[#allocation104_spill]]  ;;  %s2172_s5 = sshll.u32 %s3652_s15, 4  ;;  %s2173_s5 = int_to_ptr.vmem [resolvable:$true] %s2172_s5 }
 0x6c4   : > { %s2114_s14 = scalar_lea.sflag [#allocation32], %s3618_s4 }
 0x6c9   : > { %s2171_s3 = scalar_lea.hbm %s5471_s6, %s4891_s19  ;;  %s3240_s17 = scalar_lea.hbm %s5471_s6, 128 }
 0x6ca   : > { %s2174_s11 = sshll.u32 %s2171_s3, 4  ;;  %s2175_s11 = int_to_ptr.hbm [resolvable:$true] %s2174_s11 }
 0x6cb   : > { %s3234_s8 = sshra.s32 %s2175_s11, 4  ;;  %s3235_s8 = int_to_ptr.hbm [resolvable:$true] %s3234_s8 }
 0x6cc   : > { %s3236_s30 = scalar_lea.hbm %s3235_s8, 64  ;;  %p3241_p9 = scmp.lt.s32.totalorder %s3235_s8, %s5471_s6 }
 0x6cd   : > { %p3237_p6 = scmp.ne.s32.totalorder %s3235_s8, %s3236_s30  ;;  %p3242_p10 = scmp.lt.s32.totalorder %s3240_s17, %s3236_s30 }
 0x6cf   : > { %p3238_p13 = pnand %p3237_p6, %p3584_p7  ;;  %p3243_p11 = por %p3242_p10, %p3241_p9 }
 0x6d1   : > { %p3239_p0 = pneg %p3238_p13 }
 0x6d3   : > { %p3244_p2 = pnand %p3243_p11, %p3239_p0 }
 0x6d5   : > { %3247 = shalt.err (!%p3244_p2)
}
 0x6d6   : > { %2584 = dma.vmem_to_hbm [thread:$0]  (%p3584_p7), %s2173_s5, 1024, %s2175_s11, %s2114_s14, %s3360_s29, %s3360_s29, %s3361_s10   ;;  %v1153_v52 = vpop.xlane.xlu2 %1152  ;;  %2733 = vrcp.f32 %v4887_v21  ;;  %v1308_v6 = vpop.xlane.xlu1 %1307  ;;  %v5481_v19 = vld [vmem:[#allocation73_spill] sm:$0xff] }
 0x6d7   : > { %s4956_s4 = sshll.u32 %s3477_s18, 3  ;;  %2735 = vrcp.f32 %v1153_v52  ;;  %v1618_v60 = vpop.xlane.xlu0 %1617  ;;  %v1010_v43 = vld [vmem:[#allocation27] sm:$0xff] }
 0x6d8   : > { %p1004_p12 = scmp.gt.s32.totalorder %s4956_s4, 10  ;;  %p1005_p5 = scmp.lt.s32.totalorder %s4956_s4, 16  ;;  %2737 = vrcp.f32 %v1308_v6 }
 0x6d9   : > { %s1146_s15 = sadd.s32 1, %s4956_s4  ;;  %s1301_s29 = sadd.s32 2, %s4956_s4 }
 0x6da   : > { %p4961_p3 = pnand %p1005_p5, %p1004_p12  ;;  %p4965_p1 = scmp.gt.s32.totalorder %s1146_s15, 10 }
 0x6db   : > { %p4969_p7 = scmp.lt.s32.totalorder %s1146_s15, 16  ;;  %s1456_s13 = sadd.s32 3, %s4956_s4 }
 0x6dc   : > { %s2457_s12 = scalar_select %p4961_p3, 0, 1  ;;  %v2734_v5 = vpop.eup %2733 }
 0x6dd   : > { %p4977_p4 = scmp.gt.s32.totalorder %s1301_s29, 10  ;;  %p4981_p6 = scmp.lt.s32.totalorder %s1301_s29, 16  ;;  %v2736_v24 = vpop.eup %2735  ;;  %v1003_v31 = vmul.f32 %v2734_v5, %v5481_v19 }
 0x6de   : > { %p1158_p13 = pnand %p4969_p7, %p4965_p1  ;;  %p4989_p0 = scmp.gt.s32.totalorder %s1456_s13, 10  ;;  %v1463_v26 = vpop.xlane.xlu2 %1462  ;;  %v2738_v27 = vpop.eup %2737  ;;  %v1155_v23 = vmul.f32 %v2736_v24, %v4850_v47 }
 0x6df   : > { %p4994_p9 = scmp.lt.s32.totalorder %s1456_s13, 16  ;;  %s1611_s8 = sadd.s32 4, %s4956_s4  ;;  %2739 = vrcp.f32 %v1463_v26  ;;  %v1310_v12 = vmul.f32 %v2738_v27, %v4870_v42  ;;  %v1773_v9 = vpop.xlane.xlu1 %1772 }
 0x6e0   : > { %p1313_p10 = pnand %p4981_p6, %p4977_p4  ;;  %p5003_p11 = scmp.gt.s32.totalorder %s1611_s8, 10  ;;  %2741 = vrcp.f32 %v1618_v60 }
 0x6e1   : > { %s2463_s30 = scalar_select %p1158_p13, 0, 1  ;;  %2743 = vrcp.f32 %v1773_v9 }
 0x6e2   : > { %p5007_p2 = scmp.lt.s32.totalorder %s1611_s8, 16  ;;  %p1468_p12 = pnand %p4994_p9, %p4989_p0 }
 0x6e3   : > { %s2472_s17 = scalar_select %p1313_p10, 0, 1 }
 0x6e4   : > { %s1009_s9 = scvt.s32.f32 %s2457_s12  ;;  %s1766_s2 = sadd.s32 5, %s4956_s4 }
 0x6e5   : > { %s1161_s15 = scvt.s32.f32 %s2463_s30  ;;  %p1623_p5 = pnand %p5007_p2, %p5003_p11  ;;  %v2740_v47 = vpop.eup %2739 }
 0x6e6   : > { %s5020_s19 = scalar_select %p1468_p12, 0, 1  ;;  %v1011_v50 = vstv %s1009_s9  ;;  %v2742_v46 = vpop.eup %2741  ;;  %v1928_v30 = vpop.xlane.xlu2 %1927  ;;  %v1465_v58 = vmul.f32 %v2740_v47, %v4857_v59 }
 0x6e7   : > { %p5023_p3 = scmp.gt.s32.totalorder %s1766_s2, 10  ;;  %p5027_p1 = scmp.lt.s32.totalorder %s1766_s2, 16  ;;  %v1163_v61 = vstv %s1161_s15  ;;  %v1012_v2 = vmul.f32 %v1011_v50, %v1003_v31  ;;  %v1620_v0 = vmul.f32 %v2742_v46, %v4884_v56  ;;  %2745 = vrcp.f32 %v1928_v30  ;;  %v2744_v32 = vpop.eup %2743 }
 0x6e8   : > { %s1316_s29 = scvt.s32.f32 %s2472_s17  ;;  %s1921_s12 = sadd.s32 6, %s4956_s4  ;;  %v1164_v49 = vmul.f32 %v1163_v61, %v1155_v23  ;;  %v1775_v35 = vmul.f32 %v2744_v32, %v4873_v22 }
 0x6e9   : > { %s5038_s13 = scalar_select %p1623_p5, 0, 1  ;;  %v1013_v3 = vadd.f32 %v1012_v2, %v1010_v43 }
 0x6ea   : > { %p1778_p7 = pnand %p5027_p1, %p5023_p3  ;;  %s2076_s3 = sadd.s32 7, %s4956_s4  ;;  %v1318_v17 = vstv %s1316_s29 }
 0x6eb   : > { %p5046_p4 = scmp.gt.s32.totalorder %s1921_s12, 10  ;;  %p5050_p6 = scmp.lt.s32.totalorder %s1921_s12, 16  ;;  %v1319_v54 = vmul.f32 %v1318_v17, %v1310_v12  ;;  %v1165_v38 = vadd.f32 %v1164_v49, %v1013_v3 }
 0x6ec   : > { %s1471_s14 = scvt.s32.f32 %s5020_s19  ;;  %s1626_s8 = scvt.s32.f32 %s5038_s13 }
 0x6ed   : > { %p5056_p13 = scmp.gt.s32.totalorder %s2076_s3, 10  ;;  %p5060_p0 = scmp.lt.s32.totalorder %s2076_s3, 16  ;;  %v1320_v62 = vadd.f32 %v1319_v54, %v1165_v38  ;;  %v2746_v59 = vpop.eup %2745 }
 0x6ee   : > { %s2499_s23 = scalar_select %p1778_p7, 0, 1  ;;  %v1473_v34 = vstv %s1471_s14  ;;  %v1628_v55 = vstv %s1626_s8  ;;  %v1930_v33 = vmul.f32 %v2746_v59, %v4876_v36 }
 0x6ef   : > { %p1933_p9 = pnand %p5050_p6, %p5046_p4  ;;  %p2088_p10 = pnand %p5060_p0, %p5056_p13  ;;  %v1474_v18 = vmul.f32 %v1473_v34, %v1465_v58  ;;  %v1629_v10 = vmul.f32 %v1628_v55, %v1620_v0 }
 0x6f0   : > { %s1781_s1 = scvt.s32.f32 %s2499_s23  ;;  %s3362_s19 = smov [#allocation27]  }
 0x6f1   : > { %s2508_s17 = scalar_select %p1933_p9, 0, 1  ;;  %v1475_v8 = vadd.f32 %v1474_v18, %v1320_v62 }
 0x6f2   : > { %s2517_s9 = scalar_select %p2088_p10, 0, 1  ;;  %v1783_v13 = vstv %s1781_s1 }
 0x6f3   : > { %s1936_s2 = scvt.s32.f32 %s2508_s17  ;;  %v1630_v45 = vadd.f32 %v1629_v10, %v1475_v8  ;;  %v1784_v7 = vmul.f32 %v1783_v13, %v1775_v35  ;;  %s2124_s0 = sshll.u32 %s3362_s19, 4  ;;  %s2125_s0 = int_to_ptr.vmem [resolvable:$true] %s2124_s0 }
 0x6f4   : > { %s2091_s15 = scvt.s32.f32 %s2517_s9  ;;  %s5488_s12 = sld [smem:[#allocation101_spill]] }
 0x6f5   : > { %v1938_v1 = vstv %s1936_s2  ;;  %v1785_v39 = vadd.f32 %v1784_v7, %v1630_v45  ;;  %p5489_p11 = scmp.eq.s32.totalorder %s3477_s18, 1 }
 0x6f6   : > { %v2093_v51 = vstv %s2091_s15  ;;  %v1939_v25 = vmul.f32 %v1938_v1, %v1930_v33 }
 0x6f7   : > { %p5490_p2 = pmov %p5489_p11 }
 0x6f8   : > { %v1940_v22 = vadd.f32 %v1939_v25, %v1785_v39 }
 0x6fa   : > { %s2126_s13 = sshll.u32 %s5488_s12, 4  ;;  %s2127_s13 = int_to_ptr.hbm [resolvable:$true] %s2126_s13 }
 0x71e   : > { %v2083_v16 = vpop.xlane.xlu0 %2082 }
 0x71f   : > { %2747 = vrcp.f32 %v2083_v16 }
 0x725   : > { %v2748_v48 = vpop.eup %2747 }
 0x726   : > { %v2085_v42 = vmul.f32 %v2748_v48, %v4898_v57 }
 0x728   : > { %v2094_v40 = vmul.f32 %v2093_v51, %v2085_v42 }
 0x72a   : > { %v2095_v4 = vadd.f32 %v2094_v40, %v1940_v22 }
 0x72c   : > { %2096 = vst [vmem:[#allocation27] sm:$0xff] %v2095_v4 }
 0x72d   : > { %2581 = dma.vmem_to_hbm [thread:$0]  (%p5489_p11), %s2125_s0, 128, %s2127_s13, [#allocation11]  }
 0x72e   : > { %3317 = dma.done.wait (%p5490_p2), [#allocation11], 128   ;;  %p5491_p12 = pmov %p5490_p2 }
 0x730   : > { %3319 = vsyncadd (%p5491_p12), [#allocation11], 4294967168 }
 0x731 PF: > { %s5492_s3 = sadd.s32 4294967294, %s3342_s27   ;;  %p5493_p5 = scmp.ge.s32.totalorder %s3342_s27, 2 }
 0x732   : > { %s2194_s5 = sand.u32 1, %s5492_s3  }
 0x733   : > { %p2626_p3 = pnand %p5493_p5, %p3588_p8  ;;  %s2195_s11 = scalar_lea.sflag [#allocation29], %s2194_s5 }
 0x735   : > { %p2627_p1 = pneg %p2626_p3 }
 0x737   : > { %3321 = dma.done.wait (%p2627_p1), %s2195_s11, 2048  }
 0x738   : > { %3323 = vsyncadd (%p2627_p1), %s2195_s11, 4294965248  ;;  %s2214_s14 = sand.u32 1, %s3330_s24  }
 0x739   : > { %s2215_s8 = scalar_lea.sflag [#allocation32], %s2214_s14 }
 0x73a   : > { %3325 = dma.done.wait (%p2627_p1), %s2215_s8, 1024  }
 0x73b   : > { %3327 = vsyncadd (%p2627_p1), %s2215_s8, 4294966272  ;;  %p40_p7 = scmp.ge.s32.totalorder %s3554_s22, 4   ;;  %s5494_s24 = smov %s3334_s25 }
 0x73c   : > { %s5495_s25 = smov %s3338_s26  ;;  %s5496_s26 = smov %s3565_s7 }
 0x73d   : > { %s5497_s27 = smov %s3554_s22  ;;  %42 = sbr.rel (!%p40_p7) target bundleno = 32 (0x20), region = 234 }
 0x742   :  { %2221 = vsyncpa [#allocation10], 1 }
 0x743   :  { %2223 = vsyncpa [#allocation10 + $0x1], 1 }
 0x744   :  { %2224 = vsyncpa [#allocation13], 1 }
 0x745   :  { %2225 = vsyncpa [#allocation16], 1 }
 0x746   :  { %2226 = vsyncpa [#allocation19], 1 }
 0x747   :  { %2227 = vsyncpa [#allocation22], 1 }
 0x748   :  { %2228 = vsyncpa [#allocation25], 1 }
 0x749   :  { %2229 = vsyncpa [#allocation11], 1 }
 0x74a   :  { %2231 = vsyncpa [#allocation11 + $0x1], 1 }
 0x74b   :  { %2232 = vsyncpa [#allocation29], 1 }
 0x74c   :  { %2234 = vsyncpa [#allocation29 + $0x1], 1 }
 0x74d   :  { %2235 = vsyncpa [#allocation32], 1 }
 0x74e   :  { %2237 = vsyncpa [#allocation32 + $0x1], 1 }

</bundles_post_ra>
